<compile_context>
chip_gen: v6e
topology: v6e:2x2x1
jax: 0.10.0
libtpu: 0.0.40
codegen_flags: <defaults>
</compile_context>

<pallas_src>
import jax
import jax.numpy as jnp
from jax import lax
from jax.experimental import pallas as pl
from jax.experimental.pallas import tpu as pltpu


def _tree_lstm_kernel(tree_ref, tl_ref, tr_ref, xw_ref, ulr_ref, hc_ref):
    """One batch row: full T-step tree recurrence with the (S, 2H) h|c state resident."""
    S = hc_ref.shape[1]
    H = hc_ref.shape[2] // 2
    T = tree_ref.shape[1]

    iota_d = lax.broadcasted_iota(jnp.int32, (S, S), 0)   # varies along dim 0 (source slot)

    def step(t, hc):                                       # hc: (S, 2H) f32 state [h | c]
        tgt = tree_ref[0, t]      # (1, S) int32: slot updated this step (0 = inactive)
        idx_l = tl_ref[0, t]      # (1, S) int32: left-child slot  (0 = zero-state child)
        idx_r = tr_ref[0, t]      # (1, S) int32: right-child slot

        # Fused left+right child gather: ONE f32 one-hot matmul (exact selection, the
        # state is never re-quantized).  Result rows 0:S = left child, S:2S = right.
        oh_lr = jnp.concatenate(
            [(iota_d == idx_l).astype(jnp.float32),
             (iota_d == idx_r).astype(jnp.float32)], axis=1)           # (S, 2S)
        dn = (((0,), (0,)), ((), ()))                                   # contract dim 0 of both
        hc_lr = lax.dot_general(oh_lr, hc, dn,
                                preferred_element_type=jnp.float32)    # (2S, 2H)
        hc_l, hc_r = hc_lr[:S], hc_lr[S:]
        c_l, c_r = hc_l[:, H:], hc_r[:, H:]

        # Fused recurrence projection: [h_l | h_r] (S, 2H) @ U_lr (2H, 5H) -> (S, 5H).
        # K = 2H fills the 256-wide MXU; bf16 operands, f32 accumulation.
        h_lr = jnp.concatenate([hc_l[:, :H], hc_r[:, :H]], axis=1).astype(jnp.bfloat16)
        hu = jnp.dot(h_lr, ulr_ref[...], preferred_element_type=jnp.float32)   # (S, 5H)

        xw = xw_ref[0]            # (S, 4H) f32, gate order [i|o|u|f_x], bias folded in
        i_g = jax.nn.sigmoid(xw[:, 0:H]         + hu[:, 0:H])
        o_g = jax.nn.sigmoid(xw[:, H:2 * H]     + hu[:, H:2 * H])
        u_g = jnp.tanh(      xw[:, 2 * H:3 * H] + hu[:, 2 * H:3 * H])
        f_x = xw[:, 3 * H:4 * H]
        f_l = jax.nn.sigmoid(f_x + hu[:, 3 * H:4 * H])
        f_r = jax.nn.sigmoid(f_x + hu[:, 4 * H:5 * H])

        c_cand = i_g * u_g + f_l * c_l + f_r * c_r
        h_cand = o_g * jnp.tanh(c_cand)

        # f32 one-hot scatter of [h_cand | c_cand] into the target slots (slot 0 =
        # "no update" sentinel).  upd is a cheap XLU lane-reduce (non-binding slot).
        oh_t = jnp.logical_and(iota_d == tgt, tgt > 0).astype(jnp.float32)    # (S_d, S_s)
        cand = jnp.concatenate([h_cand, c_cand], axis=1)                       # (S, 2H) f32
        scat = jnp.dot(oh_t, cand, preferred_element_type=jnp.float32)         # (S, 2H)
        upd = jnp.sum(oh_t, axis=1, keepdims=True)                             # (S, 1)
        return jnp.where(upd > 0, scat, hc)

    # hx is None in the module -> zero-init; run the whole tree recurrence in-kernel.
    hc0 = jnp.zeros((S, 2 * H), jnp.float32)
    hc_ref[0] = lax.fori_loop(0, T, step, hc0, unroll=True)


def tree_lstm_forward(x, tree_ids, tree_ids_r, tree_ids_l, W, U, Bv):
    """Returns ((h, c), h_root) like the PyTorch module's (hx, h_root)."""
    B, S, E = x.shape
    T = tree_ids.shape[1]
    H = W.shape[-1]

    # Pack gate weights: W4 (E,4H) [i|o|u|f_x]; U_lr (2H,5H) rows [U_left; U_right],
    # cols [i|o|u|f_l|f_r].  MXU operands in bf16 (f32 accumulation in-kernel).
    W4 = jnp.concatenate([W[0], W[1], W[2], W[3]], axis=1)                            # (E, 4H)
    b4 = jnp.concatenate([Bv[0], Bv[1], Bv[2], Bv[3]], axis=1).astype(jnp.float32)    # (1, 4H)
    UL = jnp.concatenate([U[0], U[2], U[4], U[6], U[8]], axis=1)
    UR = jnp.concatenate([U[1], U[3], U[5], U[7], U[9]], axis=1)
    U_lr = jnp.concatenate([UL, UR], axis=0).astype(jnp.bfloat16)                     # (2H, 5H)

    # Step-invariant input projection taken off the recurrence critical path: one
    # batched XLA GEMM over the whole batch (bf16 operands, f32 accumulation).
    xw = jnp.einsum('bse,ef->bsf', x.astype(jnp.bfloat16), W4.astype(jnp.bfloat16),
                    preferred_element_type=jnp.float32) + b4                          # (B, S, 4H)

    tree4 = tree_ids.reshape(B, T, 1, S).astype(jnp.int32)
    treel4 = tree_ids_l.reshape(B, T, 1, S).astype(jnp.int32)
    treer4 = tree_ids_r.reshape(B, T, 1, S).astype(jnp.int32)

    idx_b4 = lambda b: (b, 0, 0, 0)   # per-row index slabs, VMEM-resident for all T steps

    hc = pl.pallas_call(
        _tree_lstm_kernel,
        grid=(B,),
        in_specs=[
            pl.BlockSpec((1, T, 1, S), idx_b4),                       # tree_ids
            pl.BlockSpec((1, T, 1, S), idx_b4),                       # tree_ids_l
            pl.BlockSpec((1, T, 1, S), idx_b4),                       # tree_ids_r
            pl.BlockSpec((1, S, 4 * H), lambda b: (b, 0, 0)),         # hoisted x @ W + b
            pl.BlockSpec((2 * H, 5 * H), lambda b: (0, 0)),           # fused U_lr (grid-invariant)
        ],
        out_specs=pl.BlockSpec((1, S, 2 * H), lambda b: (b, 0, 0)),   # (h | c) per row
        out_shape=jax.ShapeDtypeStruct((B, S, 2 * H), jnp.float32),
        compiler_params=pltpu.CompilerParams(
            dimension_semantics=("parallel",),
            vmem_limit_bytes=32 * 1024 * 1024),
    )(tree4, treel4, treer4, xw, U_lr)

    h = hc[:, :, :H]
    c = hc[:, :, H:]
    # roots = tree_ids[:, -1, :].max(axis=1); h_root = gather(h, roots) -- one tiny XLA
    # gather in the wrapper instead of a per-call tail matmul inside the kernel.
    roots = jnp.max(tree_ids[:, -1, :], axis=1)
    h_root = h[jnp.arange(B), roots]
    return (h, c), h_root


def ref_forward(x, tree_ids, tree_ids_r, tree_ids_l, W, U, Bv):
    """Pure-JAX (f32) reference of the same semantics."""
    B, S, E = x.shape
    H = W.shape[-1]
    T = tree_ids.shape[1]
    h = jnp.zeros((B, S, H), jnp.float32)
    c = jnp.zeros((B, S, H), jnp.float32)
    for t in range(T):
        tgt = tree_ids[:, t]
        il = tree_ids_l[:, t]
        ir = tree_ids_r[:, t]
        gather = lambda a, idx: jnp.take_along_axis(
            a, jnp.broadcast_to(idx[:, :, None], (B, S, H)), axis=1)
        h_l, c_l = gather(h, il), gather(c, il)
        h_r, c_r = gather(h, ir), gather(c, ir)
        mm = lambda a, w: jnp.einsum('bsi,ih->bsh', a, w)
        i_g = jax.nn.sigmoid(mm(x, W[0]) + mm(h_l, U[0]) + mm(h_r, U[1]) + Bv[0])
        o_g = jax.nn.sigmoid(mm(x, W[1]) + mm(h_l, U[2]) + mm(h_r, U[3]) + Bv[1])
        u_g = jnp.tanh(mm(x, W[2]) + mm(h_l, U[4]) + mm(h_r, U[5]) + Bv[2])
        f_x = mm(x, W[3]) + Bv[3]
        f_l = jax.nn.sigmoid(f_x + mm(h_l, U[6]) + mm(h_r, U[7]))
        f_r = jax.nn.sigmoid(f_x + mm(h_l, U[8]) + mm(h_r, U[9]))
        c_cand = i_g * u_g + f_l * c_l + f_r * c_r
        h_cand = o_g * jnp.tanh(c_cand)
        oh = (tgt[:, None, :] == jnp.arange(S)[None, :, None]) & (tgt[:, None, :] > 0)
        ohf = oh.astype(jnp.float32)
        m = ohf.sum(-1, keepdims=True) > 0
        h = jnp.where(m, jnp.einsum('bds,bsh->bdh', ohf, h_cand), h)
        c = jnp.where(m, jnp.einsum('bds,bsh->bdh', ohf, c_cand), c)
    roots = jnp.max(tree_ids[:, -1, :], axis=1)
    h_root = h[jnp.arange(B), roots]
    return (h, c), h_root


def build_tree(S, T):
    """Perfect binary tree over nodes 1..15 (slot 0 is the padding/no-op slot)."""
    tree = [[0] * S for _ in range(T)]
    tl = [[0] * S for _ in range(T)]
    tr = [[0] * S for _ in range(T)]
    for s in range(1, 9):                       # step 0: leaves 1..8 (zero-state children)
        tree[0][s] = s
    step_children = {
        1: {9: (1, 2), 10: (3, 4), 11: (5, 6), 12: (7, 8)},
        2: {13: (9, 10), 14: (11, 12)},
        3: {15: (13, 14)},                      # node 15 is the root
    }
    for t, d in step_children.items():
        for node, (lch, rch) in d.items():
            tree[t][node] = node
            tl[t][node] = lch
            tr[t][node] = rch
    return tree, tl, tr


if __name__ == "__main__":
    # H = E = 128 keeps every packed-gate slice / h|c concat lane-aligned (128 lanes).
    B, S, E, H, T = 2, 16, 128, 128, 4
    key = jax.random.PRNGKey(0)
    k_x, k_w, k_u = jax.random.split(key, 3)

    x = jax.random.normal(k_x, (B, S, E), dtype=jnp.float32)

    # deterministic Xavier-uniform weights, zero biases (matches xavier_init_weights)
    lim_w = (6.0 / (E + H)) ** 0.5
    lim_u = (6.0 / (H + H)) ** 0.5
    W = jax.random.uniform(k_w, (4, E, H), jnp.float32, -lim_w, lim_w)
    U = jax.random.uniform(k_u, (10, H, H), jnp.float32, -lim_u, lim_u)
    Bv = jnp.zeros((4, 1, H), jnp.float32)

    tree, tl, tr = build_tree(S, T)
    tree_ids   = jnp.array([tree, tree], dtype=jnp.int32)    # (B, T, S)
    tree_ids_l = jnp.array([tl, tl], dtype=jnp.int32)
    tree_ids_r = jnp.array([tr, tr], dtype=jnp.int32)

    (h, c), h_root = tree_lstm_forward(x, tree_ids, tree_ids_r, tree_ids_l, W, U, Bv)
    jax.block_until_ready((h, c, h_root))

    (h_ref, c_ref), h_root_ref = ref_forward(x, tree_ids, tree_ids_r, tree_ids_l, W, U, Bv)
    # The h|c state stays f32 now (no per-level re-quantization); remaining error comes
    # from the bf16 xw / hu projections only -> 5e-2 tolerance is comfortably safe.
    assert jnp.allclose(h, h_ref, atol=5e-2, rtol=5e-2)
    assert jnp.allclose(c, c_ref, atol=5e-2, rtol=5e-2)
    assert jnp.allclose(h_root, h_root_ref, atol=5e-2, rtol=5e-2)

    print("KERNEL_OK")
</pallas_src>

<mosaic_0001>
module attributes {stable_mosaic.version = 11 : i64} {
  func.func @_tree_lstm_kernel(%arg0: i32, %arg1: memref<1x4x1x16xi32, #tpu.memory_space<vmem>>, %arg2: memref<1x4x1x16xi32, #tpu.memory_space<vmem>>, %arg3: memref<1x4x1x16xi32, #tpu.memory_space<vmem>>, %arg4: memref<1x16x512xf32, #tpu.memory_space<vmem>>, %arg5: memref<256x640xbf16, #tpu.memory_space<vmem>>, %arg6: memref<1x16x256xf32, #tpu.memory_space<vmem>>) attributes {dimension_semantics = [#tpu.dimension_semantics<parallel>], iteration_bounds = array<i64: 2>, scalar_prefetch = 0 : i64, scratch_operands = 0 : i64, tpu.core_type = #tpu.core_type<tc>, window_params = [{transform_indices = @transform_0, window_bounds = array<i64: 1, 4, 1, 16>}, {transform_indices = @transform_1, window_bounds = array<i64: 1, 4, 1, 16>}, {transform_indices = @transform_2, window_bounds = array<i64: 1, 4, 1, 16>}, {transform_indices = @transform_3, window_bounds = array<i64: 1, 16, 512>}, {pipeline_mode = #tpu.pipeline_mode<synchronous>, transform_indices = @transform_4, window_bounds = array<i64: 256, 640>}, {transform_indices = @transform_5, window_bounds = array<i64: 1, 16, 256>}]} {
    %0 = tpu.iota {dimensions = array<i32: 0>} : vector<16x16xi32>
    %cst = arith.constant 0.000000e+00 : f32
    %1 = vector.broadcast %cst : f32 to vector<16x256xf32>
    %c0_i32 = arith.constant 0 : i32
    %c0 = arith.constant 0 : index
    %2 = arith.index_cast %c0_i32 : i32 to index
    %c0_0 = arith.constant 0 : index
    %c0_1 = arith.constant 0 : index
    %3 = vector.load %arg1[%c0, %2, %c0_0, %c0_1] : memref<1x4x1x16xi32, #tpu.memory_space<vmem>>, vector<1x1x1x16xi32>
    %4 = vector.shape_cast %3 : vector<1x1x1x16xi32> to vector<1x16xi32>
    %c0_2 = arith.constant 0 : index
    %5 = arith.index_cast %c0_i32 : i32 to index
    %c0_3 = arith.constant 0 : index
    %c0_4 = arith.constant 0 : index
    %6 = vector.load %arg2[%c0_2, %5, %c0_3, %c0_4] : memref<1x4x1x16xi32, #tpu.memory_space<vmem>>, vector<1x1x1x16xi32>
    %7 = vector.shape_cast %6 : vector<1x1x1x16xi32> to vector<1x16xi32>
    %c0_5 = arith.constant 0 : index
    %8 = arith.index_cast %c0_i32 : i32 to index
    %c0_6 = arith.constant 0 : index
    %c0_7 = arith.constant 0 : index
    %9 = vector.load %arg3[%c0_5, %8, %c0_6, %c0_7] : memref<1x4x1x16xi32, #tpu.memory_space<vmem>>, vector<1x1x1x16xi32>
    %10 = vector.shape_cast %9 : vector<1x1x1x16xi32> to vector<1x16xi32>
    %11 = vector.broadcast %7 : vector<1x16xi32> to vector<16x16xi32>
    %12 = arith.cmpi eq, %0, %11 : vector<16x16xi32>
    %13 = arith.extui %12 : vector<16x16xi1> to vector<16x16xi32>
    %14 = arith.sitofp %13 : vector<16x16xi32> to vector<16x16xf32>
    %15 = vector.broadcast %10 : vector<1x16xi32> to vector<16x16xi32>
    %16 = arith.cmpi eq, %0, %15 : vector<16x16xi32>
    %17 = arith.extui %16 : vector<16x16xi1> to vector<16x16xi32>
    %18 = arith.sitofp %17 : vector<16x16xi32> to vector<16x16xf32>
    %19 = tpu.concatenate %14, %18 in 1 : vector<16x16xf32>, vector<16x16xf32> -> vector<16x32xf32>
    %cst_8 = arith.constant dense<0.000000e+00> : vector<32x256xf32>
    %20 = tpu.matmul %19, %1, %cst_8 {dimension_numbers = #tpu.dot_dimension_numbers<[0], [0], [1], [1], [0, 1, 1, 1], [], []>} : vector<16x32xf32>, vector<16x256xf32>, vector<32x256xf32> -> vector<32x256xf32>
    %21 = vector.extract_strided_slice %20 {offsets = [0, 0], sizes = [16, 256], strides = [1, 1]} : vector<32x256xf32> to vector<16x256xf32>
    %22 = vector.extract_strided_slice %20 {offsets = [16, 0], sizes = [16, 256], strides = [1, 1]} : vector<32x256xf32> to vector<16x256xf32>
    %23 = vector.extract_strided_slice %21 {offsets = [0, 128], sizes = [16, 128], strides = [1, 1]} : vector<16x256xf32> to vector<16x128xf32>
    %24 = vector.extract_strided_slice %22 {offsets = [0, 128], sizes = [16, 128], strides = [1, 1]} : vector<16x256xf32> to vector<16x128xf32>
    %25 = vector.extract_strided_slice %21 {offsets = [0, 0], sizes = [16, 128], strides = [1, 1]} : vector<16x256xf32> to vector<16x128xf32>
    %26 = vector.extract_strided_slice %22 {offsets = [0, 0], sizes = [16, 128], strides = [1, 1]} : vector<16x256xf32> to vector<16x128xf32>
    %27 = tpu.concatenate %25, %26 in 1 : vector<16x128xf32>, vector<16x128xf32> -> vector<16x256xf32>
    %28 = arith.truncf %27 : vector<16x256xf32> to vector<16x256xbf16>
    %c0_9 = arith.constant 0 : index
    %c0_10 = arith.constant 0 : index
    %29 = vector.load %arg5[%c0_9, %c0_10] : memref<256x640xbf16, #tpu.memory_space<vmem>>, vector<256x640xbf16>
    %cst_11 = arith.constant dense<0.000000e+00> : vector<16x640xf32>
    %30 = tpu.matmul %28, %29, %cst_11 {dimension_numbers = #tpu.dot_dimension_numbers<[1], [0], [0], [1], [0, 0, 1, 1], [], []>} : vector<16x256xbf16>, vector<256x640xbf16>, vector<16x640xf32> -> vector<16x640xf32>
    %c0_12 = arith.constant 0 : index
    %c0_13 = arith.constant 0 : index
    %c0_14 = arith.constant 0 : index
    %31 = vector.load %arg4[%c0_12, %c0_13, %c0_14] : memref<1x16x512xf32, #tpu.memory_space<vmem>>, vector<1x16x512xf32>
    %32 = vector.shape_cast %31 : vector<1x16x512xf32> to vector<16x512xf32>
    %33 = vector.extract_strided_slice %32 {offsets = [0, 0], sizes = [16, 128], strides = [1, 1]} : vector<16x512xf32> to vector<16x128xf32>
    %34 = vector.extract_strided_slice %30 {offsets = [0, 0], sizes = [16, 128], strides = [1, 1]} : vector<16x640xf32> to vector<16x128xf32>
    %35 = arith.addf %33, %34 : vector<16x128xf32>
    %36 = arith.negf %35 : vector<16x128xf32>
    %37 = math.exp %36 : vector<16x128xf32>
    %cst_15 = arith.constant 1.000000e+00 : f32
    %38 = vector.broadcast %cst_15 : f32 to vector<16x128xf32>
    %39 = arith.addf %38, %37 : vector<16x128xf32>
    %40 = arith.divf %38, %39 : vector<16x128xf32>
    %41 = vector.extract_strided_slice %32 {offsets = [0, 128], sizes = [16, 128], strides = [1, 1]} : vector<16x512xf32> to vector<16x128xf32>
    %42 = vector.extract_strided_slice %30 {offsets = [0, 128], sizes = [16, 128], strides = [1, 1]} : vector<16x640xf32> to vector<16x128xf32>
    %43 = arith.addf %41, %42 : vector<16x128xf32>
    %44 = arith.negf %43 : vector<16x128xf32>
    %45 = math.exp %44 : vector<16x128xf32>
    %cst_16 = arith.constant 1.000000e+00 : f32
    %46 = vector.broadcast %cst_16 : f32 to vector<16x128xf32>
    %47 = arith.addf %46, %45 : vector<16x128xf32>
    %48 = arith.divf %46, %47 : vector<16x128xf32>
    %49 = vector.extract_strided_slice %32 {offsets = [0, 256], sizes = [16, 128], strides = [1, 1]} : vector<16x512xf32> to vector<16x128xf32>
    %50 = vector.extract_strided_slice %30 {offsets = [0, 256], sizes = [16, 128], strides = [1, 1]} : vector<16x640xf32> to vector<16x128xf32>
    %51 = arith.addf %49, %50 : vector<16x128xf32>
    %52 = math.tanh %51 : vector<16x128xf32>
    %53 = vector.extract_strided_slice %32 {offsets = [0, 384], sizes = [16, 128], strides = [1, 1]} : vector<16x512xf32> to vector<16x128xf32>
    %54 = vector.extract_strided_slice %30 {offsets = [0, 384], sizes = [16, 128], strides = [1, 1]} : vector<16x640xf32> to vector<16x128xf32>
    %55 = arith.addf %53, %54 : vector<16x128xf32>
    %56 = arith.negf %55 : vector<16x128xf32>
    %57 = math.exp %56 : vector<16x128xf32>
    %cst_17 = arith.constant 1.000000e+00 : f32
    %58 = vector.broadcast %cst_17 : f32 to vector<16x128xf32>
    %59 = arith.addf %58, %57 : vector<16x128xf32>
    %60 = arith.divf %58, %59 : vector<16x128xf32>
    %61 = vector.extract_strided_slice %30 {offsets = [0, 512], sizes = [16, 128], strides = [1, 1]} : vector<16x640xf32> to vector<16x128xf32>
    %62 = arith.addf %53, %61 : vector<16x128xf32>
    %63 = arith.negf %62 : vector<16x128xf32>
    %64 = math.exp %63 : vector<16x128xf32>
    %cst_18 = arith.constant 1.000000e+00 : f32
    %65 = vector.broadcast %cst_18 : f32 to vector<16x128xf32>
    %66 = arith.addf %65, %64 : vector<16x128xf32>
    %67 = arith.divf %65, %66 : vector<16x128xf32>
    %68 = arith.mulf %40, %52 : vector<16x128xf32>
    %69 = arith.mulf %60, %23 : vector<16x128xf32>
    %70 = arith.addf %68, %69 : vector<16x128xf32>
    %71 = arith.mulf %67, %24 : vector<16x128xf32>
    %72 = arith.addf %70, %71 : vector<16x128xf32>
    %73 = math.tanh %72 : vector<16x128xf32>
    %74 = arith.mulf %48, %73 : vector<16x128xf32>
    %75 = vector.broadcast %4 : vector<1x16xi32> to vector<16x16xi32>
    %76 = arith.cmpi eq, %0, %75 : vector<16x16xi32>
    %c0_i32_19 = arith.constant 0 : i32
    %77 = vector.broadcast %c0_i32_19 : i32 to vector<1x16xi32>
    %78 = arith.cmpi sgt, %4, %77 : vector<1x16xi32>
    %79 = vector.broadcast %78 : vector<1x16xi1> to vector<16x16xi1>
    %80 = arith.andi %76, %79 : vector<16x16xi1>
    %81 = arith.extui %80 : vector<16x16xi1> to vector<16x16xi32>
    %82 = arith.sitofp %81 : vector<16x16xi32> to vector<16x16xf32>
    %83 = tpu.concatenate %74, %72 in 1 : vector<16x128xf32>, vector<16x128xf32> -> vector<16x256xf32>
    %cst_20 = arith.constant dense<0.000000e+00> : vector<16x256xf32>
    %84 = tpu.matmul %82, %83, %cst_20 {dimension_numbers = #tpu.dot_dimension_numbers<[1], [0], [0], [1], [0, 0, 1, 1], [], []>} : vector<16x16xf32>, vector<16x256xf32>, vector<16x256xf32> -> vector<16x256xf32>
    %cst_21 = arith.constant dense<0.000000e+00> : vector<16xf32>
    %85 = vector.multi_reduction <add>, %82, %cst_21 [1] : vector<16x16xf32> to vector<16xf32>
    %86 = vector.shape_cast %85 : vector<16xf32> to vector<16x1xf32>
    %cst_22 = arith.constant 0.000000e+00 : f32
    %87 = vector.broadcast %cst_22 : f32 to vector<16x1xf32>
    %88 = arith.cmpf ogt, %86, %87 : vector<16x1xf32>
    %89 = vector.shape_cast %88 : vector<16x1xi1> to vector<16x1xi1>
    %90 = vector.broadcast %89 : vector<16x1xi1> to vector<16x256xi1>
    %91 = arith.select %90, %84, %1 : vector<16x256xi1>, vector<16x256xf32>
    %c1_i32 = arith.constant 1 : i32
    %c0_23 = arith.constant 0 : index
    %92 = arith.index_cast %c1_i32 : i32 to index
    %c0_24 = arith.constant 0 : index
    %c0_25 = arith.constant 0 : index
    %93 = vector.load %arg1[%c0_23, %92, %c0_24, %c0_25] : memref<1x4x1x16xi32, #tpu.memory_space<vmem>>, vector<1x1x1x16xi32>
    %94 = vector.shape_cast %93 : vector<1x1x1x16xi32> to vector<1x16xi32>
    %c0_26 = arith.constant 0 : index
    %95 = arith.index_cast %c1_i32 : i32 to index
    %c0_27 = arith.constant 0 : index
    %c0_28 = arith.constant 0 : index
    %96 = vector.load %arg2[%c0_26, %95, %c0_27, %c0_28] : memref<1x4x1x16xi32, #tpu.memory_space<vmem>>, vector<1x1x1x16xi32>
    %97 = vector.shape_cast %96 : vector<1x1x1x16xi32> to vector<1x16xi32>
    %c0_29 = arith.constant 0 : index
    %98 = arith.index_cast %c1_i32 : i32 to index
    %c0_30 = arith.constant 0 : index
    %c0_31 = arith.constant 0 : index
    %99 = vector.load %arg3[%c0_29, %98, %c0_30, %c0_31] : memref<1x4x1x16xi32, #tpu.memory_space<vmem>>, vector<1x1x1x16xi32>
    %100 = vector.shape_cast %99 : vector<1x1x1x16xi32> to vector<1x16xi32>
    %101 = vector.broadcast %97 : vector<1x16xi32> to vector<16x16xi32>
    %102 = arith.cmpi eq, %0, %101 : vector<16x16xi32>
    %103 = arith.extui %102 : vector<16x16xi1> to vector<16x16xi32>
    %104 = arith.sitofp %103 : vector<16x16xi32> to vector<16x16xf32>
    %105 = vector.broadcast %100 : vector<1x16xi32> to vector<16x16xi32>
    %106 = arith.cmpi eq, %0, %105 : vector<16x16xi32>
    %107 = arith.extui %106 : vector<16x16xi1> to vector<16x16xi32>
    %108 = arith.sitofp %107 : vector<16x16xi32> to vector<16x16xf32>
    %109 = tpu.concatenate %104, %108 in 1 : vector<16x16xf32>, vector<16x16xf32> -> vector<16x32xf32>
    %cst_32 = arith.constant dense<0.000000e+00> : vector<32x256xf32>
    %110 = tpu.matmul %109, %91, %cst_32 {dimension_numbers = #tpu.dot_dimension_numbers<[0], [0], [1], [1], [0, 1, 1, 1], [], []>} : vector<16x32xf32>, vector<16x256xf32>, vector<32x256xf32> -> vector<32x256xf32>
    %111 = vector.extract_strided_slice %110 {offsets = [0, 0], sizes = [16, 256], strides = [1, 1]} : vector<32x256xf32> to vector<16x256xf32>
    %112 = vector.extract_strided_slice %110 {offsets = [16, 0], sizes = [16, 256], strides = [1, 1]} : vector<32x256xf32> to vector<16x256xf32>
    %113 = vector.extract_strided_slice %111 {offsets = [0, 128], sizes = [16, 128], strides = [1, 1]} : vector<16x256xf32> to vector<16x128xf32>
    %114 = vector.extract_strided_slice %112 {offsets = [0, 128], sizes = [16, 128], strides = [1, 1]} : vector<16x256xf32> to vector<16x128xf32>
    %115 = vector.extract_strided_slice %111 {offsets = [0, 0], sizes = [16, 128], strides = [1, 1]} : vector<16x256xf32> to vector<16x128xf32>
    %116 = vector.extract_strided_slice %112 {offsets = [0, 0], sizes = [16, 128], strides = [1, 1]} : vector<16x256xf32> to vector<16x128xf32>
    %117 = tpu.concatenate %115, %116 in 1 : vector<16x128xf32>, vector<16x128xf32> -> vector<16x256xf32>
    %118 = arith.truncf %117 : vector<16x256xf32> to vector<16x256xbf16>
    %c0_33 = arith.constant 0 : index
    %c0_34 = arith.constant 0 : index
    %119 = vector.load %arg5[%c0_33, %c0_34] : memref<256x640xbf16, #tpu.memory_space<vmem>>, vector<256x640xbf16>
    %cst_35 = arith.constant dense<0.000000e+00> : vector<16x640xf32>
    %120 = tpu.matmul %118, %119, %cst_35 {dimension_numbers = #tpu.dot_dimension_numbers<[1], [0], [0], [1], [0, 0, 1, 1], [], []>} : vector<16x256xbf16>, vector<256x640xbf16>, vector<16x640xf32> -> vector<16x640xf32>
    %c0_36 = arith.constant 0 : index
    %c0_37 = arith.constant 0 : index
    %c0_38 = arith.constant 0 : index
    %121 = vector.load %arg4[%c0_36, %c0_37, %c0_38] : memref<1x16x512xf32, #tpu.memory_space<vmem>>, vector<1x16x512xf32>
    %122 = vector.shape_cast %121 : vector<1x16x512xf32> to vector<16x512xf32>
    %123 = vector.extract_strided_slice %122 {offsets = [0, 0], sizes = [16, 128], strides = [1, 1]} : vector<16x512xf32> to vector<16x128xf32>
    %124 = vector.extract_strided_slice %120 {offsets = [0, 0], sizes = [16, 128], strides = [1, 1]} : vector<16x640xf32> to vector<16x128xf32>
    %125 = arith.addf %123, %124 : vector<16x128xf32>
    %126 = arith.negf %125 : vector<16x128xf32>
    %127 = math.exp %126 : vector<16x128xf32>
    %cst_39 = arith.constant 1.000000e+00 : f32
    %128 = vector.broadcast %cst_39 : f32 to vector<16x128xf32>
    %129 = arith.addf %128, %127 : vector<16x128xf32>
    %130 = arith.divf %128, %129 : vector<16x128xf32>
    %131 = vector.extract_strided_slice %122 {offsets = [0, 128], sizes = [16, 128], strides = [1, 1]} : vector<16x512xf32> to vector<16x128xf32>
    %132 = vector.extract_strided_slice %120 {offsets = [0, 128], sizes = [16, 128], strides = [1, 1]} : vector<16x640xf32> to vector<16x128xf32>
    %133 = arith.addf %131, %132 : vector<16x128xf32>
    %134 = arith.negf %133 : vector<16x128xf32>
    %135 = math.exp %134 : vector<16x128xf32>
    %cst_40 = arith.constant 1.000000e+00 : f32
    %136 = vector.broadcast %cst_40 : f32 to vector<16x128xf32>
    %137 = arith.addf %136, %135 : vector<16x128xf32>
    %138 = arith.divf %136, %137 : vector<16x128xf32>
    %139 = vector.extract_strided_slice %122 {offsets = [0, 256], sizes = [16, 128], strides = [1, 1]} : vector<16x512xf32> to vector<16x128xf32>
    %140 = vector.extract_strided_slice %120 {offsets = [0, 256], sizes = [16, 128], strides = [1, 1]} : vector<16x640xf32> to vector<16x128xf32>
    %141 = arith.addf %139, %140 : vector<16x128xf32>
    %142 = math.tanh %141 : vector<16x128xf32>
    %143 = vector.extract_strided_slice %122 {offsets = [0, 384], sizes = [16, 128], strides = [1, 1]} : vector<16x512xf32> to vector<16x128xf32>
    %144 = vector.extract_strided_slice %120 {offsets = [0, 384], sizes = [16, 128], strides = [1, 1]} : vector<16x640xf32> to vector<16x128xf32>
    %145 = arith.addf %143, %144 : vector<16x128xf32>
    %146 = arith.negf %145 : vector<16x128xf32>
    %147 = math.exp %146 : vector<16x128xf32>
    %cst_41 = arith.constant 1.000000e+00 : f32
    %148 = vector.broadcast %cst_41 : f32 to vector<16x128xf32>
    %149 = arith.addf %148, %147 : vector<16x128xf32>
    %150 = arith.divf %148, %149 : vector<16x128xf32>
    %151 = vector.extract_strided_slice %120 {offsets = [0, 512], sizes = [16, 128], strides = [1, 1]} : vector<16x640xf32> to vector<16x128xf32>
    %152 = arith.addf %143, %151 : vector<16x128xf32>
    %153 = arith.negf %152 : vector<16x128xf32>
    %154 = math.exp %153 : vector<16x128xf32>
    %cst_42 = arith.constant 1.000000e+00 : f32
    %155 = vector.broadcast %cst_42 : f32 to vector<16x128xf32>
    %156 = arith.addf %155, %154 : vector<16x128xf32>
    %157 = arith.divf %155, %156 : vector<16x128xf32>
    %158 = arith.mulf %130, %142 : vector<16x128xf32>
    %159 = arith.mulf %150, %113 : vector<16x128xf32>
    %160 = arith.addf %158, %159 : vector<16x128xf32>
    %161 = arith.mulf %157, %114 : vector<16x128xf32>
    %162 = arith.addf %160, %161 : vector<16x128xf32>
    %163 = math.tanh %162 : vector<16x128xf32>
    %164 = arith.mulf %138, %163 : vector<16x128xf32>
    %165 = vector.broadcast %94 : vector<1x16xi32> to vector<16x16xi32>
    %166 = arith.cmpi eq, %0, %165 : vector<16x16xi32>
    %c0_i32_43 = arith.constant 0 : i32
    %167 = vector.broadcast %c0_i32_43 : i32 to vector<1x16xi32>
    %168 = arith.cmpi sgt, %94, %167 : vector<1x16xi32>
    %169 = vector.broadcast %168 : vector<1x16xi1> to vector<16x16xi1>
    %170 = arith.andi %166, %169 : vector<16x16xi1>
    %171 = arith.extui %170 : vector<16x16xi1> to vector<16x16xi32>
    %172 = arith.sitofp %171 : vector<16x16xi32> to vector<16x16xf32>
    %173 = tpu.concatenate %164, %162 in 1 : vector<16x128xf32>, vector<16x128xf32> -> vector<16x256xf32>
    %cst_44 = arith.constant dense<0.000000e+00> : vector<16x256xf32>
    %174 = tpu.matmul %172, %173, %cst_44 {dimension_numbers = #tpu.dot_dimension_numbers<[1], [0], [0], [1], [0, 0, 1, 1], [], []>} : vector<16x16xf32>, vector<16x256xf32>, vector<16x256xf32> -> vector<16x256xf32>
    %cst_45 = arith.constant dense<0.000000e+00> : vector<16xf32>
    %175 = vector.multi_reduction <add>, %172, %cst_45 [1] : vector<16x16xf32> to vector<16xf32>
    %176 = vector.shape_cast %175 : vector<16xf32> to vector<16x1xf32>
    %cst_46 = arith.constant 0.000000e+00 : f32
    %177 = vector.broadcast %cst_46 : f32 to vector<16x1xf32>
    %178 = arith.cmpf ogt, %176, %177 : vector<16x1xf32>
    %179 = vector.shape_cast %178 : vector<16x1xi1> to vector<16x1xi1>
    %180 = vector.broadcast %179 : vector<16x1xi1> to vector<16x256xi1>
    %181 = arith.select %180, %174, %91 : vector<16x256xi1>, vector<16x256xf32>
    %c2_i32 = arith.constant 2 : i32
    %c0_47 = arith.constant 0 : index
    %182 = arith.index_cast %c2_i32 : i32 to index
    %c0_48 = arith.constant 0 : index
    %c0_49 = arith.constant 0 : index
    %183 = vector.load %arg1[%c0_47, %182, %c0_48, %c0_49] : memref<1x4x1x16xi32, #tpu.memory_space<vmem>>, vector<1x1x1x16xi32>
    %184 = vector.shape_cast %183 : vector<1x1x1x16xi32> to vector<1x16xi32>
    %c0_50 = arith.constant 0 : index
    %185 = arith.index_cast %c2_i32 : i32 to index
    %c0_51 = arith.constant 0 : index
    %c0_52 = arith.constant 0 : index
    %186 = vector.load %arg2[%c0_50, %185, %c0_51, %c0_52] : memref<1x4x1x16xi32, #tpu.memory_space<vmem>>, vector<1x1x1x16xi32>
    %187 = vector.shape_cast %186 : vector<1x1x1x16xi32> to vector<1x16xi32>
    %c0_53 = arith.constant 0 : index
    %188 = arith.index_cast %c2_i32 : i32 to index
    %c0_54 = arith.constant 0 : index
    %c0_55 = arith.constant 0 : index
    %189 = vector.load %arg3[%c0_53, %188, %c0_54, %c0_55] : memref<1x4x1x16xi32, #tpu.memory_space<vmem>>, vector<1x1x1x16xi32>
    %190 = vector.shape_cast %189 : vector<1x1x1x16xi32> to vector<1x16xi32>
    %191 = vector.broadcast %187 : vector<1x16xi32> to vector<16x16xi32>
    %192 = arith.cmpi eq, %0, %191 : vector<16x16xi32>
    %193 = arith.extui %192 : vector<16x16xi1> to vector<16x16xi32>
    %194 = arith.sitofp %193 : vector<16x16xi32> to vector<16x16xf32>
    %195 = vector.broadcast %190 : vector<1x16xi32> to vector<16x16xi32>
    %196 = arith.cmpi eq, %0, %195 : vector<16x16xi32>
    %197 = arith.extui %196 : vector<16x16xi1> to vector<16x16xi32>
    %198 = arith.sitofp %197 : vector<16x16xi32> to vector<16x16xf32>
    %199 = tpu.concatenate %194, %198 in 1 : vector<16x16xf32>, vector<16x16xf32> -> vector<16x32xf32>
    %cst_56 = arith.constant dense<0.000000e+00> : vector<32x256xf32>
    %200 = tpu.matmul %199, %181, %cst_56 {dimension_numbers = #tpu.dot_dimension_numbers<[0], [0], [1], [1], [0, 1, 1, 1], [], []>} : vector<16x32xf32>, vector<16x256xf32>, vector<32x256xf32> -> vector<32x256xf32>
    %201 = vector.extract_strided_slice %200 {offsets = [0, 0], sizes = [16, 256], strides = [1, 1]} : vector<32x256xf32> to vector<16x256xf32>
    %202 = vector.extract_strided_slice %200 {offsets = [16, 0], sizes = [16, 256], strides = [1, 1]} : vector<32x256xf32> to vector<16x256xf32>
    %203 = vector.extract_strided_slice %201 {offsets = [0, 128], sizes = [16, 128], strides = [1, 1]} : vector<16x256xf32> to vector<16x128xf32>
    %204 = vector.extract_strided_slice %202 {offsets = [0, 128], sizes = [16, 128], strides = [1, 1]} : vector<16x256xf32> to vector<16x128xf32>
    %205 = vector.extract_strided_slice %201 {offsets = [0, 0], sizes = [16, 128], strides = [1, 1]} : vector<16x256xf32> to vector<16x128xf32>
    %206 = vector.extract_strided_slice %202 {offsets = [0, 0], sizes = [16, 128], strides = [1, 1]} : vector<16x256xf32> to vector<16x128xf32>
    %207 = tpu.concatenate %205, %206 in 1 : vector<16x128xf32>, vector<16x128xf32> -> vector<16x256xf32>
    %208 = arith.truncf %207 : vector<16x256xf32> to vector<16x256xbf16>
    %c0_57 = arith.constant 0 : index
    %c0_58 = arith.constant 0 : index
    %209 = vector.load %arg5[%c0_57, %c0_58] : memref<256x640xbf16, #tpu.memory_space<vmem>>, vector<256x640xbf16>
    %cst_59 = arith.constant dense<0.000000e+00> : vector<16x640xf32>
    %210 = tpu.matmul %208, %209, %cst_59 {dimension_numbers = #tpu.dot_dimension_numbers<[1], [0], [0], [1], [0, 0, 1, 1], [], []>} : vector<16x256xbf16>, vector<256x640xbf16>, vector<16x640xf32> -> vector<16x640xf32>
    %c0_60 = arith.constant 0 : index
    %c0_61 = arith.constant 0 : index
    %c0_62 = arith.constant 0 : index
    %211 = vector.load %arg4[%c0_60, %c0_61, %c0_62] : memref<1x16x512xf32, #tpu.memory_space<vmem>>, vector<1x16x512xf32>
    %212 = vector.shape_cast %211 : vector<1x16x512xf32> to vector<16x512xf32>
    %213 = vector.extract_strided_slice %212 {offsets = [0, 0], sizes = [16, 128], strides = [1, 1]} : vector<16x512xf32> to vector<16x128xf32>
    %214 = vector.extract_strided_slice %210 {offsets = [0, 0], sizes = [16, 128], strides = [1, 1]} : vector<16x640xf32> to vector<16x128xf32>
    %215 = arith.addf %213, %214 : vector<16x128xf32>
    %216 = arith.negf %215 : vector<16x128xf32>
    %217 = math.exp %216 : vector<16x128xf32>
    %cst_63 = arith.constant 1.000000e+00 : f32
    %218 = vector.broadcast %cst_63 : f32 to vector<16x128xf32>
    %219 = arith.addf %218, %217 : vector<16x128xf32>
    %220 = arith.divf %218, %219 : vector<16x128xf32>
    %221 = vector.extract_strided_slice %212 {offsets = [0, 128], sizes = [16, 128], strides = [1, 1]} : vector<16x512xf32> to vector<16x128xf32>
    %222 = vector.extract_strided_slice %210 {offsets = [0, 128], sizes = [16, 128], strides = [1, 1]} : vector<16x640xf32> to vector<16x128xf32>
    %223 = arith.addf %221, %222 : vector<16x128xf32>
    %224 = arith.negf %223 : vector<16x128xf32>
    %225 = math.exp %224 : vector<16x128xf32>
    %cst_64 = arith.constant 1.000000e+00 : f32
    %226 = vector.broadcast %cst_64 : f32 to vector<16x128xf32>
    %227 = arith.addf %226, %225 : vector<16x128xf32>
    %228 = arith.divf %226, %227 : vector<16x128xf32>
    %229 = vector.extract_strided_slice %212 {offsets = [0, 256], sizes = [16, 128], strides = [1, 1]} : vector<16x512xf32> to vector<16x128xf32>
    %230 = vector.extract_strided_slice %210 {offsets = [0, 256], sizes = [16, 128], strides = [1, 1]} : vector<16x640xf32> to vector<16x128xf32>
    %231 = arith.addf %229, %230 : vector<16x128xf32>
    %232 = math.tanh %231 : vector<16x128xf32>
    %233 = vector.extract_strided_slice %212 {offsets = [0, 384], sizes = [16, 128], strides = [1, 1]} : vector<16x512xf32> to vector<16x128xf32>
    %234 = vector.extract_strided_slice %210 {offsets = [0, 384], sizes = [16, 128], strides = [1, 1]} : vector<16x640xf32> to vector<16x128xf32>
    %235 = arith.addf %233, %234 : vector<16x128xf32>
    %236 = arith.negf %235 : vector<16x128xf32>
    %237 = math.exp %236 : vector<16x128xf32>
    %cst_65 = arith.constant 1.000000e+00 : f32
    %238 = vector.broadcast %cst_65 : f32 to vector<16x128xf32>
    %239 = arith.addf %238, %237 : vector<16x128xf32>
    %240 = arith.divf %238, %239 : vector<16x128xf32>
    %241 = vector.extract_strided_slice %210 {offsets = [0, 512], sizes = [16, 128], strides = [1, 1]} : vector<16x640xf32> to vector<16x128xf32>
    %242 = arith.addf %233, %241 : vector<16x128xf32>
    %243 = arith.negf %242 : vector<16x128xf32>
    %244 = math.exp %243 : vector<16x128xf32>
    %cst_66 = arith.constant 1.000000e+00 : f32
    %245 = vector.broadcast %cst_66 : f32 to vector<16x128xf32>
    %246 = arith.addf %245, %244 : vector<16x128xf32>
    %247 = arith.divf %245, %246 : vector<16x128xf32>
    %248 = arith.mulf %220, %232 : vector<16x128xf32>
    %249 = arith.mulf %240, %203 : vector<16x128xf32>
    %250 = arith.addf %248, %249 : vector<16x128xf32>
    %251 = arith.mulf %247, %204 : vector<16x128xf32>
    %252 = arith.addf %250, %251 : vector<16x128xf32>
    %253 = math.tanh %252 : vector<16x128xf32>
    %254 = arith.mulf %228, %253 : vector<16x128xf32>
    %255 = vector.broadcast %184 : vector<1x16xi32> to vector<16x16xi32>
    %256 = arith.cmpi eq, %0, %255 : vector<16x16xi32>
    %c0_i32_67 = arith.constant 0 : i32
    %257 = vector.broadcast %c0_i32_67 : i32 to vector<1x16xi32>
    %258 = arith.cmpi sgt, %184, %257 : vector<1x16xi32>
    %259 = vector.broadcast %258 : vector<1x16xi1> to vector<16x16xi1>
    %260 = arith.andi %256, %259 : vector<16x16xi1>
    %261 = arith.extui %260 : vector<16x16xi1> to vector<16x16xi32>
    %262 = arith.sitofp %261 : vector<16x16xi32> to vector<16x16xf32>
    %263 = tpu.concatenate %254, %252 in 1 : vector<16x128xf32>, vector<16x128xf32> -> vector<16x256xf32>
    %cst_68 = arith.constant dense<0.000000e+00> : vector<16x256xf32>
    %264 = tpu.matmul %262, %263, %cst_68 {dimension_numbers = #tpu.dot_dimension_numbers<[1], [0], [0], [1], [0, 0, 1, 1], [], []>} : vector<16x16xf32>, vector<16x256xf32>, vector<16x256xf32> -> vector<16x256xf32>
    %cst_69 = arith.constant dense<0.000000e+00> : vector<16xf32>
    %265 = vector.multi_reduction <add>, %262, %cst_69 [1] : vector<16x16xf32> to vector<16xf32>
    %266 = vector.shape_cast %265 : vector<16xf32> to vector<16x1xf32>
    %cst_70 = arith.constant 0.000000e+00 : f32
    %267 = vector.broadcast %cst_70 : f32 to vector<16x1xf32>
    %268 = arith.cmpf ogt, %266, %267 : vector<16x1xf32>
    %269 = vector.shape_cast %268 : vector<16x1xi1> to vector<16x1xi1>
    %270 = vector.broadcast %269 : vector<16x1xi1> to vector<16x256xi1>
    %271 = arith.select %270, %264, %181 : vector<16x256xi1>, vector<16x256xf32>
    %c3_i32 = arith.constant 3 : i32
    %c0_71 = arith.constant 0 : index
    %272 = arith.index_cast %c3_i32 : i32 to index
    %c0_72 = arith.constant 0 : index
    %c0_73 = arith.constant 0 : index
    %273 = vector.load %arg1[%c0_71, %272, %c0_72, %c0_73] : memref<1x4x1x16xi32, #tpu.memory_space<vmem>>, vector<1x1x1x16xi32>
    %274 = vector.shape_cast %273 : vector<1x1x1x16xi32> to vector<1x16xi32>
    %c0_74 = arith.constant 0 : index
    %275 = arith.index_cast %c3_i32 : i32 to index
    %c0_75 = arith.constant 0 : index
    %c0_76 = arith.constant 0 : index
    %276 = vector.load %arg2[%c0_74, %275, %c0_75, %c0_76] : memref<1x4x1x16xi32, #tpu.memory_space<vmem>>, vector<1x1x1x16xi32>
    %277 = vector.shape_cast %276 : vector<1x1x1x16xi32> to vector<1x16xi32>
    %c0_77 = arith.constant 0 : index
    %278 = arith.index_cast %c3_i32 : i32 to index
    %c0_78 = arith.constant 0 : index
    %c0_79 = arith.constant 0 : index
    %279 = vector.load %arg3[%c0_77, %278, %c0_78, %c0_79] : memref<1x4x1x16xi32, #tpu.memory_space<vmem>>, vector<1x1x1x16xi32>
    %280 = vector.shape_cast %279 : vector<1x1x1x16xi32> to vector<1x16xi32>
    %281 = vector.broadcast %277 : vector<1x16xi32> to vector<16x16xi32>
    %282 = arith.cmpi eq, %0, %281 : vector<16x16xi32>
    %283 = arith.extui %282 : vector<16x16xi1> to vector<16x16xi32>
    %284 = arith.sitofp %283 : vector<16x16xi32> to vector<16x16xf32>
    %285 = vector.broadcast %280 : vector<1x16xi32> to vector<16x16xi32>
    %286 = arith.cmpi eq, %0, %285 : vector<16x16xi32>
    %287 = arith.extui %286 : vector<16x16xi1> to vector<16x16xi32>
    %288 = arith.sitofp %287 : vector<16x16xi32> to vector<16x16xf32>
    %289 = tpu.concatenate %284, %288 in 1 : vector<16x16xf32>, vector<16x16xf32> -> vector<16x32xf32>
    %cst_80 = arith.constant dense<0.000000e+00> : vector<32x256xf32>
    %290 = tpu.matmul %289, %271, %cst_80 {dimension_numbers = #tpu.dot_dimension_numbers<[0], [0], [1], [1], [0, 1, 1, 1], [], []>} : vector<16x32xf32>, vector<16x256xf32>, vector<32x256xf32> -> vector<32x256xf32>
    %291 = vector.extract_strided_slice %290 {offsets = [0, 0], sizes = [16, 256], strides = [1, 1]} : vector<32x256xf32> to vector<16x256xf32>
    %292 = vector.extract_strided_slice %290 {offsets = [16, 0], sizes = [16, 256], strides = [1, 1]} : vector<32x256xf32> to vector<16x256xf32>
    %293 = vector.extract_strided_slice %291 {offsets = [0, 128], sizes = [16, 128], strides = [1, 1]} : vector<16x256xf32> to vector<16x128xf32>
    %294 = vector.extract_strided_slice %292 {offsets = [0, 128], sizes = [16, 128], strides = [1, 1]} : vector<16x256xf32> to vector<16x128xf32>
    %295 = vector.extract_strided_slice %291 {offsets = [0, 0], sizes = [16, 128], strides = [1, 1]} : vector<16x256xf32> to vector<16x128xf32>
    %296 = vector.extract_strided_slice %292 {offsets = [0, 0], sizes = [16, 128], strides = [1, 1]} : vector<16x256xf32> to vector<16x128xf32>
    %297 = tpu.concatenate %295, %296 in 1 : vector<16x128xf32>, vector<16x128xf32> -> vector<16x256xf32>
    %298 = arith.truncf %297 : vector<16x256xf32> to vector<16x256xbf16>
    %c0_81 = arith.constant 0 : index
    %c0_82 = arith.constant 0 : index
    %299 = vector.load %arg5[%c0_81, %c0_82] : memref<256x640xbf16, #tpu.memory_space<vmem>>, vector<256x640xbf16>
    %cst_83 = arith.constant dense<0.000000e+00> : vector<16x640xf32>
    %300 = tpu.matmul %298, %299, %cst_83 {dimension_numbers = #tpu.dot_dimension_numbers<[1], [0], [0], [1], [0, 0, 1, 1], [], []>} : vector<16x256xbf16>, vector<256x640xbf16>, vector<16x640xf32> -> vector<16x640xf32>
    %c0_84 = arith.constant 0 : index
    %c0_85 = arith.constant 0 : index
    %c0_86 = arith.constant 0 : index
    %301 = vector.load %arg4[%c0_84, %c0_85, %c0_86] : memref<1x16x512xf32, #tpu.memory_space<vmem>>, vector<1x16x512xf32>
    %302 = vector.shape_cast %301 : vector<1x16x512xf32> to vector<16x512xf32>
    %303 = vector.extract_strided_slice %302 {offsets = [0, 0], sizes = [16, 128], strides = [1, 1]} : vector<16x512xf32> to vector<16x128xf32>
    %304 = vector.extract_strided_slice %300 {offsets = [0, 0], sizes = [16, 128], strides = [1, 1]} : vector<16x640xf32> to vector<16x128xf32>
    %305 = arith.addf %303, %304 : vector<16x128xf32>
    %306 = arith.negf %305 : vector<16x128xf32>
    %307 = math.exp %306 : vector<16x128xf32>
    %cst_87 = arith.constant 1.000000e+00 : f32
    %308 = vector.broadcast %cst_87 : f32 to vector<16x128xf32>
    %309 = arith.addf %308, %307 : vector<16x128xf32>
    %310 = arith.divf %308, %309 : vector<16x128xf32>
    %311 = vector.extract_strided_slice %302 {offsets = [0, 128], sizes = [16, 128], strides = [1, 1]} : vector<16x512xf32> to vector<16x128xf32>
    %312 = vector.extract_strided_slice %300 {offsets = [0, 128], sizes = [16, 128], strides = [1, 1]} : vector<16x640xf32> to vector<16x128xf32>
    %313 = arith.addf %311, %312 : vector<16x128xf32>
    %314 = arith.negf %313 : vector<16x128xf32>
    %315 = math.exp %314 : vector<16x128xf32>
    %cst_88 = arith.constant 1.000000e+00 : f32
    %316 = vector.broadcast %cst_88 : f32 to vector<16x128xf32>
    %317 = arith.addf %316, %315 : vector<16x128xf32>
    %318 = arith.divf %316, %317 : vector<16x128xf32>
    %319 = vector.extract_strided_slice %302 {offsets = [0, 256], sizes = [16, 128], strides = [1, 1]} : vector<16x512xf32> to vector<16x128xf32>
    %320 = vector.extract_strided_slice %300 {offsets = [0, 256], sizes = [16, 128], strides = [1, 1]} : vector<16x640xf32> to vector<16x128xf32>
    %321 = arith.addf %319, %320 : vector<16x128xf32>
    %322 = math.tanh %321 : vector<16x128xf32>
    %323 = vector.extract_strided_slice %302 {offsets = [0, 384], sizes = [16, 128], strides = [1, 1]} : vector<16x512xf32> to vector<16x128xf32>
    %324 = vector.extract_strided_slice %300 {offsets = [0, 384], sizes = [16, 128], strides = [1, 1]} : vector<16x640xf32> to vector<16x128xf32>
    %325 = arith.addf %323, %324 : vector<16x128xf32>
    %326 = arith.negf %325 : vector<16x128xf32>
    %327 = math.exp %326 : vector<16x128xf32>
    %cst_89 = arith.constant 1.000000e+00 : f32
    %328 = vector.broadcast %cst_89 : f32 to vector<16x128xf32>
    %329 = arith.addf %328, %327 : vector<16x128xf32>
    %330 = arith.divf %328, %329 : vector<16x128xf32>
    %331 = vector.extract_strided_slice %300 {offsets = [0, 512], sizes = [16, 128], strides = [1, 1]} : vector<16x640xf32> to vector<16x128xf32>
    %332 = arith.addf %323, %331 : vector<16x128xf32>
    %333 = arith.negf %332 : vector<16x128xf32>
    %334 = math.exp %333 : vector<16x128xf32>
    %cst_90 = arith.constant 1.000000e+00 : f32
    %335 = vector.broadcast %cst_90 : f32 to vector<16x128xf32>
    %336 = arith.addf %335, %334 : vector<16x128xf32>
    %337 = arith.divf %335, %336 : vector<16x128xf32>
    %338 = arith.mulf %310, %322 : vector<16x128xf32>
    %339 = arith.mulf %330, %293 : vector<16x128xf32>
    %340 = arith.addf %338, %339 : vector<16x128xf32>
    %341 = arith.mulf %337, %294 : vector<16x128xf32>
    %342 = arith.addf %340, %341 : vector<16x128xf32>
    %343 = math.tanh %342 : vector<16x128xf32>
    %344 = arith.mulf %318, %343 : vector<16x128xf32>
    %345 = vector.broadcast %274 : vector<1x16xi32> to vector<16x16xi32>
    %346 = arith.cmpi eq, %0, %345 : vector<16x16xi32>
    %c0_i32_91 = arith.constant 0 : i32
    %347 = vector.broadcast %c0_i32_91 : i32 to vector<1x16xi32>
    %348 = arith.cmpi sgt, %274, %347 : vector<1x16xi32>
    %349 = vector.broadcast %348 : vector<1x16xi1> to vector<16x16xi1>
    %350 = arith.andi %346, %349 : vector<16x16xi1>
    %351 = arith.extui %350 : vector<16x16xi1> to vector<16x16xi32>
    %352 = arith.sitofp %351 : vector<16x16xi32> to vector<16x16xf32>
    %353 = tpu.concatenate %344, %342 in 1 : vector<16x128xf32>, vector<16x128xf32> -> vector<16x256xf32>
    %cst_92 = arith.constant dense<0.000000e+00> : vector<16x256xf32>
    %354 = tpu.matmul %352, %353, %cst_92 {dimension_numbers = #tpu.dot_dimension_numbers<[1], [0], [0], [1], [0, 0, 1, 1], [], []>} : vector<16x16xf32>, vector<16x256xf32>, vector<16x256xf32> -> vector<16x256xf32>
    %cst_93 = arith.constant dense<0.000000e+00> : vector<16xf32>
    %355 = vector.multi_reduction <add>, %352, %cst_93 [1] : vector<16x16xf32> to vector<16xf32>
    %356 = vector.shape_cast %355 : vector<16xf32> to vector<16x1xf32>
    %cst_94 = arith.constant 0.000000e+00 : f32
    %357 = vector.broadcast %cst_94 : f32 to vector<16x1xf32>
    %358 = arith.cmpf ogt, %356, %357 : vector<16x1xf32>
    %359 = vector.shape_cast %358 : vector<16x1xi1> to vector<16x1xi1>
    %360 = vector.broadcast %359 : vector<16x1xi1> to vector<16x256xi1>
    %361 = arith.select %360, %354, %271 : vector<16x256xi1>, vector<16x256xf32>
    %c4_i32 = arith.constant 4 : i32
    %c0_95 = arith.constant 0 : index
    %c0_96 = arith.constant 0 : index
    %c0_97 = arith.constant 0 : index
    %362 = vector.load %arg6[%c0_95, %c0_96, %c0_97] : memref<1x16x256xf32, #tpu.memory_space<vmem>>, vector<1x16x256xf32>
    %363 = vector.shape_cast %362 : vector<1x16x256xf32> to vector<16x256xf32>
    %364 = vector.shape_cast %361 : vector<16x256xf32> to vector<1x16x256xf32>
    tpu.vector_store %arg6[%c0_95, %c0_96, %c0_97], %364 {strides = array<i32>} : memref<1x16x256xf32, #tpu.memory_space<vmem>>, vector<1x16x256xf32>,
    return
  }
  func.func @transform_0(%arg0: i32) -> (i32, i32, i32, i32) {
    %c0_i32 = arith.constant 0 : i32
    %c0_i32_0 = arith.constant 0 : i32
    %c0_i32_1 = arith.constant 0 : i32
    %c0_i32_2 = arith.constant 0 : i32
    return %arg0, %c0_i32, %c0_i32_0, %c0_i32_1 : i32, i32, i32, i32
  }
  func.func @transform_1(%arg0: i32) -> (i32, i32, i32, i32) {
    %c0_i32 = arith.constant 0 : i32
    %c0_i32_0 = arith.constant 0 : i32
    %c0_i32_1 = arith.constant 0 : i32
    %c0_i32_2 = arith.constant 0 : i32
    return %arg0, %c0_i32, %c0_i32_0, %c0_i32_1 : i32, i32, i32, i32
  }
  func.func @transform_2(%arg0: i32) -> (i32, i32, i32, i32) {
    %c0_i32 = arith.constant 0 : i32
    %c0_i32_0 = arith.constant 0 : i32
    %c0_i32_1 = arith.constant 0 : i32
    %c0_i32_2 = arith.constant 0 : i32
    return %arg0, %c0_i32, %c0_i32_0, %c0_i32_1 : i32, i32, i32, i32
  }
  func.func @transform_3(%arg0: i32) -> (i32, i32, i32) {
    %c0_i32 = arith.constant 0 : i32
    %c0_i32_0 = arith.constant 0 : i32
    %c0_i32_1 = arith.constant 0 : i32
    return %arg0, %c0_i32, %c0_i32_0 : i32, i32, i32
  }
  func.func @transform_4(%arg0: i32) -> (i32, i32) {
    %c0_i32 = arith.constant 0 : i32
    %c0_i32_0 = arith.constant 0 : i32
    %c0_i32_1 = arith.constant 0 : i32
    return %c0_i32, %c0_i32_0 : i32, i32
  }
  func.func @transform_5(%arg0: i32) -> (i32, i32, i32) {
    %c0_i32 = arith.constant 0 : i32
    %c0_i32_0 = arith.constant 0 : i32
    %c0_i32_1 = arith.constant 0 : i32
    return %arg0, %c0_i32, %c0_i32_0 : i32, i32, i32
  }
}

</mosaic_0001>

<bundles_post_ra>
// kernel: tpu_custom_call.1
= control target key start
LH: loop header
LB: loop body
LE: loop exit
PB: predicated region body
PF: predicated region fallthrough
CT: control target
= control target key end

     0   :  { %s5281_s0 = inlined_call_operand.hbm [shape: s32[2,4,1,16], index: 0, kind: input, shape index: {}]   ;;  %s5282_s1 = inlined_call_operand.hbm [shape: s32[2,4,1,16], index: 1, kind: input, shape index: {}]   ;;  %s5283_s2 = inlined_call_operand.hbm [shape: s32[2,4,1,16], index: 2, kind: input, shape index: {}]   ;;  %s5284_s3 = inlined_call_operand.hbm [shape: f32[2,16,512], index: 3, kind: input, shape index: {}]   ;;  %s5285_s4 = inlined_call_operand.hbm [shape: bf16[256,640], index: 4, kind: input, shape index: {}]   ;;  %s5286_s5 = inlined_call_operand.hbm [shape: f32[2,16,256], index: 5, kind: output, shape index: {}]  }
   0x1   :  { %5383 = sst [smem:[#allocation71_spill]] %s5281_s0 }
   0x2   :  { %5384 = sst [smem:[#allocation72_spill]] %s5282_s1 }
   0x3   :  { %5385 = sst [smem:[#allocation73_spill]] %s5285_s4 }
   0x4   :  { %10 = vsyncpa [#allocation3], 0 }
   0x5   :  { %12 = vsyncpa [#allocation3 + $0x1], 0 }
   0x6   :  { %13 = vsyncpa [#allocation6], 0 }
   0x7   :  { %15 = vsyncpa [#allocation6 + $0x1], 0 }
   0x8   :  { %16 = vsyncpa [#allocation9], 0 }
   0x9   :  { %18 = vsyncpa [#allocation9 + $0x1], 0 }
   0xa   :  { %19 = vsyncpa [#allocation4], 0 }
   0xb   :  { %21 = vsyncpa [#allocation4 + $0x1], 0  ;;  %s4041_s18 = smov 0   ;;  %s4043_s19 = smov 0  }
   0xc   :  { %s4045_s20 = smov 0   ;;  %s4047_s21 = smov 0  }
   0xd LB: > { %5386 = sst [smem:[#allocation17_spill]] %s3989_s20  ;;  %s4062_s22 = sadd.s32 4294967295, %s3993_s21   ;;  %s3993_s21 = sphi %s4047_s21, %s5572_s21   ;;  %s3989_s20 = sphi %s4045_s20, %s5569_s20   ;;  %s3985_s19 = sphi %s4043_s19, %s5571_s19   ;;  %s3981_s18 = sphi %s4041_s18, %s5570_s18  }
   0xe   : > { %s3022_s23 = sadd.s32 4294967294, %s3993_s21   ;;  %s4066_s24 = sadd.s32 1, %s3993_s21  }
   0xf   : > { %s34_s25 = sadd.s32 1, %s3989_s20  ;;  %s31_s26 = ssub.s32 %s3993_s21, %s4066_s24 }
  0x10   : > { %p41_p0 = scmp.ne.s32.totalorder %s3989_s20, %s3985_s19  ;;  %p32_p1 = scmp.eq.s32.totalorder %s31_s26, 0 }
  0x11   : > { %p42_p2 = scmp.eq.s32.totalorder %s3993_s21, 0  ;;  %p47_p3 = scmp.ne.s32.totalorder %s3985_s19, %s3981_s18 }
  0x12   : > { %p5288_p4 = scmp.eq.s32.totalorder %s4062_s22, 0  ;;  %p170_p7 = scmp.eq.s32.totalorder %s4062_s22, 1 }
  0x13   : > { %s4078_s27 = scalar_select %p32_p1, %s3989_s20, %s34_s25  }
  0x14   : > { %p4080_p5 = por %p42_p2, %p41_p0  ;;  %p4086_p6 = por %p5288_p4, %p47_p3 }
  0x15   : > { %5387 = sst [smem:[#allocation18_spill]] %s4078_s27  ;;  %p176_p8 = scmp.eq.s32.totalorder %s3022_s23, 1 }
  0x16   : > { %s5389_s29 = scalar_select %p4086_p6, 1, 0 }
  0x17   : > { %p3023_p9 = scmp.ge.s32.totalorder %s3993_s21, 1  ;;  %p183_p10 = scmp.lt.s32.totalorder %s3993_s21, 3 }
  0x18   : > { %p4093_p11 = por %p170_p7, %p41_p0  ;;  %p4097_p12 = por %p176_p8, %p47_p3 }
  0x19   : > { %p4101_p13 = pnand %p3023_p9, %p183_p10  ;;  %s3995_s8 = smov [#allocation10]  }
  0x1a   : > { %s5390_s30 = scalar_select %p4093_p11, 1, 0 }
  0x1b   : > { %s5391_s6 = scalar_select %p4097_p12, 1, 0 }
  0x1c   : > { %s5392_s7 = scalar_select %p4101_p13, 1, 0 }
  0x1d   : > { %p3351_p1 = pneg %p4101_p13  ;;  %s195_s9 = sshll.u32 %s3995_s8, 4  ;;  %s196_s9 = int_to_ptr.vmem [resolvable:$true] %s195_s9 }
  0x1e   : > { %p3373_p3 = scmp.lt.s32.totalorder %s3993_s21, 2  ;;  %s4116_s11 = sand.u32 1, %s3989_s20  }
  0x1f   : > { %p4109_p2 = pnand %p3351_p1, %p5288_p4  ;;  %s4119_s12 = sshll.u32 %s4116_s11, 2 }
  0x20   : > { %s3790_s13 = scalar_lea.vmem %s196_s9, 10240  ;;  %p3798_p12 = scmp.lt.s32.totalorder %s196_s9, %s196_s9 }
  0x21   : > { %p3781_p7 = pneg %p4109_p2  ;;  %p3791_p8 = scmp.ne.s32.totalorder %s196_s9, %s3790_s13 }
  0x22   : > { %p3799_p11 = scmp.lt.s32.totalorder %s3790_s13, %s3790_s13 }
  0x23   : > { %p3793_p9 = pnand %p3791_p8, %p3781_p7 }
  0x24   : > { %p3800_p1 = por %p3799_p11, %p3798_p12 }
  0x25   : > { %p3794_p10 = pneg %p3793_p9 }
  0x27   : > { %p3801_p4 = pnand %p3800_p1, %p3794_p10 }
  0x29   : > { %3804 = shalt.err (!%p3801_p4)
}
  0x2a   : > { %s3996_s14 = smov 320   ;;  %s3997_s15 = smov 20  }
  0x2b   : > { %s5394_s4 = sld [smem:[#allocation73_spill]]  ;;  %s4129_s23 = sshll.u32 %s3993_s21, 6 }
  0x2c   : > { %p4135_p4 = pnand %p3373_p3, %p4080_p5  ;;  %s5289_s26 = sand.u32 1, %s3993_s21  }
  0x2d   : > { %s5396_s1 = sld [smem:[#allocation72_spill]]  ;;  %s4151_s28 = scalar_lea.sflag [#allocation6], %s5289_s26 }
  0x2e   : > { %p4157_p11 = pneg %p4135_p4 }
  0x31   : > { %3354 = dma.hbm_to_vmem [thread:$0]  (!%p4109_p2), %s5394_s4, 10240, %s196_s9, [#allocation9], %s3996_s14, %s3996_s14, %s3997_s15  }
  0x32   : > { %s234_s9 = scalar_lea.vmem [#allocation5], %s4119_s12 }
  0x33   : > { %s4144_s27 = scalar_lea.hbm %s5396_s1, %s4129_s23  ;;  %s241_s10 = sshll.u32 %s234_s9, 4  ;;  %s4147_s10 = int_to_ptr.vmem [resolvable:$true] %s241_s10 }
  0x34   : > { %s3805_s14 = scalar_lea.hbm %s4144_s27, 64  ;;  %s3810_s8 = scalar_lea.hbm %s5396_s1, 128 }
  0x35   : > { %p3806_p5 = scmp.ne.s32.totalorder %s4144_s27, %s3805_s14  ;;  %p3811_p3 = scmp.lt.s32.totalorder %s4144_s27, %s5396_s1 }
  0x36   : > { %p3812_p7 = scmp.lt.s32.totalorder %s3810_s8, %s3805_s14 }
  0x37   : > { %p3808_p12 = pnand %p4157_p11, %p3806_p5 }
  0x38   : > { %p3813_p8 = por %p3812_p7, %p3811_p3 }
  0x39   : > { %p3809_p2 = pneg %p3808_p12 }
  0x3b   : > { %p3814_p9 = pnand %p3813_p8, %p3809_p2 }
  0x3d   : > { %3817 = shalt.err (!%p3814_p9)
}
  0x3e   : > { %s3818_s26 = scalar_lea.vmem %s4147_s10, 64  ;;  %s3998_s4 = smov [#allocation5]  }
  0x3f   : > { %p3819_p10 = scmp.ne.s32.totalorder %s4147_s10, %s3818_s26  ;;  %s3823_s16 = sshll.u32 %s3998_s4, 4  ;;  %s3824_s16 = int_to_ptr.vmem [resolvable:$false] %s3823_s16 }
  0x40   : > { %s3825_s17 = scalar_lea.vmem %s3824_s16, 128  ;;  %p3826_p12 = scmp.lt.s32.totalorder %s4147_s10, %s3824_s16 }
  0x41   : > { %p3821_p1 = pnand %p3819_p10, %p4157_p11  ;;  %p3827_p0 = scmp.lt.s32.totalorder %s3825_s17, %s3818_s26 }
  0x43   : > { %p3822_p5 = pneg %p3821_p1  ;;  %p3828_p6 = por %p3827_p0, %p3826_p12 }
  0x45   : > { %p3829_p13 = pnand %p3828_p6, %p3822_p5 }
  0x47   : > { %3832 = shalt.err (!%p3829_p13)
}
  0x48   : > { %s5293_s14 = smov 16   ;;  %s4000_s8 = smov 1  }
  0x49   : > { %3361 = dma.hbm_to_vmem [thread:$0]  (!%p4135_p4), %s4144_s27, 64, %s4147_s10, %s4151_s28, %s5293_s14, %s5293_s14, %s4000_s8  }
  0x4a   : > { %s5398_s0 = sld [smem:[#allocation71_spill]]  ;;  %s213_s9 = scalar_lea.vmem [#allocation2], %s4119_s12 }
  0x4b   : > { %s220_s16 = sshll.u32 %s213_s9, 4  ;;  %s210_s17 = scalar_lea.sflag [#allocation3], %s4116_s11  ;;  %s4190_s16 = int_to_ptr.vmem [resolvable:$true] %s220_s16 }
  0x50   : > { %s4187_s13 = scalar_lea.hbm %s5398_s0, %s4129_s23  ;;  %s3838_s10 = scalar_lea.hbm %s5398_s0, 128 }
  0x51   : > { %s3833_s1 = scalar_lea.hbm %s4187_s13, 64  ;;  %p3839_p2 = scmp.lt.s32.totalorder %s4187_s13, %s5398_s0 }
  0x52   : > { %p3834_p6 = scmp.ne.s32.totalorder %s4187_s13, %s3833_s1  ;;  %p3840_p3 = scmp.lt.s32.totalorder %s3838_s10, %s3833_s1 }
  0x54   : > { %p3836_p13 = pnand %p3834_p6, %p4157_p11  ;;  %p3841_p7 = por %p3840_p3, %p3839_p2 }
  0x56   : > { %p3837_p0 = pneg %p3836_p13 }
  0x58   : > { %p3842_p8 = pnand %p3841_p7, %p3837_p0 }
  0x5a   : > { %3845 = shalt.err (!%p3842_p8)
}
  0x5b   : > { %s3846_s9 = scalar_lea.vmem %s4190_s16, 64  ;;  %s4001_s14 = smov [#allocation2]  }
  0x5c   : > { %p3847_p9 = scmp.ne.s32.totalorder %s4190_s16, %s3846_s9  ;;  %s3851_s20 = sshll.u32 %s4001_s14, 4  ;;  %s3852_s20 = int_to_ptr.vmem [resolvable:$false] %s3851_s20 }
  0x5d   : > { %s3853_s27 = scalar_lea.vmem %s3852_s20, 128  ;;  %p3854_p5 = scmp.lt.s32.totalorder %s4190_s16, %s3852_s20 }
  0x5e   : > { %p3849_p10 = pnand %p3847_p9, %p4157_p11  ;;  %p3855_p12 = scmp.lt.s32.totalorder %s3853_s27, %s3846_s9 }
  0x60   : > { %p3850_p1 = pneg %p3849_p10  ;;  %p3856_p6 = por %p3855_p12, %p3854_p5 }
  0x62   : > { %p3857_p13 = pnand %p3856_p6, %p3850_p1 }
  0x64   : > { %3860 = shalt.err (!%p3857_p13)
}
  0x65   : > { %s5399_s1 = smov 16   ;;  %s4220_s4 = scalar_lea.hbm %s5283_s2, %s4129_s23 }
  0x66   : > { %3358 = dma.hbm_to_vmem [thread:$0]  (!%p4135_p4), %s4187_s13, 64, %s4190_s16, %s210_s17, %s5399_s1, %s5399_s1, %s4000_s8  }
  0x67   : > { %s255_s26 = scalar_lea.vmem [#allocation7], %s4119_s12  ;;  %s3035_s20 = sshll.u32 %s4116_s11, 6 }
  0x68   : > { %s262_s9 = sshll.u32 %s255_s26, 4  ;;  %s3861_s27 = scalar_lea.hbm %s4220_s4, 64  ;;  %s4223_s9 = int_to_ptr.vmem [resolvable:$true] %s262_s9 }
  0x69   : > { %p3862_p0 = scmp.ne.s32.totalorder %s4220_s4, %s3861_s27  ;;  %s3866_s16 = scalar_lea.hbm %s5283_s2, 128 }
  0x6a   : > { %p3867_p7 = scmp.lt.s32.totalorder %s4220_s4, %s5283_s2  ;;  %p3868_p8 = scmp.lt.s32.totalorder %s3866_s16, %s3861_s27 }
  0x6b   : > { %p3864_p2 = pnand %p3862_p0, %p4157_p11 }
  0x6c   : > { %p3869_p9 = por %p3868_p8, %p3867_p7 }
  0x6d   : > { %p3865_p3 = pneg %p3864_p2 }
  0x6f   : > { %p3870_p10 = pnand %p3869_p9, %p3865_p3 }
  0x71   : > { %3873 = shalt.err (!%p3870_p10)
}
  0x72   : > { %s3874_s12 = scalar_lea.vmem %s4223_s9, 64  ;;  %s4002_s14 = smov [#allocation7]  }
  0x73   : > { %p3875_p1 = scmp.ne.s32.totalorder %s4223_s9, %s3874_s12  ;;  %s3879_s0 = sshll.u32 %s4002_s14, 4  ;;  %s3880_s0 = int_to_ptr.vmem [resolvable:$false] %s3879_s0 }
  0x74   : > { %s3881_s10 = scalar_lea.vmem %s3880_s0, 128  ;;  %p3882_p6 = scmp.lt.s32.totalorder %s4223_s9, %s3880_s0 }
  0x75   : > { %p3877_p5 = pnand %p3875_p1, %p4157_p11  ;;  %p3883_p13 = scmp.lt.s32.totalorder %s3881_s10, %s3874_s12 }
  0x77   : > { %p3878_p12 = pneg %p3877_p5  ;;  %p3884_p0 = por %p3883_p13, %p3882_p6 }
  0x79   : > { %p3885_p2 = pnand %p3884_p0, %p3878_p12 }
  0x7b   : > { %3888 = shalt.err (!%p3885_p2)
}
  0x7c   : > { %3364 = dma.hbm_to_vmem [thread:$0]  (!%p4135_p4), %s4220_s4, 64, %s4223_s9, %s4151_s28, %s5399_s1, %s5399_s1, %s4000_s8  }
  0x7d   : > { %s3234_s26 = sshll.u32 %s3993_s21, 10  ;;  %s276_s17 = scalar_lea.vmem [#allocation8], %s3035_s20 }
  0x7e   : > { %s4254_s16 = scalar_lea.hbm %s5284_s3, %s3234_s26  ;;  %s283_s23 = sshll.u32 %s276_s17, 4  ;;  %s4258_s23 = int_to_ptr.vmem [resolvable:$true] %s283_s23 }
  0x7f   : > { %s5400_s12 = sand.u32 1, %s3993_s21   ;;  %s3889_s0 = scalar_lea.hbm %s4254_s16, 1024 }
  0x80   : > { %s4262_s14 = scalar_lea.sflag [#allocation9], %s5400_s12  ;;  %p3890_p3 = scmp.ne.s32.totalorder %s4254_s16, %s3889_s0 }
  0x81   : > { %s3894_s1 = scalar_lea.hbm %s5284_s3, 2048  ;;  %p3895_p9 = scmp.lt.s32.totalorder %s4254_s16, %s5284_s3 }
  0x82   : > { %p3892_p7 = pnand %p3890_p3, %p4157_p11  ;;  %p3896_p10 = scmp.lt.s32.totalorder %s3894_s1, %s3889_s0 }
  0x84   : > { %p3893_p8 = pneg %p3892_p7  ;;  %p3897_p1 = por %p3896_p10, %p3895_p9 }
  0x86   : > { %p3898_p5 = pnand %p3897_p1, %p3893_p8 }
  0x88   : > { %3901 = shalt.err (!%p3898_p5)
}
  0x89   : > { %s3902_s9 = scalar_lea.vmem %s4258_s23, 1024  ;;  %s4003_s20 = smov [#allocation8]  }
  0x8a   : > { %p3903_p12 = scmp.ne.s32.totalorder %s4258_s23, %s3902_s9  ;;  %s3907_s10 = sshll.u32 %s4003_s20, 4  ;;  %s3908_s10 = int_to_ptr.vmem [resolvable:$false] %s3907_s10 }
  0x8b   : > { %s3909_s26 = scalar_lea.vmem %s3908_s10, 2048  ;;  %p3910_p0 = scmp.lt.s32.totalorder %s4258_s23, %s3908_s10 }
  0x8c   : > { %p3905_p6 = pnand %p3903_p12, %p4157_p11  ;;  %p3911_p2 = scmp.lt.s32.totalorder %s3909_s26, %s3902_s9 }
  0x8e   : > { %p3906_p13 = pneg %p3905_p6  ;;  %p3912_p3 = por %p3911_p2, %p3910_p0 }
  0x90   : > { %p3913_p7 = pnand %p3912_p3, %p3906_p13 }
  0x92   : > { %3916 = shalt.err (!%p3913_p7)
}
  0x93   : > { %s4004_s27 = smov 512   ;;  %s4005_s13 = smov 32  }
  0x94   : > { %3367 = dma.hbm_to_vmem [thread:$0]  (!%p4135_p4), %s4254_s16, 1024, %s4258_s23, %s4262_s14, %s4004_s27, %s4004_s27, %s4005_s13  }
  0x95   : > { %p5401_p11 = scmp.ne.s32.totalorder %s5392_s7, 0 }
  0x97   : > { %295 = sbr.rel (%p5401_p11) target bundleno = 3235 (0xca3), region = 40 }
  0x9c   : > { %s4288_s15 = sand.u32 1, %s3985_s19   ;;  %p5402_p8 = scmp.ne.s32.totalorder %s5389_s29, 0 }
  0x9d   : > { %s3039_s17 = sshll.u32 %s4288_s15, 2  ;;  %s298_s12 = scalar_lea.sflag [#allocation3], %s4288_s15 }
  0x9e   : > { %s4292_s0 = scalar_lea.vmem [#allocation2], %s3039_s17 }
  0x9f   : > { %3960 = dma.done.wait (%p5402_p8), %s298_s12, 64  }
  0xa0   : > { %3962 = vsyncadd (%p5402_p8), %s298_s12, 4294967232  ;;  %s306_s25 = sand.u32 1, %s4062_s22   ;;  %s4299_s16 = scalar_lea.vmem [#allocation5], %s3039_s17 }
  0xa1   : > { %s307_s7 = scalar_lea.sflag [#allocation6], %s306_s25 }
  0xa2   : > { %3964 = dma.done.wait (%p5402_p8), %s307_s7, 128  }
  0xa3   : > { %3966 = vsyncadd (%p5402_p8), %s307_s7, 4294967168  ;;  %s3042_s23 = sshll.u32 %s4288_s15, 6  ;;  %s4306_s14 = scalar_lea.vmem [#allocation7], %s3039_s17 }
  0xa4   : > { %s325_s28 = scalar_lea.sflag [#allocation9], %s306_s25  ;;  %s4308_s8 = scalar_lea.vmem [#allocation8], %s3042_s23 }
  0xa5   : > { %3968 = dma.done.wait (%p5402_p8), %s325_s28, 1024  }
  0xa6   : > { %3970 = vsyncadd (%p5402_p8), %s325_s28, 4294966272  ;;  %p5403_p4 = scmp.eq.s32.totalorder %s4062_s22, 0 }
  0xa8   : > { %3972 = dma.done.wait (%p5403_p4), [#allocation9], 10240   ;;  %p5404_p9 = pmov %p5403_p4 }
  0xa9   : > { %v375_v0 = vlaneseq  ;;  %v5295_v1 = vmov 0.0   ;;  %v3048_v4 = vld [vmem:[%s4306_s14] ss:$0 sm:$0xff]  ;;  %s4007_s29 = smov 16   ;;  %v3045_v7 = vld [vmem:[%s4299_s16] ss:$0 sm:$0xff] }
  0xaa   : > { %3974 = vsyncadd (%p5404_p9), [#allocation9], 4294957056  ;;  %3329 = vmatprep.subr.mxu1 %v5295_v1  ;;  %vm409_vm3 = vcmask 130048   ;;  %v4339_v14 = vld [vmem:[#allocation10 + $0x11c] ss:$20 sps:$4 sm:$0xff]   ;;  %s3044_s1 = sshll.u32 %s4288_s15, 5 }
  0xab   : > { %v4319_v2 = vshrl.u32 %v375_v0, 7  ;;  %3330 = vmatpush3.msra.mxu1 %v5295_v1  ;;  %v4341_v15 = vld [vmem:[#allocation10 + $0x124] ss:$20 sps:$4 sm:$0xff]   ;;  %v4343_v16 = vld [vmem:[#allocation10 + $0x120] ss:$20 sps:$4 sm:$0xff]   ;;  %s373_s11 = scalar_lea.vmem [#allocation11], %s3044_s1 }
  0xac   : > { %1059 = vmatprep.subr.bf16.mxu1 %v4339_v14  ;;  %1102 = vmatprep.subr.bf16.mxu0 %v4341_v15  ;;  %v4347_v17 = vld [vmem:[#allocation10 + $0xfc] ss:$20 sps:$4 sm:$0xff]   ;;  %v4350_v18 = vld [vmem:[#allocation10 + $0xf8] ss:$20 sps:$4 sm:$0xff]   ;;  %v4353_v19 = vld [vmem:[#allocation10 + $0xd4] ss:$20 sps:$4 sm:$0xff]  }
  0xad   : > { %v4323_v3 = vadd.s32 8, %v4319_v2  ;;  %vm395_vm0 = vcmp.eq.s32.totalorder %v4319_v2, %v3048_v4  ;;  %vm385_vm2 = vcmp.eq.s32.totalorder %v4319_v2, %v3045_v7  ;;  %1103 = vmatpush1.bf16.msra.mxu0 %v4343_v16  ;;  %v4356_v20 = vld [vmem:[#allocation10 + $0xd0] ss:$20 sps:$4 sm:$0xff]   ;;  %v4359_v21 = vld [vmem:[#allocation10 + $0xac] ss:$20 sps:$4 sm:$0xff]   ;;  %s2874_s4 = sshll.u32 %s373_s11, 4  ;;  %s5230_s4 = int_to_ptr.vmem [resolvable:$true] %s2874_s4 }
  0xae   : > { %v3049_v5 = vsel %vm395_vm0, 1.0, %v5295_v1  ;;  %v3046_v8 = vsel %vm385_vm2, 1.0, %v5295_v1  ;;  %1104 = vmatprep.subr.bf16.mxu0 %v4347_v17  ;;  %v4362_v22 = vld [vmem:[#allocation10 + $0xa8] ss:$20 sps:$4 sm:$0xff]   ;;  %v4365_v23 = vld [vmem:[#allocation10 + $0x84] ss:$20 sps:$4 sm:$0xff]  }
  0xaf   : > { %vm396_vm1 = vcmp.eq.s32.totalorder %v4323_v3, %v3048_v4  ;;  %403 = vrot.lane.b32.xlu0 %v3049_v5, %s4007_s29  ;;  %vm386_vm4 = vcmp.eq.s32.totalorder %v4323_v3, %v3045_v7  ;;  %v4368_v24 = vld [vmem:[#allocation10 + $0x80] ss:$20 sps:$4 sm:$0xff]   ;;  %v4371_v25 = vld [vmem:[#allocation10 + $0x5c] ss:$20 sps:$4 sm:$0xff]   ;;  %v4374_v26 = vld [vmem:[#allocation10 + $0x58] ss:$20 sps:$4 sm:$0xff]  }
  0xb0   : > { %v3050_v6 = vsel %vm396_vm1, 1.0, %v5295_v1  ;;  %v3047_v11 = vsel %vm386_vm4, 1.0, %v5295_v1  ;;  %5405 = vst [vmem:[#allocation19_spill] sm:$0xff] %v4368_v24  ;;  %5406 = vst [vmem:[#allocation20_spill] sm:$0xff] %v4371_v25  ;;  %v4377_v27 = vld [vmem:[#allocation10 + $0x34] ss:$20 sps:$4 sm:$0xff]  }
  0xb1   : > { %1105 = vmatpush1.bf16.msra.mxu0 %v4350_v18  ;;  %5407 = vst [vmem:[#allocation21_spill] sm:$0xff] %v4374_v26  ;;  %5408 = vst [vmem:[#allocation22_spill] sm:$0xff] %v4377_v27  ;;  %v4380_v28 = vld [vmem:[#allocation10 + $0x30] ss:$20 sps:$4 sm:$0xff]   ;;  %v4383_v29 = vld [vmem:[#allocation10 + $0xc] ss:$20 sps:$4 sm:$0xff]  }
  0xb2   : > { %1106 = vmatprep.subr.bf16.mxu0 %v4353_v19  ;;  %5409 = vst [vmem:[#allocation23_spill] sm:$0xff] %v4380_v28  ;;  %5410 = vst [vmem:[#allocation24_spill] sm:$0xff] %v4383_v29  ;;  %v4386_v30 = vld [vmem:[#allocation10 + $0x8] ss:$20 sps:$4 sm:$0xff]   ;;  %v4389_v31 = vld [vmem:[#allocation10 + $0x264] ss:$20 sps:$4 sm:$0xff]  }
  0xb3   : > { %405 = vrot.lane.b32.xlu0 %v3050_v6, %s4007_s29  ;;  %5411 = vst [vmem:[#allocation25_spill] sm:$0xff] %v4386_v30  ;;  %5412 = vst [vmem:[#allocation26_spill] sm:$0xff] %v4389_v31  ;;  %v4392_v32 = vld [vmem:[#allocation10 + $0x260] ss:$20 sps:$4 sm:$0xff]   ;;  %v4395_v33 = vld [vmem:[#allocation10 + $0x23c] ss:$20 sps:$4 sm:$0xff]  }
  0xb4   : > { %5413 = vst [vmem:[#allocation27_spill] sm:$0xff] %v4392_v32  ;;  %5414 = vst [vmem:[#allocation28_spill] sm:$0xff] %v4395_v33  ;;  %v4398_v34 = vld [vmem:[#allocation10 + $0x238] ss:$20 sps:$4 sm:$0xff]   ;;  %v4401_v35 = vld [vmem:[#allocation10 + $0x214] ss:$20 sps:$4 sm:$0xff]  }
  0xb5   : > { %1107 = vmatpush1.bf16.msra.mxu0 %v4356_v20  ;;  %5415 = vst [vmem:[#allocation29_spill] sm:$0xff] %v4398_v34  ;;  %5416 = vst [vmem:[#allocation30_spill] sm:$0xff] %v4401_v35  ;;  %v4404_v36 = vld [vmem:[#allocation10 + $0x210] ss:$20 sps:$4 sm:$0xff]   ;;  %v4407_v37 = vld [vmem:[#allocation10 + $0x1ec] ss:$20 sps:$4 sm:$0xff]  }
  0xb6   : > { %1108 = vmatprep.subr.bf16.mxu0 %v4359_v21  ;;  %5417 = vst [vmem:[#allocation31_spill] sm:$0xff] %v4404_v36  ;;  %5418 = vst [vmem:[#allocation32_spill] sm:$0xff] %v4407_v37  ;;  %v4410_v38 = vld [vmem:[#allocation10 + $0x1e8] ss:$20 sps:$4 sm:$0xff]   ;;  %v4413_v39 = vld [vmem:[#allocation10 + $0x1c4] ss:$20 sps:$4 sm:$0xff]  }
  0xb7   : > { %5419 = vst [vmem:[#allocation33_spill] sm:$0xff] %v4410_v38  ;;  %5420 = vst [vmem:[#allocation34_spill] sm:$0xff] %v4413_v39  ;;  %v4416_v40 = vld [vmem:[#allocation10 + $0x1c0] ss:$20 sps:$4 sm:$0xff]   ;;  %v4421_v42 = vld [vmem:[#allocation10 + $0x118] ss:$20 sps:$4 sm:$0xff]  }
  0xb8   : > { %5421 = vst [vmem:[#allocation35_spill] sm:$0xff] %v4416_v40  ;;  %v4423_v43 = vld [vmem:[#allocation10 + $0xf4] ss:$20 sps:$4 sm:$0xff]   ;;  %v4427_v45 = vld [vmem:[#allocation10 + $0xf0] ss:$20 sps:$4 sm:$0xff]   ;;  %s3235_s9 = sshll.u32 %s4062_s22, 9 }
  0xb9   : > { %1109 = vmatpush1.bf16.msra.mxu0 %v4362_v22  ;;  %v4430_v46 = vld [vmem:[#allocation10 + $0xcc] ss:$20 sps:$4 sm:$0xff]   ;;  %v4434_v48 = vld [vmem:[#allocation10 + $0xc8] ss:$20 sps:$4 sm:$0xff]   ;;  %v4437_v49 = vld [vmem:[#allocation10 + $0xa4] ss:$20 sps:$4 sm:$0xff]   ;;  %s5236_s26 = scalar_lea.hbm %s5286_s5, %s3235_s9 }
  0xba   : > { %1110 = vmatprep.subr.bf16.mxu0 %v4365_v23  ;;  %v4441_v51 = vld [vmem:[#allocation10 + $0xa0] ss:$20 sps:$4 sm:$0xff]   ;;  %v4444_v52 = vld [vmem:[#allocation10 + $0x7c] ss:$20 sps:$4 sm:$0xff]   ;;  %v4447_v53 = vld [vmem:[#allocation10 + $0x78] ss:$20 sps:$4 sm:$0xff]  }
  0xbb   : > { %v4450_v54 = vld [vmem:[#allocation10 + $0x54] ss:$20 sps:$4 sm:$0xff]   ;;  %v4453_v55 = vld [vmem:[#allocation10 + $0x50] ss:$20 sps:$4 sm:$0xff]   ;;  %v4456_v56 = vld [vmem:[#allocation10 + $0x2c] ss:$20 sps:$4 sm:$0xff]  }
  0xbc   : > { %v4459_v57 = vld [vmem:[#allocation10 + $0x28] ss:$20 sps:$4 sm:$0xff]   ;;  %v4462_v58 = vld [vmem:[#allocation10 + $0x4] ss:$20 sps:$4 sm:$0xff]   ;;  %v4465_v59 = vld [vmem:[#allocation10] ss:$20 sps:$4 sm:$0xff]  }
  0xbd   : > { %1111 = vmatpush1.bf16.msra.mxu0 %v4368_v24  ;;  %v4468_v60 = vld [vmem:[#allocation10 + $0x25c] ss:$20 sps:$4 sm:$0xff]   ;;  %v4471_v61 = vld [vmem:[#allocation10 + $0x258] ss:$20 sps:$4 sm:$0xff]   ;;  %v4474_v62 = vld [vmem:[#allocation10 + $0x234] ss:$20 sps:$4 sm:$0xff]  }
  0xbe   : > { %1112 = vmatprep.subr.bf16.mxu0 %v4371_v25  ;;  %v4477_v63 = vld [vmem:[#allocation10 + $0x230] ss:$20 sps:$4 sm:$0xff]   ;;  %v4480_v0 = vld [vmem:[#allocation10 + $0x20c] ss:$20 sps:$4 sm:$0xff]   ;;  %v4483_v4 = vld [vmem:[#allocation10 + $0x208] ss:$20 sps:$4 sm:$0xff]  }
  0xbf   : > { %5422 = vst [vmem:[#allocation36_spill] sm:$0xff] %v4477_v63  ;;  %5423 = vst [vmem:[#allocation37_spill] sm:$0xff] %v4480_v0  ;;  %v4486_v5 = vld [vmem:[#allocation10 + $0x1e4] ss:$20 sps:$4 sm:$0xff]   ;;  %v4489_v6 = vld [vmem:[#allocation10 + $0x1e0] ss:$20 sps:$4 sm:$0xff]  }
  0xc0   : > { %5424 = vst [vmem:[#allocation38_spill] sm:$0xff] %v4483_v4  ;;  %5425 = vst [vmem:[#allocation39_spill] sm:$0xff] %v4486_v5  ;;  %v4492_v7 = vld [vmem:[#allocation10 + $0x1bc] ss:$20 sps:$4 sm:$0xff]   ;;  %v4525_v1 = vld [vmem:[#allocation10 + $0x140] ss:$20 sps:$4 sm:$0xff]  }
  0xc1   : > { %1113 = vmatpush1.bf16.msra.mxu0 %v4374_v26  ;;  %5426 = vst [vmem:[#allocation40_spill] sm:$0xff] %v4489_v6  ;;  %5427 = vst [vmem:[#allocation41_spill] sm:$0xff] %v4492_v7  ;;  %s2861_s22 = scalar_lea.sflag [#allocation4], %s4288_s15  ;;  %s3917_s27 = scalar_lea.vmem %s5230_s4, 512 }
  0xc2   : > { %1114 = vmatprep.subr.bf16.mxu0 %v4377_v27  ;;  %5438 = vst [vmem:[#allocation52_spill] sm:$0xff] %v4525_v1  ;;  %p3918_p10 = scmp.ne.s32.totalorder %s5230_s4, %s3917_s27  ;;  %p5565_p1 = scmp.ne.s32.totalorder %s5390_s30, 0 }
  0xc3   : > { %s4009_s13 = smov [#allocation11]  }
  0xc4   : > { %p3919_p5 = pnand %p3918_p10, %p5565_p1  ;;  %s3921_s17 = sshll.u32 %s4009_s13, 4  ;;  %s3922_s17 = int_to_ptr.vmem [resolvable:$false] %s3921_s17 }
  0xc5   : > { %1115 = vmatpush1.bf16.msra.mxu0 %v4380_v28  ;;  %s3923_s12 = scalar_lea.vmem %s3922_s17, 1024  ;;  %p3924_p6 = scmp.lt.s32.totalorder %s5230_s4, %s3922_s17 }
  0xc6   : > { %1116 = vmatprep.subr.bf16.mxu0 %v4383_v29  ;;  %p3920_p12 = pneg %p3919_p5  ;;  %p3925_p13 = scmp.lt.s32.totalorder %s3923_s12, %s3917_s27 }
  0xc8   : > { %p3926_p0 = por %p3925_p13, %p3924_p6 }
  0xc9   : > { %1117 = vmatpush1.bf16.msra.mxu0 %v4386_v30 }
  0xca   : > { %1118 = vmatprep.subr.bf16.mxu0 %v4389_v31  ;;  %p3927_p2 = pnand %p3926_p0, %p3920_p12 }
  0xcd   : > { %1119 = vmatpush2.bf16.msra.mxu0 %v4392_v32 }
  0xce   : > { %1120 = vmatprep.subr.bf16.mxu0 %v4395_v33 }
  0xd1   : > { %1121 = vmatpush2.bf16.msra.mxu0 %v4398_v34 }
  0xd2   : > { %1122 = vmatprep.subr.bf16.mxu0 %v4401_v35 }
  0xd5   : > { %1123 = vmatpush2.bf16.msra.mxu0 %v4404_v36 }
  0xd6   : > { %1124 = vmatprep.subr.bf16.mxu0 %v4407_v37 }
  0xd9   : > { %1125 = vmatpush2.bf16.msra.mxu0 %v4410_v38 }
  0xda   : > { %1126 = vmatprep.subr.bf16.mxu0 %v4413_v39 }
  0xdd   : > { %1127 = vmatpush2.bf16.msra.mxu0 %v4416_v40 }
 0x121   : > { %v404_v9 = vpop.permute.xlu0 %403 }
 0x122   : > { %v410_v10 = vsel %vm409_vm3, %v3046_v8, %v404_v9  ;;  %v4495_v8 = vld [vmem:[#allocation10 + $0x1b8] ss:$20 sps:$4 sm:$0xff]   ;;  %v4499_v9 = vld [vmem:[#allocation10 + $0x194] ss:$20 sps:$4 sm:$0xff]  }
 0x123   : > { %412 = vxpose.xlu1.b32.start [1/2] (short) (narrow) %v410_v10, 32  ;;  %5428 = vst [vmem:[#allocation42_spill] sm:$0xff] %v4495_v8  ;;  %5429 = vst [vmem:[#allocation43_spill] sm:$0xff] %v4499_v9  ;;  %v4501_v10 = vld [vmem:[#allocation10 + $0x190] ss:$20 sps:$4 sm:$0xff]  }
 0x124   : > { %5430 = vst [vmem:[#allocation44_spill] sm:$0xff] %v4501_v10 }
 0x125   : > { %v406_v12 = vpop.permute.xlu0 %405 }
 0x126   : > { %v411_v13 = vsel %vm409_vm3, %v3047_v11, %v406_v12  ;;  %v4503_v11 = vld [vmem:[#allocation10 + $0x19c] ss:$20 sps:$4 sm:$0xff]   ;;  %v4506_v12 = vld [vmem:[#allocation10 + $0x198] ss:$20 sps:$4 sm:$0xff]  }
 0x127   : > { %413 = vxpose.xlu1.b32.end [2/2] (short) (narrow) %v411_v13, 32  ;;  %5431 = vst [vmem:[#allocation45_spill] sm:$0xff] %v4503_v11  ;;  %5432 = vst [vmem:[#allocation46_spill] sm:$0xff] %v4506_v12  ;;  %1128 = vmatprep.subr.bf16.mxu0 %v4503_v11  ;;  %v4511_v13 = vld [vmem:[#allocation10 + $0x16c] ss:$20 sps:$4 sm:$0xff]  }
 0x128   : > { %1129 = vmatpush2.bf16.msra.mxu0 %v4506_v12  ;;  %5433 = vst [vmem:[#allocation47_spill] sm:$0xff] %v4511_v13 }
 0x19f   : > { %v428_v41 = vpop.trf.xlu1 }
 0x1a0   : > { %3331 = vmatprep.mubr.msk.f32.mxu1 %vm409_vm3, %v428_v41  ;;  %v4513_v41 = vld [vmem:[#allocation10 + $0x168] ss:$20 sps:$4 sm:$0xff]  }
 0x1a1   : > { %5434 = vst [vmem:[#allocation48_spill] sm:$0xff] %v4513_v41 }
 0x1a3   : > { %v429_v44 = vpop.trf.xlu1 }
 0x1a4   : > { %3332 = vmatmul.mubr.msk.f32.vlgmr.msra.gmra.mxu1 %vm409_vm3, %v429_v44  ;;  %v4515_v44 = vld [vmem:[#allocation10 + $0x174] ss:$20 sps:$4 sm:$0xff]  }
 0x1a5   : > { %1060 = vmatpush1.bf16.msra.mxu1 %v4421_v42  ;;  %5435 = vst [vmem:[#allocation49_spill] sm:$0xff] %v4515_v44  ;;  %1130 = vmatprep.subr.bf16.mxu0 %v4515_v44 }
 0x1a6   : > { %1061 = vmatprep.subr.bf16.mxu1 %v4423_v43 }
 0x1a7   : > { %v430_v47 = vpop.trf.xlu1 }
 0x1a8   : > { %3334 = vmatprep.mubr.msk.f32.mxu1 %vm409_vm3, %v430_v47  ;;  %v4517_v47 = vld [vmem:[#allocation10 + $0x170] ss:$20 sps:$4 sm:$0xff]  }
 0x1a9   : > { %1062 = vmatpush1.bf16.msra.mxu1 %v4427_v45  ;;  %5436 = vst [vmem:[#allocation50_spill] sm:$0xff] %v4517_v47  ;;  %1131 = vmatpush2.bf16.msra.mxu0 %v4517_v47 }
 0x1aa   : > { %1063 = vmatprep.subr.bf16.mxu1 %v4430_v46 }
 0x1ab   : > { %v431_v50 = vpop.trf.xlu1 }
 0x1ac   : > { %3335 = vmatmul.mubr.msk.f32.gmra.mxu1 %vm409_vm3, %v431_v50  ;;  %v4523_v50 = vld [vmem:[#allocation10 + $0x144] ss:$20 sps:$4 sm:$0xff]  }
 0x1ad   : > { %1064 = vmatpush1.bf16.msra.mxu1 %v4434_v48  ;;  %5437 = vst [vmem:[#allocation51_spill] sm:$0xff] %v4523_v50 }
 0x1ae   : > { %1065 = vmatprep.subr.bf16.mxu1 %v4437_v49 }
 0x1b1   : > { %1066 = vmatpush1.bf16.msra.mxu1 %v4441_v51 }
 0x1b2   : > { %1067 = vmatprep.subr.bf16.mxu1 %v4444_v52 }
 0x1b5   : > { %1068 = vmatpush1.bf16.msra.mxu1 %v4447_v53 }
 0x1b6   : > { %1069 = vmatprep.subr.bf16.mxu1 %v4450_v54 }
 0x1b9   : > { %1070 = vmatpush1.bf16.msra.mxu1 %v4453_v55 }
 0x1ba   : > { %1071 = vmatprep.subr.bf16.mxu1 %v4456_v56 }
 0x1bd   : > { %1072 = vmatpush1.bf16.msra.mxu1 %v4459_v57 }
 0x1be   : > { %1073 = vmatprep.subr.bf16.mxu1 %v4462_v58 }
 0x1c1   : > { %1074 = vmatpush1.bf16.msra.mxu1 %v4465_v59 }
 0x1c2   : > { %1075 = vmatprep.subr.bf16.mxu1 %v4468_v60 }
 0x1c5   : > { %1076 = vmatpush2.bf16.msra.mxu1 %v4471_v61 }
 0x1c6   : > { %1077 = vmatprep.subr.bf16.mxu1 %v4474_v62 }
 0x1c9   : > { %1078 = vmatpush2.bf16.msra.mxu1 %v4477_v63  ;;  %v5444_v63 = vmov 0.0  }
 0x1ca   : > { %1079 = vmatprep.subr.bf16.mxu1 %v4480_v0  ;;  %v4540_v0 = vld [vmem:[#allocation10 + $0x240] ss:$20 sps:$4 sm:$0xff]  }
 0x1cd   : > { %1080 = vmatpush2.bf16.msra.mxu1 %v4483_v4  ;;  %v4538_v4 = vld [vmem:[#allocation10 + $0x128] ss:$20 sps:$4 sm:$0xff]  }
 0x1ce   : > { %1081 = vmatprep.subr.bf16.mxu1 %v4486_v5 }
 0x1d1   : > { %1082 = vmatpush2.bf16.msra.mxu1 %v4489_v6 }
 0x1d2   : > { %1083 = vmatprep.subr.bf16.mxu1 %v4492_v7 }
 0x1d5   : > { %1084 = vmatpush2.bf16.msra.mxu1 %v4495_v8 }
 0x1d6   : > { %1085 = vmatprep.subr.bf16.mxu1 %v4499_v9  ;;  %v4530_v9 = vld [vmem:[#allocation10 + $0x148] ss:$20 sps:$4 sm:$0xff]  }
 0x1d7   : > { %5440 = vst [vmem:[#allocation54_spill] sm:$0xff] %v4530_v9 }
 0x1d9   : > { %1086 = vmatpush2.bf16.msra.mxu1 %v4501_v10  ;;  %v4527_v10 = vld [vmem:[#allocation10 + $0x14c] ss:$20 sps:$4 sm:$0xff]  }
 0x1da   : > { %1087 = vmatprep.subr.bf16.mxu1 %v4511_v13  ;;  %5439 = vst [vmem:[#allocation53_spill] sm:$0xff] %v4527_v10  ;;  %1132 = vmatprep.subr.bf16.mxu0 %v4527_v10  ;;  %v4535_v13 = vld [vmem:[#allocation10 + $0x268] ss:$20 sps:$4 sm:$0xff]  }
 0x1db   : > { %1133 = vmatpush2.bf16.msra.mxu0 %v4530_v9  ;;  %5441 = vst [vmem:[#allocation55_spill] sm:$0xff] %v4535_v13 }
 0x1dd   : > { %1088 = vmatpush2.bf16.msra.mxu1 %v4513_v41 }
 0x1de   : > { %1089 = vmatprep.subr.bf16.mxu1 %v4523_v50 }
 0x1e1   : > { %1090 = vmatpush2.bf16.msra.mxu1 %v4525_v1  ;;  %v4543_v1 = vld [vmem:[#allocation10 + $0x100] ss:$20 sps:$4 sm:$0xff]  }
 0x1e2   : > { %3241 = vmatprep.subr.bf16.mxu1 %v4535_v13  ;;  %5442 = vst [vmem:[#allocation56_spill] sm:$0xff] %v4543_v1  ;;  %v4546_v13 = vld [vmem:[#allocation10 + $0x218] ss:$20 sps:$4 sm:$0xff]  }
 0x1e3   : > { %5443 = vst [vmem:[#allocation57_spill] sm:$0xff] %v4546_v13 }
 0x264   : > { %v3333_v41 = vpop.f32.mrf.mxu1 }
 0x266   : > { %v522_v8 = vpop.f32.mrf.mxu1 }
 0x267   : > { %v545_v50 = vpack.c.bf16 %v3333_v41, %v522_v8  ;;  %v4556_v8 = vld [vmem:[#allocation10 + $0xb0] ss:$20 sps:$4 sm:$0xff]   ;;  %v4562_v41 = vld [vmem:[#allocation10 + $0x88] ss:$20 sps:$4 sm:$0xff]  }
 0x268   : > { %5447 = vst [vmem:[#allocation60_spill] sm:$0xff] %v4556_v8 }
 0x26c   : > { %v3336_v7 = vpop.f32.mrf.mxu1 }
 0x26e   : > { %v534_v6 = vpop.f32.mrf.mxu1 }
 0x26f   : > { %v546_v5 = vpack.c.bf16 %v3336_v7, %v534_v6  ;;  %v4550_v6 = vld [vmem:[#allocation10 + $0xd8] ss:$20 sps:$4 sm:$0xff]   ;;  %v4553_v7 = vld [vmem:[#allocation10 + $0x1f0] ss:$20 sps:$4 sm:$0xff]  }
 0x270   : > { %5445 = vst [vmem:[#allocation58_spill] sm:$0xff] %v4550_v6  ;;  %5446 = vst [vmem:[#allocation59_spill] sm:$0xff] %v4553_v7 }
 0x271   : > { %1091 = vmatprep.mubr.bf16.mxu1 %v546_v5  ;;  %1134 = vmatprep.mubr.bf16.mxu0 %v546_v5 }
 0x272   : > { %1092 = vmatmul.mubr.bf16.vlgmr.msra.gmra.mxu1 %v545_v50  ;;  %1135 = vmatmul.mubr.bf16.vlgmr.msra.gmra.mxu0 %v545_v50 }
 0x273   : > { %3242 = vmatpush3.bf16.msra.mxu1 %v4538_v4  ;;  %1177 = vmatprep.mubr.bf16.mxu1 %v546_v5  ;;  %v4559_v5 = vld [vmem:[#allocation10 + $0x1c8] ss:$20 sps:$4 sm:$0xff]  }
 0x274   : > { %3243 = vmatprep.subr.bf16.mxu1 %v4540_v0  ;;  %1357 = vmatprep.mubr.f32.mxu0 %v5444_v63  ;;  %5448 = vst [vmem:[#allocation61_spill] sm:$0xff] %v4559_v5 }
 0x277   : > { %3244 = vmatpush3.bf16.msra.mxu1 %v4543_v1  ;;  %v4565_v1 = vld [vmem:[#allocation10 + $0x1a0] ss:$20 sps:$4 sm:$0xff]  }
 0x278   : > { %3245 = vmatprep.subr.bf16.mxu1 %v4546_v13  ;;  %v4568_v13 = vld [vmem:[#allocation10 + $0x60] ss:$20 sps:$4 sm:$0xff]  }
 0x27b   : > { %3246 = vmatpush3.bf16.msra.mxu1 %v4550_v6  ;;  %v4571_v6 = vld [vmem:[#allocation10 + $0x178] ss:$20 sps:$4 sm:$0xff]  }
 0x27c   : > { %3247 = vmatprep.subr.bf16.mxu1 %v4553_v7  ;;  %v4574_v7 = vld [vmem:[#allocation10 + $0x38] ss:$20 sps:$4 sm:$0xff]  }
 0x27f   : > { %3248 = vmatpush3.bf16.msra.mxu1 %v4556_v8  ;;  %v4577_v8 = vld [vmem:[#allocation10 + $0x150] ss:$20 sps:$4 sm:$0xff]  }
 0x280   : > { %3249 = vmatprep.subr.bf16.mxu1 %v4559_v5  ;;  %v4580_v5 = vld [vmem:[#allocation10 + $0x10] ss:$20 sps:$4 sm:$0xff]  }
 0x283   : > { %3250 = vmatpush3.bf16.msra.mxu1 %v4562_v41 }
 0x284   : > { %3251 = vmatprep.subr.bf16.mxu1 %v4565_v1 }
 0x287   : > { %3252 = vmatpush3.bf16.msra.mxu1 %v4568_v13 }
 0x288   : > { %3253 = vmatprep.subr.bf16.mxu1 %v4571_v6 }
 0x28b   : > { %3254 = vmatpush3.bf16.msra.mxu1 %v4574_v7 }
 0x28c   : > { %3255 = vmatprep.subr.bf16.mxu1 %v4577_v8 }
 0x28f   : > { %3256 = vmatpush3.bf16.msra.mxu1 %v4580_v5 }
 0x290   : > { %1600 = vmatprep.subr.bf16.mxu1 %v4341_v15 }
 0x292   : > { %1178 = vmatmul.mubr.bf16.vlgmr.msra.gmra.mxu1 %v545_v50  ;;  %v3153_v50 = vld [vmem:[%s4306_s14 + $0x1] ss:$0 sm:$0xff] }
 0x293   : > { %1601 = vmatpush1.bf16.msra.mxu1 %v4343_v16  ;;  %vm1406_vm5 = vcmp.eq.s32.totalorder %v4319_v2, %v3153_v50  ;;  %vm1407_vm6 = vcmp.eq.s32.totalorder %v4323_v3, %v3153_v50 }
 0x294   : > { %1602 = vmatprep.subr.bf16.mxu1 %v4347_v17 }
 0x297   : > { %1603 = vmatpush1.bf16.msra.mxu1 %v4350_v18 }
 0x298   : > { %1604 = vmatprep.subr.bf16.mxu1 %v4353_v19 }
 0x29b   : > { %1605 = vmatpush1.bf16.msra.mxu1 %v4356_v20 }
 0x29c   : > { %1606 = vmatprep.subr.bf16.mxu1 %v4359_v21 }
 0x29f   : > { %1607 = vmatpush1.bf16.msra.mxu1 %v4362_v22 }
 0x2a0   : > { %1608 = vmatprep.subr.bf16.mxu1 %v4365_v23 }
 0x2a3   : > { %1609 = vmatpush1.bf16.msra.mxu1 %v4368_v24 }
 0x2a4   : > { %1610 = vmatprep.subr.bf16.mxu1 %v4371_v25 }
 0x2a7   : > { %1611 = vmatpush1.bf16.msra.mxu1 %v4374_v26 }
 0x2a8   : > { %1612 = vmatprep.subr.bf16.mxu1 %v4377_v27 }
 0x2ab   : > { %1613 = vmatpush1.bf16.msra.mxu1 %v4380_v28 }
 0x2ac   : > { %1614 = vmatprep.subr.bf16.mxu1 %v4383_v29 }
 0x2af   : > { %1615 = vmatpush1.bf16.msra.mxu1 %v4386_v30 }
 0x2b0   : > { %1616 = vmatprep.subr.bf16.mxu1 %v4389_v31 }
 0x2b3   : > { %1617 = vmatpush2.bf16.msra.mxu1 %v4392_v32 }
 0x2b4   : > { %1618 = vmatprep.subr.bf16.mxu1 %v4395_v33  ;;  %v4655_v33 = vld [vmem:[%s4308_s8 + $0x20] sm:$0xff] }
 0x2b5   : > { %5453 = vst [vmem:[#allocation66_spill] sm:$0xff] %v4655_v33 }
 0x2b7   : > { %1619 = vmatpush2.bf16.msra.mxu1 %v4398_v34  ;;  %v4652_v34 = vld [vmem:[%s4308_s8 + $0x38] sm:$0xff] }
 0x2b8   : > { %1620 = vmatprep.subr.bf16.mxu1 %v4401_v35  ;;  %5452 = vst [vmem:[#allocation65_spill] sm:$0xff] %v4652_v34 }
 0x2bb   : > { %1621 = vmatpush2.bf16.msra.mxu1 %v4404_v36 }
 0x2bc   : > { %1622 = vmatprep.subr.bf16.mxu1 %v4407_v37  ;;  %v4648_v37 = vld [vmem:[%s4308_s8] sm:$0xff] }
 0x2bd   : > { %5451 = vst [vmem:[#allocation64_spill] sm:$0xff] %v4648_v37 }
 0x2bf   : > { %1623 = vmatpush2.bf16.msra.mxu1 %v4410_v38  ;;  %v3154_v38 = vsel %vm1406_vm5, 1.0, %v5444_v63 }
 0x2c0   : > { %1624 = vmatprep.subr.bf16.mxu1 %v4413_v39  ;;  %1414 = vrot.lane.b32.xlu0 %v3154_v38, %s4007_s29  ;;  %v4645_v39 = vld [vmem:[%s4308_s8 + $0x18] sm:$0xff] }
 0x2c1   : > { %5450 = vst [vmem:[#allocation63_spill] sm:$0xff] %v4645_v39 }
 0x2c3   : > { %1625 = vmatpush2.bf16.msra.mxu1 %v4416_v40 }
 0x2c4   : > { %1626 = vmatprep.subr.bf16.mxu1 %v4503_v11  ;;  %v3155_v11 = vsel %vm1407_vm6, 1.0, %v5444_v63 }
 0x2c5   : > { %1416 = vrot.lane.b32.xlu1 %v3155_v11, %s4007_s29 }
 0x2c7   : > { %1627 = vmatpush2.bf16.msra.mxu1 %v4506_v12 }
 0x2c8   : > { %1628 = vmatprep.subr.bf16.mxu1 %v4515_v44  ;;  %v378_v44 = vld [vmem:[%s4292_s0] sm:$0x1] }
 0x2c9   : > { %vm1274_vm7 = vcmp.gt.s32.totalorder %v378_v44, 0 }
 0x2cb   : > { %1629 = vmatpush2.bf16.msra.mxu1 %v4517_v47  ;;  %v4625_v47 = vsub.s32 0, %v4319_v2 }
 0x2cc   : > { %1630 = vmatprep.subr.bf16.mxu1 %v4527_v10  ;;  %v5325_v10 = vmov 0  }
 0x2cd   : > { %5449 = vst [vmem:[#allocation62_spill] sm:$0xff] %v4625_v47  ;;  %v1271_v12 = vrot.slane %v378_v44, %v4625_v47 }
 0x2cf   : > { %1631 = vmatpush2.bf16.msra.mxu1 %v4530_v9  ;;  %v1275_v9 = vsel %vm1274_vm7, 1, %v5325_v10  ;;  %vm1272_vm8 = vcmp.eq.s32.totalorder %v4319_v2, %v1271_v12  ;;  %vm1273_vm11 = vcmp.eq.s32.totalorder %v4323_v3, %v1271_v12 }
 0x2d0   : > { %v1279_v40 = vrot.slane %v1275_v9, %v4625_v47 }
 0x2d2   : > { %vm1280_vm9 = vcmp.eq.s32.totalorder %v1279_v40, 1 }
 0x2d3   : > { %vm1281_vm10 = vmand %vm1272_vm8, %vm1280_vm9 }
 0x2d4   : > { %vm1282_vm12 = vmand %vm1273_vm11, %vm1280_vm9  ;;  %v4638_v44 = vsel %vm1281_vm10, 1.0, %v5444_v63 }
 0x2d5   : > { %v4633_v38 = vsel %vm1282_vm12, 1.0, %v5444_v63  ;;  %v1370_v40 = vsel %vm409_vm3, %v4638_v44, 0.0 }
 0x2d6   : > { %v1373_v11 = vsel %vm409_vm3, %v4633_v38, 0.0 }
 0x2df   : > { %1374 = vadd.xlane.f32.xlu0 %v1373_v11 }
 0x2e3   : > { %1371 = vadd.xlane.f32.xlu0 %v1370_v40 }
 0x332   : > { %v1136_v9 = vpop.f32.mrf.mxu0  ;;  %v1093_v12 = vpop.f32.mrf.mxu1 }
 0x333   : > { %v1194_v40 = vadd.f32 %v4648_v37, %v1093_v12 }
 0x334   : > { %v1138_v50 = vpop.f32.mrf.mxu0  ;;  %v1095_v47 = vpop.f32.mrf.mxu1 }
 0x335   : > { %v1226_v36 = vadd.f32 %v4645_v39, %v1138_v50  ;;  %v3135_v29 = vmul.f32 -1.442695, %v1194_v40  ;;  %v3150_v40 = vld [vmem:[%s4299_s16 + $0x1] ss:$0 sm:$0xff] }
 0x336   : > { %v4642_v10 = vpop.f32.mrf.mxu0  ;;  %v1097_v11 = vpop.f32.mrf.mxu1  ;;  %vm1396_vm13 = vcmp.eq.s32.totalorder %v4319_v2, %v3150_v40  ;;  %vm1397_vm14 = vcmp.eq.s32.totalorder %v4323_v3, %v3150_v40 }
 0x337   : > { %v3139_v31 = vmul.f32 -1.442695, %v1226_v36  ;;  %v1195_v30 = vadd.f32 %v4655_v33, %v1097_v11 }
 0x338   : > { %v1142_v35 = vpop.f32.mrf.mxu0  ;;  %v1099_v28 = vpop.f32.mrf.mxu1 }
 0x339   : > { %v1227_v32 = vadd.f32 %v4652_v34, %v1142_v35  ;;  %3531 = vpow2.f32 %v3139_v31  ;;  %v3136_v50 = vmul.f32 -1.442695, %v1195_v30  ;;  %v4664_v31 = vld [vmem:[%s4308_s8 + $0x28] sm:$0xff] }
 0x33a   : > { %3533 = vpow2.f32 %v3135_v29  ;;  %5454 = vst [vmem:[#allocation67_spill] sm:$0xff] %v4664_v31  ;;  %v4668_v29 = vld [vmem:[%s4308_s8 + $0x10] sm:$0xff] }
 0x33b   : > { %v3140_v27 = vmul.f32 -1.442695, %v1227_v32  ;;  %5455 = vst [vmem:[#allocation68_spill] sm:$0xff] %v4668_v29 }
 0x33d   : > { %3535 = vpow2.f32 %v3140_v27 }
 0x33e   : > { %3537 = vpow2.f32 %v3136_v50 }
 0x352   : > { %v3257_v26 = vpop.f32.mrf.mxu1 }
 0x354   : > { %v3258_v25 = vpop.f32.mrf.mxu1 }
 0x355   : > { %v3259_v24 = vadd.f32 %v3258_v25, %v3257_v26  ;;  %v3532_v25 = vpop.eup %3531  ;;  %v1209_v26 = vadd.f32 %v4664_v31, %v1099_v28 }
 0x356   : > { %v3260_v12 = vpop.f32.mrf.mxu1  ;;  %v3534_v27 = vpop.eup %3533 }
 0x357   : > { %v1240_v35 = vadd.f32 %v3259_v24, %v4645_v39  ;;  %v3151_v24 = vsel %vm1396_vm13, 1.0, %v5444_v63  ;;  %v3536_v50 = vpop.eup %3535  ;;  %v3138_v33 = vmul.f32 -1.442695, %v1209_v26  ;;  %v1202_v31 = vadd.f32 1.0, %v3534_v27 }
 0x358   : > { %v3261_v36 = vpop.f32.mrf.mxu1  ;;  %v1235_v40 = vadd.f32 1.0, %v3536_v50 }
 0x359   : > { %v3141_v37 = vmul.f32 -1.442695, %v1240_v35  ;;  %v3262_v11 = vadd.f32 %v3261_v36, %v3260_v12  ;;  %v1234_v12 = vadd.f32 1.0, %v3532_v25  ;;  %v1415_v35 = vpop.permute.xlu0 %1414  ;;  %v3152_v36 = vsel %vm1397_vm14, 1.0, %v5444_v63 }
 0x35a   : > { %v1420_v28 = vsel %vm409_vm3, %v3151_v24, %v1415_v35 }
 0x35b   : > { %3539 = vpow2.f32 %v3141_v37  ;;  %v1241_v32 = vadd.f32 %v3262_v11, %v4652_v34  ;;  %v1222_v37 = vadd.f32 %v4668_v29, %v1136_v9  ;;  %v3538_v11 = vpop.eup %3537  ;;  %1422 = vxpose.xlu1.b32.start [1/2] (short) (narrow) %v1420_v28, 32  ;;  %v4682_v29 = vld [vmem:[%s4308_s8 + $0x30] sm:$0xff] }
 0x35c   : > { %v1203_v25 = vadd.f32 1.0, %v3538_v11  ;;  %5457 = vst [vmem:[#allocation70_spill] sm:$0xff] %v4682_v29  ;;  %v1223_v26 = vadd.f32 %v4682_v29, %v4642_v10 }
 0x35d   : > { %v3142_v30 = vmul.f32 -1.442695, %v1241_v32  ;;  %v4676_v32 = vld [vmem:[%s4308_s8 + $0x8] sm:$0xff] }
 0x35e   : > { %5456 = vst [vmem:[#allocation69_spill] sm:$0xff] %v4676_v32  ;;  %v1208_v9 = vadd.f32 %v4676_v32, %v1095_v47 }
 0x35f   : > { %3541 = vpow2.f32 %v3142_v30  ;;  %v1417_v30 = vpop.permute.xlu1 %1416 }
 0x360   : > { %3543 = vtanh.f32 %v1222_v37  ;;  %v1421_v34 = vsel %vm409_vm3, %v3152_v36, %v1417_v30  ;;  %v3137_v27 = vmul.f32 -1.442695, %v1208_v9 }
 0x361   : > { %3545 = vrcp.f32 %v1234_v12  ;;  %1423 = vxpose.xlu1.b32.end [2/2] (short) (narrow) %v1421_v34, 32 }
 0x362   : > { %3547 = vpow2.f32 %v3138_v33 }
 0x363   : > { %3549 = vrcp.f32 %v1202_v31 }
 0x364   : > { %3551 = vrcp.f32 %v1235_v40 }
 0x365   : > { %3553 = vrcp.f32 %v1203_v25 }
 0x368   : > { %v3540_v39 = vpop.eup %3539 }
 0x369   : > { %v1248_v24 = vadd.f32 1.0, %v3540_v39 }
 0x36b   : > { %3555 = vrcp.f32 %v1248_v24 }
 0x36c   : > { %v3542_v37 = vpop.eup %3541  ;;  %3557 = vtanh.f32 %v1223_v26 }
 0x36d   : > { %v1249_v50 = vadd.f32 1.0, %v3542_v37  ;;  %3559 = vpow2.f32 %v3137_v27  ;;  %v3544_v47 = vpop.eup %3543 }
 0x36e   : > { %v3546_v12 = vpop.eup %3545 }
 0x36f   : > { %3561 = vrcp.f32 %v1249_v50  ;;  %v3548_v35 = vpop.eup %3547  ;;  %v1256_v31 = vmul.f32 0.0, %v3546_v12 }
 0x370   : > { %v3550_v33 = vpop.eup %3549  ;;  %v1217_v25 = vadd.f32 1.0, %v3548_v35 }
 0x371   : > { %v3552_v36 = vpop.eup %3551  ;;  %v1254_v28 = vmul.f32 %v3550_v33, %v3544_v47 }
 0x372   : > { %v3554_v34 = vpop.eup %3553  ;;  %v1257_v10 = vmul.f32 0.0, %v3552_v36  ;;  %3563 = vrcp.f32 %v1217_v25 }
 0x373   : > { %v1258_v40 = vadd.f32 %v1256_v31, %v1254_v28 }
 0x378   : > { %v3556_v11 = vpop.eup %3555 }
 0x379   : > { %v1260_v30 = vmul.f32 0.0, %v3556_v11  ;;  %v3558_v39 = vpop.eup %3557 }
 0x37a   : > { %v3560_v9 = vpop.eup %3559  ;;  %v1255_v24 = vmul.f32 %v3558_v39, %v3554_v34 }
 0x37b   : > { %v1262_v37 = vadd.f32 %v1260_v30, %v1258_v40  ;;  %v1216_v29 = vadd.f32 1.0, %v3560_v9 }
 0x37c   : > { %v3562_v26 = vpop.eup %3561  ;;  %v1259_v27 = vadd.f32 %v1257_v10, %v1255_v24 }
 0x37d   : > { %v1261_v50 = vmul.f32 0.0, %v3562_v26  ;;  %3565 = vtanh.f32 %v1262_v37 }
 0x37f   : > { %v1263_v32 = vadd.f32 %v1261_v50, %v1259_v27  ;;  %v3564_v12 = vpop.eup %3563  ;;  %v5472_v50 = vld [vmem:[#allocation56_spill] sm:$0xff] }
 0x381   : > { %3567 = vtanh.f32 %v1263_v32  ;;  %1321 = vmatprep.subr.mxu0 %v1263_v32 }
 0x382   : > { %3569 = vrcp.f32 %v1216_v29  ;;  %v4692_v29 = vpop.xlane.xlu0 %1374 }
 0x383   : > { %vm1377_vm0 = vcmp.gt.f32.partialorder %v4692_v29, 0.0  ;;  %v4875_v29 = vld [vmem:[#allocation10 + $0x11c] ss:$20 sps:$4 sm:$0xff]  }
 0x386   : > { %v1372_v32 = vpop.xlane.xlu0 %1371 }
 0x387   : > { %vm1376_vm15 = vcmp.gt.f32.partialorder %v1372_v32, 0.0  ;;  %v5497_v32 = vld [vmem:[#allocation49_spill] sm:$0xff] }
 0x38a   : > { %v3566_v47 = vpop.eup %3565 }
 0x38e   : > { %v3568_v33 = vpop.eup %3567 }
 0x38f   : > { %v1267_v36 = vmul.f32 %v3568_v33, %v3564_v12  ;;  %v3570_v11 = vpop.eup %3569  ;;  %v5473_v12 = vld [vmem:[#allocation57_spill] sm:$0xff]  ;;  %v5475_v33 = vld [vmem:[#allocation59_spill] sm:$0xff] }
 0x390   : > { %v1266_v31 = vmul.f32 %v3570_v11, %v3566_v47  ;;  %v5474_v47 = vld [vmem:[#allocation58_spill] sm:$0xff]  ;;  %v5477_v11 = vld [vmem:[#allocation61_spill] sm:$0xff] }
 0x391   : > { %1322 = vmatpush1.msra.mxu0 %v1267_v36  ;;  %v5476_v36 = vld [vmem:[#allocation60_spill] sm:$0xff] }
 0x392   : > { %1323 = vmatprep.subr.mxu0 %v1262_v37 }
 0x393   : > { %1324 = vmatpush1.msra.mxu0 %v1266_v31  ;;  %v5496_v31 = vld [vmem:[#allocation46_spill] sm:$0xff] }
 0x394   : > { %3145 = vmatmul.mubr.msk.f32.vlgmr.msra.gmra.mxu0 %vm409_vm3, %v4638_v44 }
 0x395   : > { %1363 = vmatprep.mubr.f32.mxu0 %v5444_v63 }
 0x398   : > { %3146 = vmatmul.mubr.msk.f32.gmra.mxu0 %vm409_vm3, %v4633_v38 }
 0x399   : > { %1530 = vmatprep.mubr.f32.mxu0 %v5444_v63 }
 0x3d9   : > { %v1438_v10 = vpop.trf.xlu1 }
 0x3dd   : > { %v1439_v40 = vpop.trf.xlu1 }
 0x3e1   : > { %v1440_v9 = vpop.trf.xlu1 }
 0x3e5   : > { %v1441_v25 = vpop.trf.xlu1 }
 0x454   : > { %v1359_v35 = vpop.f32.mrf.mxu0 }
 0x455   : > { %v4694_v34 = vsel %vm1376_vm15, %v1359_v35, 0.0 }
 0x456   : > { %v1361_v28 = vpop.f32.mrf.mxu0 }
 0x457   : > { %v4697_v30 = vsel %vm1376_vm15, %v1361_v28, 0.0 }
 0x458   : > { %v1365_v44 = vpop.f32.mrf.mxu0 }
 0x459   : > { %v4701_v39 = vsel %vm1377_vm0, %v1365_v44, 0.0 }
 0x45a   : > { %v4703_v38 = vpop.f32.mrf.mxu0 }
 0x45b   : > { %3156 = vmatprep.subr.msk.mxu0 %vm1377_vm0, %v4703_v38 }
 0x45c   : > { %3157 = vmatpush1.msk.msra.mxu0 %vm1377_vm0, %v1365_v44  ;;  %v3182_v44 = vld [vmem:[%s4306_s14 + $0x2] ss:$0 sm:$0xff] }
 0x45d   : > { %3158 = vmatprep.subr.msk.mxu0 %vm1376_vm15, %v1361_v28  ;;  %v5499_v28 = vld [vmem:[#allocation53_spill] sm:$0xff]  ;;  %vm1896_vm1 = vcmp.eq.s32.totalorder %v4319_v2, %v3182_v44  ;;  %vm1897_vm2 = vcmp.eq.s32.totalorder %v4323_v3, %v3182_v44 }
 0x45e   : > { %3159 = vmatpush1.msk.msra.mxu0 %vm1376_vm15, %v1359_v35  ;;  %v5498_v35 = vld [vmem:[#allocation50_spill] sm:$0xff] }
 0x45f   : > { %3160 = vmatmul.mubr.msk.f32.vlgmr.msra.gmra.mxu0 %vm409_vm3, %v1438_v10  ;;  %1557 = vmatprep.subr.bf16.mxu0 %v4339_v14  ;;  %v5458_v14 = vld [vmem:[#allocation36_spill] sm:$0xff]  ;;  %v5500_v10 = vld [vmem:[#allocation54_spill] sm:$0xff] }
 0x460   : > { %1536 = vmatprep.mubr.f32.mxu0 %v5444_v63  ;;  %1558 = vmatpush1.bf16.msra.mxu0 %v4421_v42  ;;  %v5459_v42 = vld [vmem:[#allocation37_spill] sm:$0xff] }
 0x461   : > { %1559 = vmatprep.subr.bf16.mxu0 %v4423_v43  ;;  %v5460_v43 = vld [vmem:[#allocation38_spill] sm:$0xff] }
 0x463   : > { %3161 = vmatmul.mubr.msk.f32.gmra.mxu0 %vm409_vm3, %v1439_v40  ;;  %v3183_v40 = vsel %vm1896_vm1, 1.0, %v5444_v63 }
 0x464   : > { %1542 = vmatprep.mubr.f32.mxu0 %v5444_v63  ;;  %1560 = vmatpush1.bf16.msra.mxu0 %v4427_v45  ;;  %v5461_v45 = vld [vmem:[#allocation39_spill] sm:$0xff] }
 0x465   : > { %1561 = vmatprep.subr.bf16.mxu0 %v4430_v46  ;;  %v5462_v46 = vld [vmem:[#allocation40_spill] sm:$0xff]  ;;  %1904 = vrot.lane.b32.xlu0 %v3183_v40, %s4007_s29 }
 0x467   : > { %3162 = vmatmul.mubr.msk.f32.gmra.mxu0 %vm409_vm3, %v1440_v9  ;;  %v3184_v9 = vsel %vm1897_vm2, 1.0, %v5444_v63 }
 0x468   : > { %1548 = vmatprep.mubr.f32.mxu0 %v5444_v63  ;;  %1562 = vmatpush1.bf16.msra.mxu0 %v4434_v48  ;;  %v5463_v48 = vld [vmem:[#allocation41_spill] sm:$0xff] }
 0x469   : > { %1563 = vmatprep.subr.bf16.mxu0 %v4437_v49  ;;  %v5464_v49 = vld [vmem:[#allocation42_spill] sm:$0xff]  ;;  %1906 = vrot.lane.b32.xlu0 %v3184_v9, %s4007_s29 }
 0x46b   : > { %3163 = vmatmul.mubr.msk.f32.gmra.mxu0 %vm409_vm3, %v1441_v25  ;;  %v3147_v25 = vld [vmem:[%s4292_s0 + $0x1] sm:$0x1] }
 0x46c   : > { %1564 = vmatpush1.bf16.msra.mxu0 %v4441_v51  ;;  %v5465_v51 = vld [vmem:[#allocation43_spill] sm:$0xff]  ;;  %vm1764_vm4 = vcmp.gt.s32.totalorder %v3147_v25, 0 }
 0x46d   : > { %1565 = vmatprep.subr.bf16.mxu0 %v4444_v52  ;;  %v5466_v52 = vld [vmem:[#allocation44_spill] sm:$0xff] }
 0x470   : > { %1566 = vmatpush1.bf16.msra.mxu0 %v4447_v53  ;;  %v5467_v53 = vld [vmem:[#allocation47_spill] sm:$0xff] }
 0x471   : > { %1567 = vmatprep.subr.bf16.mxu0 %v4450_v54  ;;  %v5468_v54 = vld [vmem:[#allocation48_spill] sm:$0xff] }
 0x474   : > { %1568 = vmatpush1.bf16.msra.mxu0 %v4453_v55  ;;  %v5469_v55 = vld [vmem:[#allocation51_spill] sm:$0xff] }
 0x475   : > { %1569 = vmatprep.subr.bf16.mxu0 %v4456_v56  ;;  %v5470_v56 = vld [vmem:[#allocation52_spill] sm:$0xff] }
 0x478   : > { %1570 = vmatpush1.bf16.msra.mxu0 %v4459_v57  ;;  %v5471_v57 = vld [vmem:[#allocation55_spill] sm:$0xff] }
 0x479   : > { %1571 = vmatprep.subr.bf16.mxu0 %v4462_v58 }
 0x47c   : > { %1572 = vmatpush1.bf16.msra.mxu0 %v4465_v59 }
 0x47d   : > { %1573 = vmatprep.subr.bf16.mxu0 %v4468_v60 }
 0x480   : > { %1574 = vmatpush2.bf16.msra.mxu0 %v4471_v61 }
 0x481   : > { %1575 = vmatprep.subr.bf16.mxu0 %v4474_v62 }
 0x484   : > { %1576 = vmatpush2.bf16.msra.mxu0 %v5458_v14  ;;  %v5501_v14 = vmov 0  }
 0x485   : > { %1577 = vmatprep.subr.bf16.mxu0 %v5459_v42  ;;  %v1765_v42 = vsel %vm1764_vm4, 1, %v5501_v14 }
 0x488   : > { %1578 = vmatpush2.bf16.msra.mxu0 %v5460_v43  ;;  %v5502_v43 = vld [vmem:[#allocation62_spill] sm:$0xff] }
 0x489   : > { %1579 = vmatprep.subr.bf16.mxu0 %v5461_v45  ;;  %v1761_v45 = vrot.slane %v3147_v25, %v5502_v43 }
 0x48b   : > { %vm1762_vm5 = vcmp.eq.s32.totalorder %v4319_v2, %v1761_v45  ;;  %vm1763_vm8 = vcmp.eq.s32.totalorder %v4323_v3, %v1761_v45 }
 0x48c   : > { %1580 = vmatpush2.bf16.msra.mxu0 %v5462_v46  ;;  %v1769_v46 = vrot.slane %v1765_v42, %v5502_v43 }
 0x48d   : > { %1581 = vmatprep.subr.bf16.mxu0 %v5463_v48 }
 0x48e   : > { %vm1770_vm6 = vcmp.eq.s32.totalorder %v1769_v46, 1 }
 0x48f   : > { %vm1771_vm7 = vmand %vm1762_vm5, %vm1770_vm6 }
 0x490   : > { %1582 = vmatpush2.bf16.msra.mxu0 %v5464_v49  ;;  %vm1772_vm9 = vmand %vm1763_vm8, %vm1770_vm6  ;;  %v4818_v48 = vsel %vm1771_vm7, 1.0, %v5444_v63 }
 0x491   : > { %1583 = vmatprep.subr.bf16.mxu0 %v5465_v51  ;;  %v4821_v49 = vsel %vm1772_vm9, 1.0, %v5444_v63 }
 0x492   : > { %v1863_v51 = vsel %vm409_vm3, %v4821_v49, 0.0 }
 0x493   : > { %1864 = vadd.xlane.f32.xlu0 %v1863_v51 }
 0x494   : > { %1584 = vmatpush2.bf16.msra.mxu0 %v5466_v52  ;;  %v1860_v52 = vsel %vm409_vm3, %v4818_v48, 0.0 }
 0x495   : > { %1585 = vmatprep.subr.bf16.mxu0 %v5467_v53  ;;  %1861 = vadd.xlane.f32.xlu1 %v1860_v52  ;;  %v5509_v52 = vld [vmem:[#allocation69_spill] sm:$0xff] }
 0x498   : > { %1586 = vmatpush2.bf16.msra.mxu0 %v5468_v54 }
 0x499   : > { %1587 = vmatprep.subr.bf16.mxu0 %v5469_v55 }
 0x49c   : > { %1588 = vmatpush2.bf16.msra.mxu0 %v5470_v56 }
 0x49d   : > { %3263 = vmatprep.subr.bf16.mxu0 %v5471_v57 }
 0x4d7   : > { %v1905_v25 = vpop.permute.xlu0 %1904 }
 0x51f   : > { %v1532_v58 = vpop.f32.mrf.mxu0 }
 0x521   : > { %v4750_v59 = vpop.f32.mrf.mxu0 }
 0x523   : > { %v1538_v60 = vpop.f32.mrf.mxu0 }
 0x524   : > { %v1555_v27 = vpack.c.bf16 %v1538_v60, %v1532_v58  ;;  %v5503_v60 = vld [vmem:[#allocation63_spill] sm:$0xff] }
 0x525   : > { %v4752_v61 = vpop.f32.mrf.mxu0 }
 0x527   : > { %v1544_v62 = vpop.f32.mrf.mxu0 }
 0x529   : > { %v4754_v24 = vpop.f32.mrf.mxu0 }
 0x52b   : > { %v1550_v26 = vpop.f32.mrf.mxu0 }
 0x52c   : > { %v1556_v37 = vpack.c.bf16 %v1550_v26, %v1544_v62 }
 0x52d   : > { %v4827_v54 = vpop.f32.mrf.mxu0 }
 0x52e   : > { %1589 = vmatprep.mubr.bf16.mxu0 %v1556_v37  ;;  %1632 = vmatprep.mubr.bf16.mxu1 %v1556_v37 }
 0x52f   : > { %1590 = vmatmul.mubr.bf16.vlgmr.msra.gmra.mxu0 %v1555_v27  ;;  %1633 = vmatmul.mubr.bf16.vlgmr.msra.gmra.mxu1 %v1555_v27 }
 0x530   : > { %3264 = vmatpush3.bf16.msra.mxu0 %v4538_v4  ;;  %1675 = vmatprep.mubr.bf16.mxu0 %v1556_v37  ;;  %v5489_v4 = vld [vmem:[#allocation30_spill] sm:$0xff] }
 0x531   : > { %3265 = vmatprep.subr.bf16.mxu0 %v4540_v0  ;;  %1847 = vmatprep.mubr.f32.mxu1 %v5444_v63  ;;  %v5480_v0 = vld [vmem:[#allocation21_spill] sm:$0xff] }
 0x534   : > { %3266 = vmatpush3.bf16.msra.mxu0 %v5472_v50 }
 0x535   : > { %3267 = vmatprep.subr.bf16.mxu0 %v5473_v12  ;;  %v5505_v12 = vld [vmem:[#allocation65_spill] sm:$0xff] }
 0x538   : > { %3268 = vmatpush3.bf16.msra.mxu0 %v5474_v47 }
 0x539   : > { %3269 = vmatprep.subr.bf16.mxu0 %v5475_v33 }
 0x53c   : > { %3270 = vmatpush3.bf16.msra.mxu0 %v5476_v36  ;;  %v5506_v36 = vld [vmem:[#allocation66_spill] sm:$0xff] }
 0x53d   : > { %3271 = vmatprep.subr.bf16.mxu0 %v5477_v11 }
 0x540   : > { %3272 = vmatpush3.bf16.msra.mxu0 %v4562_v41  ;;  %v5495_v41 = vld [vmem:[#allocation45_spill] sm:$0xff] }
 0x541   : > { %3273 = vmatprep.subr.bf16.mxu0 %v4565_v1  ;;  %v5478_v1 = vld [vmem:[#allocation19_spill] sm:$0xff] }
 0x544   : > { %3274 = vmatpush3.bf16.msra.mxu0 %v4568_v13  ;;  %v5490_v13 = vld [vmem:[#allocation31_spill] sm:$0xff] }
 0x545   : > { %3275 = vmatprep.subr.bf16.mxu0 %v4571_v6  ;;  %v5491_v6 = vld [vmem:[#allocation32_spill] sm:$0xff] }
 0x548   : > { %3276 = vmatpush3.bf16.msra.mxu0 %v4574_v7  ;;  %v5492_v7 = vld [vmem:[#allocation33_spill] sm:$0xff] }
 0x549   : > { %3277 = vmatprep.subr.bf16.mxu0 %v4577_v8  ;;  %v5493_v8 = vld [vmem:[#allocation34_spill] sm:$0xff] }
 0x54c   : > { %3278 = vmatpush3.bf16.msra.mxu0 %v4580_v5  ;;  %v5494_v5 = vld [vmem:[#allocation35_spill] sm:$0xff] }
 0x54d   : > { %2090 = vmatprep.subr.bf16.mxu0 %v4341_v15  ;;  %v5479_v15 = vld [vmem:[#allocation20_spill] sm:$0xff] }
 0x54f   : > { %1676 = vmatmul.mubr.bf16.vlgmr.msra.gmra.mxu0 %v1555_v27  ;;  %v5504_v27 = vld [vmem:[#allocation64_spill] sm:$0xff] }
 0x550   : > { %2091 = vmatpush1.bf16.msra.mxu0 %v4343_v16  ;;  %v5481_v16 = vld [vmem:[#allocation22_spill] sm:$0xff] }
 0x551   : > { %2092 = vmatprep.subr.bf16.mxu0 %v4347_v17  ;;  %v5482_v17 = vld [vmem:[#allocation23_spill] sm:$0xff] }
 0x554   : > { %2093 = vmatpush1.bf16.msra.mxu0 %v4350_v18  ;;  %v5483_v18 = vld [vmem:[#allocation24_spill] sm:$0xff] }
 0x555   : > { %2094 = vmatprep.subr.bf16.mxu0 %v4353_v19  ;;  %v5484_v19 = vld [vmem:[#allocation25_spill] sm:$0xff] }
 0x558   : > { %2095 = vmatpush1.bf16.msra.mxu0 %v4356_v20  ;;  %v5485_v20 = vld [vmem:[#allocation26_spill] sm:$0xff] }
 0x559   : > { %2096 = vmatprep.subr.bf16.mxu0 %v4359_v21  ;;  %v5486_v21 = vld [vmem:[#allocation27_spill] sm:$0xff] }
 0x55c   : > { %2097 = vmatpush1.bf16.msra.mxu0 %v4362_v22  ;;  %v5487_v22 = vld [vmem:[#allocation28_spill] sm:$0xff] }
 0x55d   : > { %2098 = vmatprep.subr.bf16.mxu0 %v4365_v23  ;;  %v5488_v23 = vld [vmem:[#allocation29_spill] sm:$0xff] }
 0x560   : > { %2099 = vmatpush1.bf16.msra.mxu0 %v5478_v1 }
 0x561   : > { %2100 = vmatprep.subr.bf16.mxu0 %v5479_v15 }
 0x564   : > { %2101 = vmatpush1.bf16.msra.mxu0 %v5480_v0 }
 0x565   : > { %2102 = vmatprep.subr.bf16.mxu0 %v5481_v16 }
 0x568   : > { %2103 = vmatpush1.bf16.msra.mxu0 %v5482_v17 }
 0x569   : > { %2104 = vmatprep.subr.bf16.mxu0 %v5483_v18 }
 0x56c   : > { %2105 = vmatpush1.bf16.msra.mxu0 %v5484_v19 }
 0x56d   : > { %2106 = vmatprep.subr.bf16.mxu0 %v5485_v20 }
 0x570   : > { %2107 = vmatpush2.bf16.msra.mxu0 %v5486_v21 }
 0x571   : > { %2108 = vmatprep.subr.bf16.mxu0 %v5487_v22 }
 0x574   : > { %2109 = vmatpush2.bf16.msra.mxu0 %v5488_v23 }
 0x575   : > { %2110 = vmatprep.subr.bf16.mxu0 %v5489_v4 }
 0x578   : > { %2111 = vmatpush2.bf16.msra.mxu0 %v5490_v13 }
 0x579   : > { %2112 = vmatprep.subr.bf16.mxu0 %v5491_v6  ;;  %v3179_v6 = vld [vmem:[%s4299_s16 + $0x2] ss:$0 sm:$0xff] }
 0x57a   : > { %vm1886_vm10 = vcmp.eq.s32.totalorder %v4319_v2, %v3179_v6  ;;  %vm1887_vm11 = vcmp.eq.s32.totalorder %v4323_v3, %v3179_v6 }
 0x57b   : > { %v3181_v51 = vsel %vm1887_vm11, 1.0, %v5444_v63 }
 0x57c   : > { %2113 = vmatpush2.bf16.msra.mxu0 %v5492_v7 }
 0x57d   : > { %2114 = vmatprep.subr.bf16.mxu0 %v5493_v8 }
 0x580   : > { %2115 = vmatpush2.bf16.msra.mxu0 %v5494_v5  ;;  %v5507_v5 = vld [vmem:[#allocation67_spill] sm:$0xff] }
 0x581   : > { %2116 = vmatprep.subr.bf16.mxu0 %v5495_v41 }
 0x584   : > { %2117 = vmatpush2.bf16.msra.mxu0 %v5496_v31 }
 0x585   : > { %2118 = vmatprep.subr.bf16.mxu0 %v5497_v32  ;;  %v5508_v32 = vld [vmem:[#allocation68_spill] sm:$0xff] }
 0x588   : > { %2119 = vmatpush2.bf16.msra.mxu0 %v5498_v35 }
 0x589   : > { %2120 = vmatprep.subr.bf16.mxu0 %v5499_v28  ;;  %v3180_v28 = vsel %vm1886_vm10, 1.0, %v5444_v63 }
 0x58a   : > { %v1910_v45 = vsel %vm409_vm3, %v3180_v28, %v1905_v25 }
 0x58b   : > { %1912 = vxpose.xlu0.b32.start [1/2] (short) (narrow) %v1910_v45, 32 }
 0x58c   : > { %2121 = vmatpush2.bf16.msra.mxu0 %v5500_v10 }
 0x5ef   : > { %v1634_v53 = vpop.f32.mrf.mxu1  ;;  %v1591_v56 = vpop.f32.mrf.mxu0 }
 0x5f0   : > { %v1684_v50 = vadd.f32 %v1591_v56, %v5504_v27  ;;  %v1712_v35 = vadd.f32 %v1634_v53, %v5508_v32  ;;  %v1907_v56 = vpop.permute.xlu0 %1906 }
 0x5f1   : > { %v1636_v55 = vpop.f32.mrf.mxu1  ;;  %v1593_v58 = vpop.f32.mrf.mxu0 }
 0x5f2   : > { %v1716_v62 = vadd.f32 %v1636_v55, %v5503_v60  ;;  %v3164_v1 = vmul.f32 -1.442695, %v1684_v50  ;;  %v1698_v55 = vadd.f32 %v1593_v58, %v5509_v52 }
 0x5f3   : > { %v1638_v57 = vpop.f32.mrf.mxu1  ;;  %v1595_v37 = vpop.f32.mrf.mxu0 }
 0x5f4   : > { %v3168_v33 = vmul.f32 -1.442695, %v1716_v62  ;;  %v1685_v11 = vadd.f32 %v1595_v37, %v5506_v36  ;;  %v1911_v62 = vsel %vm409_vm3, %v3181_v51, %v1907_v56  ;;  %v3166_v50 = vmul.f32 -1.442695, %v1698_v55  ;;  %v4890_v51 = vld [vmem:[#allocation10 + $0xcc] ss:$20 sps:$4 sm:$0xff]  }
 0x5f5   : > { %v1640_v26 = vpop.f32.mrf.mxu1  ;;  %v1597_v15 = vpop.f32.mrf.mxu0  ;;  %1913 = vxpose.xlu0.b32.end [2/2] (short) (narrow) %v1911_v62, 32  ;;  %v4895_v55 = vld [vmem:[#allocation10 + $0xc8] ss:$20 sps:$4 sm:$0xff]   ;;  %v4902_v56 = vld [vmem:[#allocation10 + $0xa0] ss:$20 sps:$4 sm:$0xff]  }
 0x5f6   : > { %v1717_v47 = vadd.f32 %v1640_v26, %v5505_v12  ;;  %3571 = vpow2.f32 %v3168_v33  ;;  %v3165_v16 = vmul.f32 -1.442695, %v1685_v11  ;;  %v1699_v41 = vadd.f32 %v1597_v15, %v5507_v5  ;;  %v5510_v26 = vld [vmem:[#allocation70_spill] sm:$0xff] }
 0x5f7   : > { %3573 = vpow2.f32 %v3164_v1  ;;  %v1713_v37 = vadd.f32 %v1638_v57, %v5510_v26  ;;  %v4908_v62 = vld [vmem:[#allocation10 + $0x78] ss:$20 sps:$4 sm:$0xff]   ;;  %v4911_v26 = vld [vmem:[#allocation10 + $0x54] ss:$20 sps:$4 sm:$0xff]  }
 0x5f8   : > { %v3169_v0 = vmul.f32 -1.442695, %v1717_v47  ;;  %v3167_v9 = vmul.f32 -1.442695, %v1699_v41 }
 0x5fa   : > { %3575 = vpow2.f32 %v3169_v0 }
 0x5fb   : > { %3577 = vpow2.f32 %v3165_v16 }
 0x603   : > { %v3572_v8 = vpop.eup %3571 }
 0x604   : > { %v3574_v31 = vpop.eup %3573  ;;  %v1724_v44 = vadd.f32 1.0, %v3572_v8 }
 0x605   : > { %v1692_v42 = vadd.f32 1.0, %v3574_v31 }
 0x607   : > { %v3576_v10 = vpop.eup %3575 }
 0x608   : > { %v3578_v40 = vpop.eup %3577  ;;  %v1725_v46 = vadd.f32 1.0, %v3576_v10 }
 0x609   : > { %v1693_v53 = vadd.f32 1.0, %v3578_v40 }
 0x60f   : > { %v3279_v17 = vpop.f32.mrf.mxu0 }
 0x611   : > { %v3280_v18 = vpop.f32.mrf.mxu0 }
 0x612   : > { %v3281_v19 = vadd.f32 %v3280_v18, %v3279_v17 }
 0x613   : > { %v3282_v20 = vpop.f32.mrf.mxu0 }
 0x614   : > { %v1730_v21 = vadd.f32 %v3281_v19, %v5503_v60 }
 0x615   : > { %v3283_v22 = vpop.f32.mrf.mxu0 }
 0x616   : > { %v3170_v23 = vmul.f32 -1.442695, %v1730_v21  ;;  %v3284_v4 = vadd.f32 %v3283_v22, %v3282_v20 }
 0x618   : > { %3579 = vpow2.f32 %v3170_v23  ;;  %v1731_v13 = vadd.f32 %v3284_v4, %v5505_v12 }
 0x61a   : > { %v3171_v7 = vmul.f32 -1.442695, %v1731_v13 }
 0x61c   : > { %3581 = vpow2.f32 %v3171_v7 }
 0x61d   : > { %3583 = vtanh.f32 %v1712_v35 }
 0x61e   : > { %3585 = vrcp.f32 %v1724_v44  ;;  %v1862_v44 = vpop.xlane.xlu1 %1861 }
 0x61f   : > { %3587 = vpow2.f32 %v3167_v9  ;;  %v1385_v9 = vsel %vm1377_vm0, %v4703_v38, 0.0  ;;  %vm1866_vm13 = vcmp.gt.f32.partialorder %v1862_v44, 0.0  ;;  %v4887_v38 = vld [vmem:[#allocation10 + $0xf0] ss:$20 sps:$4 sm:$0xff]  }
 0x620   : > { %3589 = vrcp.f32 %v1692_v42  ;;  %v5005_v44 = vld [vmem:[#allocation10 + $0xb0] ss:$20 sps:$4 sm:$0xff]  }
 0x621   : > { %3591 = vrcp.f32 %v1725_v46  ;;  %5521 = vst [vmem:[#allocation48_spill] sm:$0xff] %v5005_v44 }
 0x622   : > { %3593 = vrcp.f32 %v1693_v53  ;;  %v4898_v53 = vld [vmem:[#allocation10 + $0xa4] ss:$20 sps:$4 sm:$0xff]  }
 0x625   : > { %v3580_v60 = vpop.eup %3579 }
 0x626   : > { %v1738_v27 = vadd.f32 1.0, %v3580_v60  ;;  %v4905_v60 = vld [vmem:[#allocation10 + $0x7c] ss:$20 sps:$4 sm:$0xff]  }
 0x628   : > { %3595 = vrcp.f32 %v1738_v27  ;;  %v4917_v27 = vld [vmem:[#allocation10 + $0x2c] ss:$20 sps:$4 sm:$0xff]  }
 0x629   : > { %v3582_v12 = vpop.eup %3581  ;;  %3597 = vtanh.f32 %v1713_v37  ;;  %v4914_v37 = vld [vmem:[#allocation10 + $0x50] ss:$20 sps:$4 sm:$0xff]  }
 0x62a   : > { %v1739_v47 = vadd.f32 1.0, %v3582_v12  ;;  %3599 = vpow2.f32 %v3166_v50  ;;  %v3584_v58 = vpop.eup %3583  ;;  %v4920_v50 = vld [vmem:[#allocation10 + $0x28] ss:$20 sps:$4 sm:$0xff]   ;;  %v4923_v12 = vld [vmem:[#allocation10 + $0x4] ss:$20 sps:$4 sm:$0xff]  }
 0x62b   : > { %v3586_v33 = vpop.eup %3585 }
 0x62c   : > { %3601 = vrcp.f32 %v1739_v47  ;;  %v3588_v36 = vpop.eup %3587  ;;  %v1746_v15 = vmul.f32 %v3586_v33, %v4750_v59  ;;  %v4926_v47 = vld [vmem:[#allocation10] ss:$20 sps:$4 sm:$0xff]   ;;  %v4932_v33 = vld [vmem:[#allocation10 + $0x258] ss:$20 sps:$4 sm:$0xff]  }
 0x62d   : > { %v3590_v11 = vpop.eup %3589  ;;  %v1707_v22 = vadd.f32 1.0, %v3588_v36  ;;  %v4935_v36 = vld [vmem:[#allocation10 + $0x234] ss:$20 sps:$4 sm:$0xff]  }
 0x62e   : > { %v3592_v1 = vpop.eup %3591  ;;  %v1744_v16 = vmul.f32 %v3590_v11, %v3584_v58  ;;  %v4929_v58 = vld [vmem:[#allocation10 + $0x25c] ss:$20 sps:$4 sm:$0xff]  }
 0x62f   : > { %v3594_v0 = vpop.eup %3593  ;;  %v1747_v17 = vmul.f32 %v3592_v1, %v4752_v61  ;;  %3603 = vrcp.f32 %v1707_v22  ;;  %v4938_v11 = vld [vmem:[#allocation10 + $0x230] ss:$20 sps:$4 sm:$0xff]   ;;  %v4941_v1 = vld [vmem:[#allocation10 + $0x20c] ss:$20 sps:$4 sm:$0xff]  }
 0x630   : > { %v1748_v20 = vadd.f32 %v1746_v15, %v1744_v16  ;;  %v4944_v15 = vld [vmem:[#allocation10 + $0x208] ss:$20 sps:$4 sm:$0xff]   ;;  %v4971_v22 = vld [vmem:[#allocation10 + $0x144] ss:$20 sps:$4 sm:$0xff]  }
 0x631   : > { %v4953_v16 = vld [vmem:[#allocation10 + $0x1bc] ss:$20 sps:$4 sm:$0xff]   ;;  %5512 = vst [vmem:[#allocation37_spill] sm:$0xff] %v4971_v22 }
 0x635   : > { %v3596_v57 = vpop.eup %3595 }
 0x636   : > { %v1750_v18 = vmul.f32 %v3596_v57, %v4754_v24  ;;  %v3598_v19 = vpop.eup %3597  ;;  %v4950_v57 = vld [vmem:[#allocation10 + $0x1e0] ss:$20 sps:$4 sm:$0xff]  }
 0x637   : > { %v3600_v21 = vpop.eup %3599  ;;  %v1745_v23 = vmul.f32 %v3598_v19, %v3594_v0  ;;  %v4947_v0 = vld [vmem:[#allocation10 + $0x1e4] ss:$20 sps:$4 sm:$0xff]  }
 0x638   : > { %v1752_v13 = vadd.f32 %v1750_v18, %v1748_v20  ;;  %v1706_v8 = vadd.f32 1.0, %v3600_v21  ;;  %v4959_v18 = vld [vmem:[#allocation10 + $0x194] ss:$20 sps:$4 sm:$0xff]   ;;  %v4962_v19 = vld [vmem:[#allocation10 + $0x190] ss:$20 sps:$4 sm:$0xff]  }
 0x639   : > { %v3602_v4 = vpop.eup %3601  ;;  %v1749_v6 = vadd.f32 %v1747_v17, %v1745_v23  ;;  %v4956_v17 = vld [vmem:[#allocation10 + $0x1b8] ss:$20 sps:$4 sm:$0xff]   ;;  %v4968_v21 = vld [vmem:[#allocation10 + $0x168] ss:$20 sps:$4 sm:$0xff]   ;;  %v4974_v23 = vld [vmem:[#allocation10 + $0x140] ss:$20 sps:$4 sm:$0xff]  }
 0x63a   : > { %v1751_v7 = vmul.f32 %v3602_v4, %v4827_v54  ;;  %3605 = vtanh.f32 %v1752_v13  ;;  %v1865_v54 = vpop.xlane.xlu0 %1864  ;;  %v4965_v20 = vld [vmem:[#allocation10 + $0x16c] ss:$20 sps:$4 sm:$0xff]   ;;  %5511 = vst [vmem:[#allocation36_spill] sm:$0xff] %v4968_v21  ;;  %5513 = vst [vmem:[#allocation38_spill] sm:$0xff] %v4974_v23  ;;  %v4977_v4 = vld [vmem:[#allocation10 + $0x268] ss:$20 sps:$4 sm:$0xff]  }
 0x63b   : > { %vm1867_vm12 = vcmp.gt.f32.partialorder %v1865_v54, 0.0  ;;  %5514 = vst [vmem:[#allocation39_spill] sm:$0xff] %v4977_v4  ;;  %v4993_v54 = vld [vmem:[#allocation10 + $0x100] ss:$20 sps:$4 sm:$0xff]  }
 0x63c   : > { %v1753_v59 = vadd.f32 %v1751_v7, %v1749_v6  ;;  %v3604_v61 = vpop.eup %3603  ;;  %5517 = vst [vmem:[#allocation42_spill] sm:$0xff] %v4993_v54 }
 0x63e   : > { %3607 = vtanh.f32 %v1753_v59  ;;  %1811 = vmatprep.subr.mxu1 %v1753_v59 }
 0x63f   : > { %3609 = vrcp.f32 %v1706_v8 }
 0x647   : > { %v3606_v5 = vpop.eup %3605 }
 0x64b   : > { %v3608_v24 = vpop.eup %3607 }
 0x64c   : > { %v1757_v41 = vmul.f32 %v3608_v24, %v3604_v61  ;;  %v3610_v31 = vpop.eup %3609 }
 0x64d   : > { %v1756_v32 = vmul.f32 %v3610_v31, %v3606_v5  ;;  %v4986_v31 = vld [vmem:[#allocation10 + $0x128] ss:$20 sps:$4 sm:$0xff]  }
 0x64e   : > { %1812 = vmatpush1.msra.mxu1 %v1757_v41  ;;  %5515 = vst [vmem:[#allocation40_spill] sm:$0xff] %v4986_v31 }
 0x64f   : > { %1813 = vmatprep.subr.mxu1 %v1752_v13 }
 0x650   : > { %1814 = vmatpush1.msra.mxu1 %v1756_v32  ;;  %v4989_v32 = vld [vmem:[#allocation10 + $0x240] ss:$20 sps:$4 sm:$0xff]  }
 0x651   : > { %3174 = vmatmul.mubr.msk.f32.vlgmr.msra.gmra.mxu1 %vm409_vm3, %v4818_v48  ;;  %5516 = vst [vmem:[#allocation41_spill] sm:$0xff] %v4989_v32 }
 0x652   : > { %1853 = vmatprep.mubr.f32.mxu1 %v5444_v63 }
 0x655   : > { %3175 = vmatmul.mubr.msk.f32.gmra.mxu1 %vm409_vm3, %v4821_v49 }
 0x656   : > { %2020 = vmatprep.mubr.f32.mxu1 %v5444_v63 }
 0x66d   : > { %v1928_v10 = vpop.trf.xlu0 }
 0x671   : > { %v1929_v45 = vpop.trf.xlu0 }
 0x711   : > { %v1849_v35 = vpop.f32.mrf.mxu1 }
 0x712   : > { %v4870_v46 = vsel %vm1866_vm13, %v1849_v35, %v4694_v34  ;;  %v1930_v34 = vpop.trf.xlu0  ;;  %v4996_v35 = vld [vmem:[#allocation10 + $0x218] ss:$20 sps:$4 sm:$0xff]  }
 0x713   : > { %v1851_v28 = vpop.f32.mrf.mxu1  ;;  %5518 = vst [vmem:[#allocation43_spill] sm:$0xff] %v4996_v35 }
 0x714   : > { %v4867_v49 = vsel %vm1866_vm13, %v1851_v28, %v4697_v30  ;;  %v4882_v30 = vld [vmem:[#allocation10 + $0xf4] ss:$20 sps:$4 sm:$0xff]   ;;  %v4999_v28 = vld [vmem:[#allocation10 + $0xd8] ss:$20 sps:$4 sm:$0xff]  }
 0x715   : > { %v1855_v40 = vpop.f32.mrf.mxu1  ;;  %5519 = vst [vmem:[#allocation44_spill] sm:$0xff] %v4999_v28 }
 0x716   : > { %v4862_v42 = vsel %vm1867_vm12, %v1855_v40, %v4701_v39  ;;  %v4879_v39 = vld [vmem:[#allocation10 + $0x118] ss:$20 sps:$4 sm:$0xff]   ;;  %v1931_v52 = vpop.trf.xlu0  ;;  %v5008_v40 = vld [vmem:[#allocation10 + $0x1c8] ss:$20 sps:$4 sm:$0xff]  }
 0x717   : > { %v1857_v25 = vpop.f32.mrf.mxu1  ;;  %5522 = vst [vmem:[#allocation51_spill] sm:$0xff] %v5008_v40 }
 0x718   : > { %v4859_v48 = vsel %vm1867_vm12, %v1857_v25, %v1385_v9  ;;  %v5011_v9 = vld [vmem:[#allocation10 + $0x88] ss:$20 sps:$4 sm:$0xff]   ;;  %v5014_v25 = vld [vmem:[#allocation10 + $0x1a0] ss:$20 sps:$4 sm:$0xff]  }
 0x719   : > { %1984 = vmatprep.subr.mxu1 %v4859_v48  ;;  %5523 = vst [vmem:[#allocation52_spill] sm:$0xff] %v5011_v9  ;;  %5524 = vst [vmem:[#allocation55_spill] sm:$0xff] %v5014_v25 }
 0x71a   : > { %1985 = vmatpush1.msra.mxu1 %v4862_v42 }
 0x71b   : > { %1986 = vmatprep.subr.mxu1 %v4867_v49 }
 0x71c   : > { %1987 = vmatpush1.msra.mxu1 %v4870_v46 }
 0x71d   : > { %3185 = vmatmul.mubr.msk.f32.vlgmr.msra.gmra.mxu1 %vm409_vm3, %v1928_v10  ;;  %2047 = vmatprep.subr.bf16.mxu1 %v4875_v29  ;;  %v5002_v10 = vld [vmem:[#allocation10 + $0x1f0] ss:$20 sps:$4 sm:$0xff]  }
 0x71e   : > { %2026 = vmatprep.mubr.f32.mxu1 %v5444_v63  ;;  %2048 = vmatpush1.bf16.msra.mxu1 %v4879_v39  ;;  %5520 = vst [vmem:[#allocation47_spill] sm:$0xff] %v5002_v10 }
 0x71f   : > { %2049 = vmatprep.subr.bf16.mxu1 %v4882_v30 }
 0x721   : > { %3186 = vmatmul.mubr.msk.f32.gmra.mxu1 %vm409_vm3, %v1929_v45  ;;  %v5017_v45 = vld [vmem:[#allocation10 + $0x60] ss:$20 sps:$4 sm:$0xff]  }
 0x722   : > { %2032 = vmatprep.mubr.f32.mxu1 %v5444_v63  ;;  %2050 = vmatpush1.bf16.msra.mxu1 %v4887_v38  ;;  %5525 = vst [vmem:[#allocation56_spill] sm:$0xff] %v5017_v45 }
 0x723   : > { %2051 = vmatprep.subr.bf16.mxu1 %v4890_v51 }
 0x725   : > { %3187 = vmatmul.mubr.msk.f32.gmra.mxu1 %vm409_vm3, %v1930_v34  ;;  %v5020_v34 = vld [vmem:[#allocation10 + $0x178] ss:$20 sps:$4 sm:$0xff]  }
 0x726   : > { %2038 = vmatprep.mubr.f32.mxu1 %v5444_v63  ;;  %2052 = vmatpush1.bf16.msra.mxu1 %v4895_v55  ;;  %5526 = vst [vmem:[#allocation57_spill] sm:$0xff] %v5020_v34 }
 0x727   : > { %2053 = vmatprep.subr.bf16.mxu1 %v4898_v53 }
 0x729   : > { %3188 = vmatmul.mubr.msk.f32.gmra.mxu1 %vm409_vm3, %v1931_v52  ;;  %v5023_v52 = vld [vmem:[#allocation10 + $0x38] ss:$20 sps:$4 sm:$0xff]  }
 0x72a   : > { %2054 = vmatpush1.bf16.msra.mxu1 %v4902_v56  ;;  %5527 = vst [vmem:[#allocation58_spill] sm:$0xff] %v5023_v52 }
 0x72b   : > { %2055 = vmatprep.subr.bf16.mxu1 %v4905_v60 }
 0x72e   : > { %2056 = vmatpush1.bf16.msra.mxu1 %v4908_v62 }
 0x72f   : > { %2057 = vmatprep.subr.bf16.mxu1 %v4911_v26 }
 0x732   : > { %2058 = vmatpush1.bf16.msra.mxu1 %v4914_v37 }
 0x733   : > { %2059 = vmatprep.subr.bf16.mxu1 %v4917_v27 }
 0x736   : > { %2060 = vmatpush1.bf16.msra.mxu1 %v4920_v50 }
 0x737   : > { %2061 = vmatprep.subr.bf16.mxu1 %v4923_v12 }
 0x73a   : > { %2062 = vmatpush1.bf16.msra.mxu1 %v4926_v47 }
 0x73b   : > { %2063 = vmatprep.subr.bf16.mxu1 %v4929_v58 }
 0x73e   : > { %2064 = vmatpush2.bf16.msra.mxu1 %v4932_v33 }
 0x73f   : > { %2065 = vmatprep.subr.bf16.mxu1 %v4935_v36 }
 0x742   : > { %2066 = vmatpush2.bf16.msra.mxu1 %v4938_v11 }
 0x743   : > { %2067 = vmatprep.subr.bf16.mxu1 %v4941_v1 }
 0x746   : > { %2068 = vmatpush2.bf16.msra.mxu1 %v4944_v15 }
 0x747   : > { %2069 = vmatprep.subr.bf16.mxu1 %v4947_v0 }
 0x74a   : > { %2070 = vmatpush2.bf16.msra.mxu1 %v4950_v57 }
 0x74b   : > { %2071 = vmatprep.subr.bf16.mxu1 %v4953_v16 }
 0x74e   : > { %2072 = vmatpush2.bf16.msra.mxu1 %v4956_v17 }
 0x74f   : > { %2073 = vmatprep.subr.bf16.mxu1 %v4959_v18 }
 0x752   : > { %2074 = vmatpush2.bf16.msra.mxu1 %v4962_v19 }
 0x753   : > { %2075 = vmatprep.subr.bf16.mxu1 %v4965_v20 }
 0x756   : > { %2076 = vmatpush2.bf16.msra.mxu1 %v4968_v21 }
 0x757   : > { %2077 = vmatprep.subr.bf16.mxu1 %v4971_v22 }
 0x75a   : > { %2078 = vmatpush2.bf16.msra.mxu1 %v4974_v23 }
 0x75b   : > { %3285 = vmatprep.subr.bf16.mxu1 %v4977_v4 }
 0x7dd   : > { %v2022_v13 = vpop.f32.mrf.mxu1 }
 0x7df   : > { %v4980_v6 = vpop.f32.mrf.mxu1 }
 0x7e1   : > { %v2028_v7 = vpop.f32.mrf.mxu1 }
 0x7e2   : > { %v2045_v41 = vpack.c.bf16 %v2028_v7, %v2022_v13  ;;  %v5026_v13 = vld [vmem:[#allocation10 + $0x150] ss:$20 sps:$4 sm:$0xff]  }
 0x7e3   : > { %v4982_v8 = vpop.f32.mrf.mxu1  ;;  %5528 = vst [vmem:[#allocation59_spill] sm:$0xff] %v5026_v13  ;;  %v5029_v7 = vld [vmem:[#allocation10 + $0x10] ss:$20 sps:$4 sm:$0xff]  }
 0x7e4   : > { %5529 = vst [vmem:[#allocation60_spill] sm:$0xff] %v5029_v7 }
 0x7e5   : > { %v2034_v59 = vpop.f32.mrf.mxu1 }
 0x7e7   : > { %v4984_v61 = vpop.f32.mrf.mxu1 }
 0x7e9   : > { %v2040_v5 = vpop.f32.mrf.mxu1 }
 0x7ea   : > { %v2046_v24 = vpack.c.bf16 %v2040_v5, %v2034_v59  ;;  %v3739_v59 = vld [vmem:[#allocation10 + $0x124] ss:$20 sps:$4 sm:$0xff]   ;;  %v3740_v5 = vld [vmem:[#allocation10 + $0x120] ss:$20 sps:$4 sm:$0xff]  }
 0x7ec   : > { %2079 = vmatprep.mubr.bf16.mxu1 %v2046_v24  ;;  %2122 = vmatprep.mubr.bf16.mxu0 %v2046_v24 }
 0x7ed   : > { %2080 = vmatmul.mubr.bf16.vlgmr.msra.gmra.mxu1 %v2045_v41  ;;  %2123 = vmatmul.mubr.bf16.vlgmr.msra.gmra.mxu0 %v2045_v41 }
 0x7ee   : > { %3286 = vmatpush3.bf16.msra.mxu1 %v4986_v31  ;;  %2165 = vmatprep.mubr.bf16.mxu1 %v2046_v24  ;;  %v3741_v24 = vld [vmem:[#allocation10 + $0xfc] ss:$20 sps:$4 sm:$0xff]  }
 0x7ef   : > { %3287 = vmatprep.subr.bf16.mxu1 %v4989_v32  ;;  %2337 = vmatprep.mubr.f32.mxu0 %v5444_v63 }
 0x7f2   : > { %3288 = vmatpush3.bf16.msra.mxu1 %v4993_v54 }
 0x7f3   : > { %3289 = vmatprep.subr.bf16.mxu1 %v4996_v35  ;;  %v5072_v35 = vld [vmem:[%s4308_s8 + $0x20] sm:$0xff] }
 0x7f4   : > { %5532 = vst [vmem:[#allocation20_spill] sm:$0xff] %v5072_v35 }
 0x7f6   : > { %3290 = vmatpush3.bf16.msra.mxu1 %v4999_v28 }
 0x7f7   : > { %3291 = vmatprep.subr.bf16.mxu1 %v5002_v10 }
 0x7fa   : > { %3292 = vmatpush3.bf16.msra.mxu1 %v5005_v44 }
 0x7fb   : > { %3293 = vmatprep.subr.bf16.mxu1 %v5008_v40 }
 0x7fe   : > { %3294 = vmatpush3.bf16.msra.mxu1 %v5011_v9  ;;  %v3747_v9 = vld [vmem:[#allocation10 + $0x84] ss:$20 sps:$4 sm:$0xff]  }
 0x7ff   : > { %3295 = vmatprep.subr.bf16.mxu1 %v5014_v25  ;;  %v3745_v25 = vld [vmem:[#allocation10 + $0xac] ss:$20 sps:$4 sm:$0xff]  }
 0x802   : > { %3296 = vmatpush3.bf16.msra.mxu1 %v5017_v45  ;;  %v3743_v45 = vld [vmem:[#allocation10 + $0xd4] ss:$20 sps:$4 sm:$0xff]  }
 0x803   : > { %3297 = vmatprep.subr.bf16.mxu1 %v5020_v34  ;;  %v3742_v34 = vld [vmem:[#allocation10 + $0xf8] ss:$20 sps:$4 sm:$0xff]  }
 0x806   : > { %3298 = vmatpush3.bf16.msra.mxu1 %v5023_v52  ;;  %v3744_v52 = vld [vmem:[#allocation10 + $0xd0] ss:$20 sps:$4 sm:$0xff]  }
 0x807   : > { %3299 = vmatprep.subr.bf16.mxu1 %v5026_v13  ;;  %v3746_v13 = vld [vmem:[#allocation10 + $0xa8] ss:$20 sps:$4 sm:$0xff]  }
 0x80a   : > { %3300 = vmatpush3.bf16.msra.mxu1 %v5029_v7  ;;  %v3748_v7 = vld [vmem:[#allocation10 + $0x80] ss:$20 sps:$4 sm:$0xff]  }
 0x80b   : > { %2580 = vmatprep.subr.bf16.mxu1 %v3739_v59  ;;  %v3749_v59 = vld [vmem:[#allocation10 + $0x5c] ss:$20 sps:$4 sm:$0xff]  }
 0x80d   : > { %2166 = vmatmul.mubr.bf16.vlgmr.msra.gmra.mxu1 %v2045_v41  ;;  %v3750_v41 = vld [vmem:[#allocation10 + $0x58] ss:$20 sps:$4 sm:$0xff]  }
 0x80e   : > { %2581 = vmatpush1.bf16.msra.mxu1 %v3740_v5  ;;  %v3751_v5 = vld [vmem:[#allocation10 + $0x34] ss:$20 sps:$4 sm:$0xff]  }
 0x80f   : > { %2582 = vmatprep.subr.bf16.mxu1 %v3741_v24  ;;  %v3752_v24 = vld [vmem:[#allocation10 + $0x30] ss:$20 sps:$4 sm:$0xff]  }
 0x812   : > { %2583 = vmatpush1.bf16.msra.mxu1 %v3742_v34  ;;  %v3753_v34 = vld [vmem:[#allocation10 + $0xc] ss:$20 sps:$4 sm:$0xff]  }
 0x813   : > { %2584 = vmatprep.subr.bf16.mxu1 %v3743_v45  ;;  %v3754_v45 = vld [vmem:[#allocation10 + $0x8] ss:$20 sps:$4 sm:$0xff]  }
 0x816   : > { %2585 = vmatpush1.bf16.msra.mxu1 %v3744_v52  ;;  %v3755_v52 = vld [vmem:[#allocation10 + $0x264] ss:$20 sps:$4 sm:$0xff]  }
 0x817   : > { %2586 = vmatprep.subr.bf16.mxu1 %v3745_v25  ;;  %v3756_v25 = vld [vmem:[#allocation10 + $0x260] ss:$20 sps:$4 sm:$0xff]  }
 0x81a   : > { %2587 = vmatpush1.bf16.msra.mxu1 %v3746_v13  ;;  %v3757_v13 = vld [vmem:[#allocation10 + $0x23c] ss:$20 sps:$4 sm:$0xff]  }
 0x81b   : > { %2588 = vmatprep.subr.bf16.mxu1 %v3747_v9  ;;  %v3758_v9 = vld [vmem:[#allocation10 + $0x238] ss:$20 sps:$4 sm:$0xff]  }
 0x81e   : > { %2589 = vmatpush1.bf16.msra.mxu1 %v3748_v7  ;;  %v3759_v7 = vld [vmem:[#allocation10 + $0x214] ss:$20 sps:$4 sm:$0xff]  }
 0x81f   : > { %2590 = vmatprep.subr.bf16.mxu1 %v3749_v59  ;;  %v3760_v59 = vld [vmem:[#allocation10 + $0x210] ss:$20 sps:$4 sm:$0xff]  }
 0x822   : > { %2591 = vmatpush1.bf16.msra.mxu1 %v3750_v41  ;;  %v3761_v41 = vld [vmem:[#allocation10 + $0x1ec] ss:$20 sps:$4 sm:$0xff]  }
 0x823   : > { %2592 = vmatprep.subr.bf16.mxu1 %v3751_v5  ;;  %v3762_v5 = vld [vmem:[#allocation10 + $0x1e8] ss:$20 sps:$4 sm:$0xff]  }
 0x826   : > { %2593 = vmatpush1.bf16.msra.mxu1 %v3752_v24  ;;  %v3763_v24 = vld [vmem:[#allocation10 + $0x1c4] ss:$20 sps:$4 sm:$0xff]  }
 0x827   : > { %2594 = vmatprep.subr.bf16.mxu1 %v3753_v34  ;;  %v3764_v34 = vld [vmem:[#allocation10 + $0x1c0] ss:$20 sps:$4 sm:$0xff]  }
 0x82a   : > { %2595 = vmatpush1.bf16.msra.mxu1 %v3754_v45  ;;  %v3765_v45 = vld [vmem:[#allocation10 + $0x19c] ss:$20 sps:$4 sm:$0xff]  }
 0x82b   : > { %2596 = vmatprep.subr.bf16.mxu1 %v3755_v52  ;;  %v3766_v52 = vld [vmem:[#allocation10 + $0x198] ss:$20 sps:$4 sm:$0xff]  }
 0x82e   : > { %2597 = vmatpush2.bf16.msra.mxu1 %v3756_v25  ;;  %v3767_v25 = vld [vmem:[#allocation10 + $0x174] ss:$20 sps:$4 sm:$0xff]  }
 0x82f   : > { %2598 = vmatprep.subr.bf16.mxu1 %v3757_v13  ;;  %v3768_v13 = vld [vmem:[#allocation10 + $0x170] ss:$20 sps:$4 sm:$0xff]  }
 0x832   : > { %2599 = vmatpush2.bf16.msra.mxu1 %v3758_v9  ;;  %v3769_v9 = vld [vmem:[#allocation10 + $0x14c] ss:$20 sps:$4 sm:$0xff]  }
 0x833   : > { %2600 = vmatprep.subr.bf16.mxu1 %v3759_v7  ;;  %v3770_v7 = vld [vmem:[#allocation10 + $0x148] ss:$20 sps:$4 sm:$0xff]  }
 0x836   : > { %2601 = vmatpush2.bf16.msra.mxu1 %v3760_v59  ;;  %v3207_v59 = vld [vmem:[%s4306_s14 + $0x3] ss:$0 sm:$0xff] }
 0x837   : > { %2602 = vmatprep.subr.bf16.mxu1 %v3761_v41  ;;  %vm2386_vm14 = vcmp.eq.s32.totalorder %v4319_v2, %v3207_v59  ;;  %vm2387_vm15 = vcmp.eq.s32.totalorder %v4323_v3, %v3207_v59 }
 0x838   : > { %v3208_v41 = vsel %vm2386_vm14, 1.0, %v5444_v63 }
 0x839   : > { %2394 = vrot.lane.b32.xlu1 %v3208_v41, %s4007_s29  ;;  %v5055_v41 = vpop.f32.mrf.mxu1 }
 0x83a   : > { %2603 = vmatpush2.bf16.msra.mxu1 %v3762_v5  ;;  %v3209_v5 = vsel %vm2387_vm15, 1.0, %v5444_v63 }
 0x83b   : > { %2604 = vmatprep.subr.bf16.mxu1 %v3763_v24  ;;  %2396 = vrot.lane.b32.xlu0 %v3209_v5, %s4007_s29  ;;  %v3176_v24 = vld [vmem:[%s4292_s0 + $0x2] sm:$0x1] }
 0x83c   : > { %vm2254_vm0 = vcmp.gt.s32.totalorder %v3176_v24, 0 }
 0x83e   : > { %2605 = vmatpush2.bf16.msra.mxu1 %v3764_v34  ;;  %v2255_v34 = vsel %vm2254_vm0, 1, %v5501_v14 }
 0x83f   : > { %2606 = vmatprep.subr.bf16.mxu1 %v3765_v45  ;;  %v2251_v45 = vrot.slane %v3176_v24, %v5502_v43 }
 0x841   : > { %vm2252_vm1 = vcmp.eq.s32.totalorder %v4319_v2, %v2251_v45  ;;  %vm2253_vm5 = vcmp.eq.s32.totalorder %v4323_v3, %v2251_v45 }
 0x842   : > { %2607 = vmatpush2.bf16.msra.mxu1 %v3766_v52  ;;  %v2259_v52 = vrot.slane %v2255_v34, %v5502_v43 }
 0x843   : > { %2608 = vmatprep.subr.bf16.mxu1 %v3767_v25 }
 0x844   : > { %vm2260_vm2 = vcmp.eq.s32.totalorder %v2259_v52, 1  ;;  %v5060_v52 = vld [vmem:[%s4308_s8 + $0x18] sm:$0xff] }
 0x845   : > { %vm2261_vm4 = vmand %vm2252_vm1, %vm2260_vm2 }
 0x846   : > { %2609 = vmatpush2.bf16.msra.mxu1 %v3768_v13  ;;  %vm2262_vm6 = vmand %vm2253_vm5, %vm2260_vm2 }
 0x847   : > { %2610 = vmatprep.subr.bf16.mxu1 %v3769_v9  ;;  %v5046_v25 = vsel %vm2262_vm6, 1.0, %v5444_v63  ;;  %v5051_v9 = vsel %vm2261_vm4, 1.0, %v5444_v63 }
 0x848   : > { %v2353_v13 = vsel %vm409_vm3, %v5046_v25, 0.0 }
 0x84a   : > { %2611 = vmatpush2.bf16.msra.mxu1 %v3770_v7  ;;  %v2350_v7 = vsel %vm409_vm3, %v5051_v9, 0.0 }
 0x85d   : > { %2354 = vadd.xlane.f32.xlu1 %v2353_v13  ;;  %v5064_v13 = vld [vmem:[%s4308_s8] sm:$0xff] }
 0x85e   : > { %5530 = vst [vmem:[#allocation61_spill] sm:$0xff] %v5064_v13 }
 0x861   : > { %2351 = vadd.xlane.f32.xlu1 %v2350_v7  ;;  %v5068_v7 = vld [vmem:[%s4308_s8 + $0x38] sm:$0xff] }
 0x862   : > { %5531 = vst [vmem:[#allocation19_spill] sm:$0xff] %v5068_v7 }
 0x8ad   : > { %v2124_v59 = vpop.f32.mrf.mxu0  ;;  %v2081_v24 = vpop.f32.mrf.mxu1 }
 0x8ae   : > { %v2174_v44 = vadd.f32 %v5064_v13, %v2081_v24 }
 0x8af   : > { %v2126_v5 = vpop.f32.mrf.mxu0  ;;  %v2083_v45 = vpop.f32.mrf.mxu1 }
 0x8b0   : > { %v2206_v43 = vadd.f32 %v5060_v52, %v2126_v5  ;;  %v3189_v32 = vmul.f32 -1.442695, %v2174_v44  ;;  %v3204_v44 = vld [vmem:[%s4299_s16 + $0x3] ss:$0 sm:$0xff] }
 0x8b1   : > { %v5057_v34 = vpop.f32.mrf.mxu0  ;;  %v2085_v40 = vpop.f32.mrf.mxu1  ;;  %vm2376_vm7 = vcmp.eq.s32.totalorder %v4319_v2, %v3204_v44  ;;  %vm2377_vm8 = vcmp.eq.s32.totalorder %v4323_v3, %v3204_v44 }
 0x8b2   : > { %v3193_v28 = vmul.f32 -1.442695, %v2206_v43  ;;  %v2175_v54 = vadd.f32 %v5072_v35, %v2085_v40  ;;  %v5092_v35 = vld [vmem:[%s4308_s8 + $0x8] sm:$0xff] }
 0x8b3   : > { %v2130_v14 = vpop.f32.mrf.mxu0  ;;  %v2087_v31 = vpop.f32.mrf.mxu1  ;;  %5535 = vst [vmem:[#allocation23_spill] sm:$0xff] %v5092_v35 }
 0x8b4   : > { %v2207_v10 = vadd.f32 %v5068_v7, %v2130_v14  ;;  %3611 = vpow2.f32 %v3193_v28  ;;  %v3190_v5 = vmul.f32 -1.442695, %v2175_v54  ;;  %v5080_v54 = vld [vmem:[%s4308_s8 + $0x28] sm:$0xff] }
 0x8b5   : > { %3613 = vpow2.f32 %v3189_v32  ;;  %5533 = vst [vmem:[#allocation21_spill] sm:$0xff] %v5080_v54 }
 0x8b6   : > { %v3194_v4 = vmul.f32 -1.442695, %v2207_v10 }
 0x8b8   : > { %3615 = vpow2.f32 %v3194_v4  ;;  %v5085_v4 = vld [vmem:[%s4308_s8 + $0x10] sm:$0xff] }
 0x8b9   : > { %3617 = vpow2.f32 %v3190_v5  ;;  %5534 = vst [vmem:[#allocation22_spill] sm:$0xff] %v5085_v4 }
 0x8c1   : > { %v3612_v32 = vpop.eup %3611 }
 0x8cd   : > { %v3301_v23 = vpop.f32.mrf.mxu1 }
 0x8cf   : > { %v3302_v22 = vpop.f32.mrf.mxu1 }
 0x8d0   : > { %v3303_v24 = vadd.f32 %v3302_v22, %v3301_v23  ;;  %v2189_v22 = vadd.f32 %v5080_v54, %v2087_v31  ;;  %v3614_v23 = vpop.eup %3613  ;;  %v2397_v31 = vpop.permute.xlu0 %2396 }
 0x8d1   : > { %v3304_v13 = vpop.f32.mrf.mxu1  ;;  %v3616_v5 = vpop.eup %3615 }
 0x8d2   : > { %v2220_v14 = vadd.f32 %v5060_v52, %v3303_v24  ;;  %v2214_v24 = vadd.f32 1.0, %v3612_v32  ;;  %v2215_v54 = vadd.f32 1.0, %v3616_v5 }
 0x8d3   : > { %v3305_v43 = vpop.f32.mrf.mxu1 }
 0x8d4   : > { %v3195_v21 = vmul.f32 -1.442695, %v2220_v14  ;;  %v3306_v40 = vadd.f32 %v3305_v43, %v3304_v13  ;;  %v3205_v13 = vsel %vm2376_vm7, 1.0, %v5444_v63  ;;  %v3618_v14 = vpop.eup %3617  ;;  %v3192_v43 = vmul.f32 -1.442695, %v2189_v22 }
 0x8d6   : > { %3619 = vpow2.f32 %v3195_v21  ;;  %v2221_v10 = vadd.f32 %v5068_v7, %v3306_v40  ;;  %v2202_v21 = vadd.f32 %v5085_v4, %v2124_v59  ;;  %v2395_v40 = vpop.permute.xlu1 %2394  ;;  %v2188_v59 = vadd.f32 %v5092_v35, %v2083_v45  ;;  %v5097_v7 = vld [vmem:[%s4308_s8 + $0x30] sm:$0xff] }
 0x8d7   : > { %v2400_v44 = vsel %vm409_vm3, %v3205_v13, %v2395_v40  ;;  %v2183_v4 = vadd.f32 1.0, %v3618_v14  ;;  %5536 = vst [vmem:[#allocation24_spill] sm:$0xff] %v5097_v7 }
 0x8d8   : > { %v3196_v28 = vmul.f32 -1.442695, %v2221_v10  ;;  %v3206_v10 = vsel %vm2377_vm8, 1.0, %v5444_v63  ;;  %2402 = vxpose.xlu1.b32.start [1/2] (short) (narrow) %v2400_v44, 32  ;;  %v3191_v13 = vmul.f32 -1.442695, %v2188_v59 }
 0x8d9   : > { %v2401_v32 = vsel %vm409_vm3, %v3206_v10, %v2397_v31 }
 0x8da   : > { %3621 = vpow2.f32 %v3196_v28  ;;  %v2182_v28 = vadd.f32 1.0, %v3614_v23  ;;  %v2203_v23 = vadd.f32 %v5097_v7, %v5057_v34 }
 0x8db   : > { %3623 = vtanh.f32 %v2202_v21 }
 0x8dc   : > { %3625 = vrcp.f32 %v2214_v24  ;;  %2403 = vxpose.xlu1.b32.end [2/2] (short) (narrow) %v2401_v32, 32 }
 0x8dd   : > { %3627 = vpow2.f32 %v3192_v43 }
 0x8de   : > { %3629 = vrcp.f32 %v2182_v28 }
 0x8df   : > { %3631 = vrcp.f32 %v2215_v54 }
 0x8e0   : > { %3633 = vrcp.f32 %v2183_v4 }
 0x8e3   : > { %v3620_v22 = vpop.eup %3619 }
 0x8e4   : > { %v2228_v21 = vadd.f32 1.0, %v3620_v22 }
 0x8e6   : > { %3635 = vrcp.f32 %v2228_v21 }
 0x8e7   : > { %v3622_v5 = vpop.eup %3621  ;;  %3637 = vtanh.f32 %v2203_v23 }
 0x8e8   : > { %v2229_v45 = vadd.f32 1.0, %v3622_v5  ;;  %3639 = vpow2.f32 %v3191_v13  ;;  %v3624_v24 = vpop.eup %3623 }
 0x8e9   : > { %v3626_v14 = vpop.eup %3625 }
 0x8ea   : > { %3641 = vrcp.f32 %v2229_v45  ;;  %v3628_v43 = vpop.eup %3627  ;;  %v2236_v31 = vmul.f32 %v3626_v14, %v4980_v6 }
 0x8eb   : > { %v3630_v40 = vpop.eup %3629  ;;  %v2197_v23 = vadd.f32 1.0, %v3628_v43 }
 0x8ec   : > { %v3632_v10 = vpop.eup %3631  ;;  %v2234_v54 = vmul.f32 %v3630_v40, %v3624_v24 }
 0x8ed   : > { %v3634_v28 = vpop.eup %3633  ;;  %v2237_v44 = vmul.f32 %v3632_v10, %v4982_v8  ;;  %3643 = vrcp.f32 %v2197_v23 }
 0x8ee   : > { %v2238_v32 = vadd.f32 %v2236_v31, %v2234_v54 }
 0x8f3   : > { %v3636_v34 = vpop.eup %3635 }
 0x8f4   : > { %v2240_v4 = vmul.f32 %v3636_v34, %v4984_v61  ;;  %v3638_v59 = vpop.eup %3637 }
 0x8f5   : > { %v3640_v22 = vpop.eup %3639  ;;  %v2235_v21 = vmul.f32 %v3638_v59, %v3634_v28  ;;  %v5557_v59 = vld [vmem:[#allocation62_spill] sm:$0xff] }
 0x8f6   : > { %v2242_v5 = vadd.f32 %v2240_v4, %v2238_v32  ;;  %v2196_v35 = vadd.f32 1.0, %v3640_v22 }
 0x8f7   : > { %v3642_v13 = vpop.eup %3641  ;;  %v2239_v45 = vadd.f32 %v2237_v44, %v2235_v21 }
 0x8f8   : > { %v2241_v7 = vmul.f32 %v3642_v13, %v5055_v41  ;;  %3645 = vtanh.f32 %v2242_v5 }
 0x8fa   : > { %v2243_v6 = vadd.f32 %v2241_v7, %v2239_v45  ;;  %v3644_v8 = vpop.eup %3643 }
 0x8fc   : > { %3647 = vtanh.f32 %v2243_v6  ;;  %2301 = vmatprep.subr.mxu0 %v2243_v6 }
 0x8fd   : > { %3649 = vrcp.f32 %v2196_v35  ;;  %v2355_v35 = vpop.xlane.xlu1 %2354 }
 0x8fe   : > { %vm2357_vm9 = vcmp.gt.f32.partialorder %v2355_v35, 0.0 }
 0x901   : > { %v2352_v41 = vpop.xlane.xlu1 %2351 }
 0x902   : > { %vm2356_vm10 = vcmp.gt.f32.partialorder %v2352_v41, 0.0  ;;  %v5559_v41 = vld [vmem:[#allocation19_spill] sm:$0xff] }
 0x905   : > { %v3646_v24 = vpop.eup %3645 }
 0x909   : > { %v3648_v61 = vpop.eup %3647 }
 0x90a   : > { %v2247_v14 = vmul.f32 %v3648_v61, %v3644_v8  ;;  %v3650_v40 = vpop.eup %3649 }
 0x90b   : > { %v2246_v43 = vmul.f32 %v3650_v40, %v3646_v24 }
 0x90c   : > { %2302 = vmatpush1.msra.mxu0 %v2247_v14 }
 0x90d   : > { %2303 = vmatprep.subr.mxu0 %v2242_v5 }
 0x90e   : > { %2304 = vmatpush1.msra.mxu0 %v2246_v43  ;;  %v5558_v43 = vld [vmem:[#allocation61_spill] sm:$0xff] }
 0x90f   : > { %3199 = vmatmul.mubr.msk.f32.vlgmr.msra.gmra.mxu0 %vm409_vm3, %v5051_v9 }
 0x910   : > { %2343 = vmatprep.mubr.f32.mxu0 %v5444_v63 }
 0x913   : > { %3200 = vmatmul.mubr.msk.f32.gmra.mxu0 %vm409_vm3, %v5046_v25 }
 0x914   : > { %2510 = vmatprep.mubr.f32.mxu0 %v5444_v63 }
 0x954   : > { %v2418_v31 = vpop.trf.xlu1 }
 0x958   : > { %v2419_v44 = vpop.trf.xlu1 }
 0x9cf   : > { %v2339_v7 = vpop.f32.mrf.mxu0 }
 0x9d0   : > { %v5123_v4 = vsel %vm2356_vm10, %v2339_v7, %v4870_v46  ;;  %v5538_v46 = vld [vmem:[#allocation37_spill] sm:$0xff] }
 0x9d1   : > { %v2341_v10 = vpop.f32.mrf.mxu0 }
 0x9d2   : > { %v5120_v25 = vsel %vm2356_vm10, %v2341_v10, %v4867_v49  ;;  %v5537_v49 = vld [vmem:[#allocation36_spill] sm:$0xff] }
 0x9d3   : > { %v2345_v28 = vpop.f32.mrf.mxu0 }
 0x9d4   : > { %v5115_v9 = vsel %vm2357_vm9, %v2345_v28, %v4862_v42 }
 0x9d5   : > { %v2347_v34 = vpop.f32.mrf.mxu0 }
 0x9d6   : > { %v5112_v54 = vsel %vm2357_vm9, %v2347_v34, %v4859_v48  ;;  %v2420_v48 = vpop.trf.xlu1 }
 0x9d7   : > { %2474 = vmatprep.subr.mxu0 %v5112_v54 }
 0x9d8   : > { %2475 = vmatpush1.msra.mxu0 %v5115_v9 }
 0x9d9   : > { %2476 = vmatprep.subr.mxu0 %v5120_v25 }
 0x9da   : > { %2477 = vmatpush1.msra.mxu0 %v5123_v4  ;;  %v2421_v42 = vpop.trf.xlu1 }
 0x9db   : > { %3210 = vmatmul.mubr.msk.f32.vlgmr.msra.gmra.mxu0 %vm409_vm3, %v2418_v31  ;;  %2537 = vmatprep.subr.bf16.mxu0 %v4875_v29  ;;  %v5539_v29 = vld [vmem:[#allocation38_spill] sm:$0xff]  ;;  %v5560_v31 = vld [vmem:[#allocation20_spill] sm:$0xff] }
 0x9dc   : > { %2516 = vmatprep.mubr.f32.mxu0 %v5444_v63  ;;  %2538 = vmatpush1.bf16.msra.mxu0 %v4879_v39  ;;  %v5540_v39 = vld [vmem:[#allocation39_spill] sm:$0xff] }
 0x9dd   : > { %2539 = vmatprep.subr.bf16.mxu0 %v4882_v30 }
 0x9df   : > { %3211 = vmatmul.mubr.msk.f32.gmra.mxu0 %vm409_vm3, %v2419_v44 }
 0x9e0   : > { %2522 = vmatprep.mubr.f32.mxu0 %v5444_v63  ;;  %2540 = vmatpush1.bf16.msra.mxu0 %v4887_v38 }
 0x9e1   : > { %2541 = vmatprep.subr.bf16.mxu0 %v4890_v51 }
 0x9e3   : > { %3212 = vmatmul.mubr.msk.f32.gmra.mxu0 %vm409_vm3, %v2420_v48 }
 0x9e4   : > { %2528 = vmatprep.mubr.f32.mxu0 %v5444_v63  ;;  %2542 = vmatpush1.bf16.msra.mxu0 %v4895_v55 }
 0x9e5   : > { %2543 = vmatprep.subr.bf16.mxu0 %v4898_v53 }
 0x9e7   : > { %3213 = vmatmul.mubr.msk.f32.gmra.mxu0 %vm409_vm3, %v2421_v42 }
 0x9e8   : > { %2544 = vmatpush1.bf16.msra.mxu0 %v4902_v56 }
 0x9e9   : > { %2545 = vmatprep.subr.bf16.mxu0 %v4905_v60 }
 0x9ec   : > { %2546 = vmatpush1.bf16.msra.mxu0 %v4908_v62 }
 0x9ed   : > { %2547 = vmatprep.subr.bf16.mxu0 %v4911_v26 }
 0x9f0   : > { %2548 = vmatpush1.bf16.msra.mxu0 %v4914_v37  ;;  %v5541_v37 = vld [vmem:[#allocation40_spill] sm:$0xff] }
 0x9f1   : > { %2549 = vmatprep.subr.bf16.mxu0 %v4917_v27  ;;  %v5542_v27 = vld [vmem:[#allocation41_spill] sm:$0xff] }
 0x9f4   : > { %2550 = vmatpush1.bf16.msra.mxu0 %v4920_v50  ;;  %v5543_v50 = vld [vmem:[#allocation42_spill] sm:$0xff] }
 0x9f5   : > { %2551 = vmatprep.subr.bf16.mxu0 %v4923_v12  ;;  %v5544_v12 = vld [vmem:[#allocation43_spill] sm:$0xff] }
 0x9f8   : > { %2552 = vmatpush1.bf16.msra.mxu0 %v4926_v47  ;;  %v5545_v47 = vld [vmem:[#allocation44_spill] sm:$0xff] }
 0x9f9   : > { %2553 = vmatprep.subr.bf16.mxu0 %v4929_v58  ;;  %v5546_v58 = vld [vmem:[#allocation47_spill] sm:$0xff] }
 0x9fc   : > { %2554 = vmatpush2.bf16.msra.mxu0 %v4932_v33  ;;  %v5547_v33 = vld [vmem:[#allocation48_spill] sm:$0xff] }
 0x9fd   : > { %2555 = vmatprep.subr.bf16.mxu0 %v4935_v36  ;;  %v5548_v36 = vld [vmem:[#allocation51_spill] sm:$0xff] }
 0xa00   : > { %2556 = vmatpush2.bf16.msra.mxu0 %v4938_v11  ;;  %v5549_v11 = vld [vmem:[#allocation52_spill] sm:$0xff] }
 0xa01   : > { %2557 = vmatprep.subr.bf16.mxu0 %v4941_v1  ;;  %v5550_v1 = vld [vmem:[#allocation55_spill] sm:$0xff] }
 0xa04   : > { %2558 = vmatpush2.bf16.msra.mxu0 %v4944_v15  ;;  %v5551_v15 = vld [vmem:[#allocation56_spill] sm:$0xff] }
 0xa05   : > { %2559 = vmatprep.subr.bf16.mxu0 %v4947_v0  ;;  %v5552_v0 = vld [vmem:[#allocation57_spill] sm:$0xff] }
 0xa08   : > { %2560 = vmatpush2.bf16.msra.mxu0 %v4950_v57  ;;  %v5553_v57 = vld [vmem:[#allocation58_spill] sm:$0xff] }
 0xa09   : > { %2561 = vmatprep.subr.bf16.mxu0 %v4953_v16  ;;  %v5554_v16 = vld [vmem:[#allocation59_spill] sm:$0xff] }
 0xa0c   : > { %2562 = vmatpush2.bf16.msra.mxu0 %v4956_v17  ;;  %v5555_v17 = vld [vmem:[#allocation60_spill] sm:$0xff] }
 0xa0d   : > { %2563 = vmatprep.subr.bf16.mxu0 %v4959_v18  ;;  %v3201_v18 = vld [vmem:[%s4292_s0 + $0x3] sm:$0x1] }
 0xa0e   : > { %vm2744_vm11 = vcmp.gt.s32.totalorder %v3201_v18, 0  ;;  %v2741_v32 = vrot.slane %v3201_v18, %v5557_v59  ;;  %v5564_v18 = vld [vmem:[#allocation24_spill] sm:$0xff] }
 0xa10   : > { %2564 = vmatpush2.bf16.msra.mxu0 %v4962_v19  ;;  %v5556_v19 = vmov 0   ;;  %vm2742_vm12 = vcmp.eq.s32.totalorder %v4319_v2, %v2741_v32  ;;  %vm2743_vm15 = vcmp.eq.s32.totalorder %v4323_v3, %v2741_v32 }
 0xa11   : > { %2565 = vmatprep.subr.bf16.mxu0 %v4965_v20  ;;  %v2745_v20 = vsel %vm2744_vm11, 1, %v5556_v19 }
 0xa12   : > { %v2749_v22 = vrot.slane %v2745_v20, %v5557_v59 }
 0xa14   : > { %2566 = vmatpush2.bf16.msra.mxu0 %v5537_v49  ;;  %vm2750_vm13 = vcmp.eq.s32.totalorder %v2749_v22, 1 }
 0xa15   : > { %2567 = vmatprep.subr.bf16.mxu0 %v5538_v46  ;;  %vm2751_vm14 = vmand %vm2742_vm12, %vm2750_vm13 }
 0xa16   : > { %vm2752_vm0 = vmand %vm2743_vm15, %vm2750_vm13  ;;  %v5196_v23 = vsel %vm2751_vm14, 1.0, %v5444_v63 }
 0xa17   : > { %v2840_v21 = vsel %vm409_vm3, %v5196_v23, 0.0  ;;  %v5201_v13 = vsel %vm2752_vm0, 1.0, %v5444_v63 }
 0xa18   : > { %2568 = vmatpush2.bf16.msra.mxu0 %v5539_v29  ;;  %2841 = vadd.xlane.f32.xlu0 %v2840_v21  ;;  %v2843_v5 = vsel %vm409_vm3, %v5201_v13, 0.0 }
 0xa19   : > { %3307 = vmatprep.subr.bf16.mxu0 %v5540_v39 }
 0xa1c   : > { %2844 = vadd.xlane.f32.xlu0 %v2843_v5 }
 0xa9b   : > { %v2512_v30 = vpop.f32.mrf.mxu0 }
 0xa9d   : > { %v5167_v38 = vpop.f32.mrf.mxu0 }
 0xa9f   : > { %v2518_v51 = vpop.f32.mrf.mxu0 }
 0xaa0   : > { %v2535_v26 = vpack.c.bf16 %v2518_v51, %v2512_v30 }
 0xaa1   : > { %v5169_v55 = vpop.f32.mrf.mxu0 }
 0xaa3   : > { %v2524_v53 = vpop.f32.mrf.mxu0 }
 0xaa5   : > { %v5171_v56 = vpop.f32.mrf.mxu0 }
 0xaa7   : > { %v2530_v60 = vpop.f32.mrf.mxu0 }
 0xaa8   : > { %v2536_v62 = vpack.c.bf16 %v2530_v60, %v2524_v53 }
 0xaa9   : > { %v5205_v45 = vpop.f32.mrf.mxu0 }
 0xaaa   : > { %2569 = vmatprep.mubr.bf16.mxu0 %v2536_v62  ;;  %2612 = vmatprep.mubr.bf16.mxu1 %v2536_v62 }
 0xaab   : > { %2570 = vmatmul.mubr.bf16.vlgmr.msra.gmra.mxu0 %v2535_v26  ;;  %2613 = vmatmul.mubr.bf16.vlgmr.msra.gmra.mxu1 %v2535_v26 }
 0xaac   : > { %3308 = vmatpush3.bf16.msra.mxu0 %v5541_v37  ;;  %2655 = vmatprep.mubr.bf16.mxu0 %v2536_v62 }
 0xaad   : > { %3309 = vmatprep.subr.bf16.mxu0 %v5542_v27  ;;  %2827 = vmatprep.mubr.f32.mxu1 %v5444_v63  ;;  %v5561_v27 = vld [vmem:[#allocation21_spill] sm:$0xff] }
 0xab0   : > { %3310 = vmatpush3.bf16.msra.mxu0 %v5543_v50 }
 0xab1   : > { %3311 = vmatprep.subr.bf16.mxu0 %v5544_v12 }
 0xab4   : > { %3312 = vmatpush3.bf16.msra.mxu0 %v5545_v47  ;;  %v5562_v47 = vld [vmem:[#allocation22_spill] sm:$0xff] }
 0xab5   : > { %3313 = vmatprep.subr.bf16.mxu0 %v5546_v58 }
 0xab8   : > { %3314 = vmatpush3.bf16.msra.mxu0 %v5547_v33 }
 0xab9   : > { %3315 = vmatprep.subr.bf16.mxu0 %v5548_v36 }
 0xabc   : > { %3316 = vmatpush3.bf16.msra.mxu0 %v5549_v11 }
 0xabd   : > { %3317 = vmatprep.subr.bf16.mxu0 %v5550_v1 }
 0xac0   : > { %3318 = vmatpush3.bf16.msra.mxu0 %v5551_v15 }
 0xac1   : > { %3319 = vmatprep.subr.bf16.mxu0 %v5552_v0  ;;  %v5563_v0 = vld [vmem:[#allocation23_spill] sm:$0xff] }
 0xac4   : > { %3320 = vmatpush3.bf16.msra.mxu0 %v5553_v57 }
 0xac5   : > { %3321 = vmatprep.subr.bf16.mxu0 %v5554_v16 }
 0xac8   : > { %3322 = vmatpush3.bf16.msra.mxu0 %v5555_v17 }
 0xacb   : > { %2656 = vmatmul.mubr.bf16.vlgmr.msra.gmra.mxu0 %v2535_v26 }
 0xb6b   : > { %v2614_v2 = vpop.f32.mrf.mxu1  ;;  %v2571_v3 = vpop.f32.mrf.mxu0 }
 0xb6c   : > { %v2664_v35 = vadd.f32 %v5558_v43, %v2571_v3  ;;  %v2692_v58 = vadd.f32 %v5562_v47, %v2614_v2 }
 0xb6d   : > { %v2616_v6 = vpop.f32.mrf.mxu1  ;;  %v2573_v24 = vpop.f32.mrf.mxu0 }
 0xb6e   : > { %v2696_v61 = vadd.f32 %v5060_v52, %v2616_v6  ;;  %v3214_v34 = vmul.f32 -1.442695, %v2664_v35  ;;  %v2678_v57 = vadd.f32 %v5563_v0, %v2573_v24 }
 0xb6f   : > { %v2618_v8 = vpop.f32.mrf.mxu1  ;;  %v2575_v40 = vpop.f32.mrf.mxu0 }
 0xb70   : > { %v3218_v10 = vmul.f32 -1.442695, %v2696_v61  ;;  %v2665_v28 = vadd.f32 %v5560_v31, %v2575_v40  ;;  %v2693_v19 = vadd.f32 %v5564_v18, %v2618_v8  ;;  %v3216_v59 = vmul.f32 -1.442695, %v2678_v57 }
 0xb71   : > { %v2620_v14 = vpop.f32.mrf.mxu1  ;;  %v2577_v44 = vpop.f32.mrf.mxu0 }
 0xb72   : > { %v2697_v7 = vadd.f32 %v5559_v41, %v2620_v14  ;;  %3651 = vpow2.f32 %v3218_v10  ;;  %v3215_v42 = vmul.f32 -1.442695, %v2665_v28  ;;  %v2679_v50 = vadd.f32 %v5561_v27, %v2577_v44 }
 0xb73   : > { %3653 = vpow2.f32 %v3214_v34 }
 0xb74   : > { %v3219_v48 = vmul.f32 -1.442695, %v2697_v7  ;;  %v3217_v1 = vmul.f32 -1.442695, %v2679_v50 }
 0xb76   : > { %3655 = vpow2.f32 %v3219_v48 }
 0xb77   : > { %3657 = vpow2.f32 %v3215_v42 }
 0xb7f   : > { %v3652_v37 = vpop.eup %3651 }
 0xb80   : > { %v3654_v12 = vpop.eup %3653  ;;  %v2704_v36 = vadd.f32 1.0, %v3652_v37 }
 0xb81   : > { %v2672_v15 = vadd.f32 1.0, %v3654_v12 }
 0xb83   : > { %v3656_v33 = vpop.eup %3655 }
 0xb84   : > { %v3658_v11 = vpop.eup %3657 }
 0xb85   : > { %v2673_v16 = vadd.f32 1.0, %v3658_v11 }
 0xb8b   : > { %v3323_v49 = vpop.f32.mrf.mxu0 }
 0xb8d   : > { %v3324_v46 = vpop.f32.mrf.mxu0 }
 0xb8e   : > { %v3325_v29 = vadd.f32 %v3324_v46, %v3323_v49 }
 0xb8f   : > { %v3326_v39 = vpop.f32.mrf.mxu0 }
 0xb90   : > { %v2710_v30 = vadd.f32 %v5060_v52, %v3325_v29  ;;  %v2705_v52 = vadd.f32 1.0, %v3656_v33 }
 0xb91   : > { %v3327_v51 = vpop.f32.mrf.mxu0 }
 0xb92   : > { %v3220_v53 = vmul.f32 -1.442695, %v2710_v30  ;;  %v3328_v60 = vadd.f32 %v3327_v51, %v3326_v39 }
 0xb94   : > { %3659 = vpow2.f32 %v3220_v53  ;;  %v2711_v62 = vadd.f32 %v5559_v41, %v3328_v60 }
 0xb96   : > { %v3221_v26 = vmul.f32 -1.442695, %v2711_v62 }
 0xb98   : > { %3661 = vpow2.f32 %v3221_v26 }
 0xb99   : > { %3663 = vtanh.f32 %v2692_v58 }
 0xb9a   : > { %3665 = vrcp.f32 %v2704_v36 }
 0xb9b   : > { %3667 = vpow2.f32 %v3217_v1 }
 0xb9c   : > { %3669 = vrcp.f32 %v2672_v15 }
 0xb9d   : > { %3671 = vrcp.f32 %v2705_v52 }
 0xb9e   : > { %3673 = vrcp.f32 %v2673_v16 }
 0xba1   : > { %v3660_v17 = vpop.eup %3659 }
 0xba2   : > { %v2718_v20 = vadd.f32 1.0, %v3660_v17 }
 0xba4   : > { %3675 = vrcp.f32 %v2718_v20 }
 0xba5   : > { %v3662_v32 = vpop.eup %3661  ;;  %3677 = vtanh.f32 %v2693_v19 }
 0xba6   : > { %v2719_v22 = vadd.f32 1.0, %v3662_v32  ;;  %3679 = vpow2.f32 %v3216_v59  ;;  %v3664_v21 = vpop.eup %3663 }
 0xba7   : > { %v3666_v5 = vpop.eup %3665 }
 0xba8   : > { %3681 = vrcp.f32 %v2719_v22  ;;  %v3668_v2 = vpop.eup %3667  ;;  %v2726_v24 = vmul.f32 %v3666_v5, %v5167_v38 }
 0xba9   : > { %v3670_v6 = vpop.eup %3669  ;;  %v2687_v10 = vadd.f32 1.0, %v3668_v2 }
 0xbaa   : > { %v3672_v3 = vpop.eup %3671  ;;  %v2724_v8 = vmul.f32 %v3670_v6, %v3664_v21 }
 0xbab   : > { %v3674_v61 = vpop.eup %3673  ;;  %v2727_v40 = vmul.f32 %v3672_v3, %v5169_v55  ;;  %3683 = vrcp.f32 %v2687_v10 }
 0xbac   : > { %v2728_v41 = vadd.f32 %v2726_v24, %v2724_v8 }
 0xbb1   : > { %v3676_v14 = vpop.eup %3675 }
 0xbb2   : > { %v2730_v43 = vmul.f32 %v3676_v14, %v5171_v56  ;;  %v3678_v35 = vpop.eup %3677 }
 0xbb3   : > { %v3680_v7 = vpop.eup %3679  ;;  %v2725_v31 = vmul.f32 %v3678_v35, %v3674_v61 }
 0xbb4   : > { %v2732_v34 = vadd.f32 %v2730_v43, %v2728_v41  ;;  %v2686_v42 = vadd.f32 1.0, %v3680_v7 }
 0xbb5   : > { %v3682_v28 = vpop.eup %3681  ;;  %v2729_v44 = vadd.f32 %v2727_v40, %v2725_v31 }
 0xbb6   : > { %v2731_v48 = vmul.f32 %v3682_v28, %v5205_v45  ;;  %3685 = vtanh.f32 %v2732_v34  ;;  %v2842_v45 = vpop.xlane.xlu0 %2841 }
 0xbb7   : > { %vm2846_vm1 = vcmp.gt.f32.partialorder %v2842_v45, 0.0 }
 0xbb8   : > { %v2733_v38 = vadd.f32 %v2731_v48, %v2729_v44  ;;  %v3684_v55 = vpop.eup %3683 }
 0xbba   : > { %3687 = vtanh.f32 %v2733_v38  ;;  %2791 = vmatprep.subr.mxu1 %v2733_v38  ;;  %v2845_v30 = vpop.xlane.xlu0 %2844 }
 0xbbb   : > { %3689 = vrcp.f32 %v2686_v42  ;;  %vm2847_vm2 = vcmp.gt.f32.partialorder %v2845_v30, 0.0 }
 0xbc3   : > { %v3686_v56 = vpop.eup %3685 }
 0xbc7   : > { %v3688_v49 = vpop.eup %3687 }
 0xbc8   : > { %v2737_v46 = vmul.f32 %v3688_v49, %v3684_v55  ;;  %v3690_v29 = vpop.eup %3689 }
 0xbc9   : > { %v2736_v39 = vmul.f32 %v3690_v29, %v3686_v56 }
 0xbca   : > { %2792 = vmatpush1.msra.mxu1 %v2737_v46 }
 0xbcb   : > { %2793 = vmatprep.subr.mxu1 %v2732_v34 }
 0xbcc   : > { %2794 = vmatpush1.msra.mxu1 %v2736_v39 }
 0xbcd   : > { %3224 = vmatmul.mubr.msk.f32.vlgmr.msra.gmra.mxu1 %vm409_vm3, %v5196_v23 }
 0xbce   : > { %2833 = vmatprep.mubr.f32.mxu1 %v5444_v63 }
 0xbd1   : > { %3225 = vmatmul.mubr.msk.f32.gmra.mxu1 %vm409_vm3, %v5201_v13 }
 0xc8d   : > { %v2829_v51 = vpop.f32.mrf.mxu1 }
 0xc8e   : > { %v2852_v53 = vsel %vm2846_vm1, %v2829_v51, %v5123_v4 }
 0xc8f   : > { %2856 = vst [vmem:[%s373_s11] sm:$0xff] %v2852_v53  ;;  %v2831_v60 = vpop.f32.mrf.mxu1 }
 0xc90   : > { %v2853_v23 = vsel %vm2846_vm1, %v2831_v60, %v5120_v25 }
 0xc91   : > { %2857 = vst [vmem:[%s373_s11 + $0x8] sm:$0xff] %v2853_v23  ;;  %v2835_v63 = vpop.f32.mrf.mxu1 }
 0xc92   : > { %v2854_v13 = vsel %vm2847_vm2, %v2835_v63, %v5115_v9 }
 0xc93   : > { %2858 = vst [vmem:[%s373_s11 + $0x10] sm:$0xff] %v2854_v13  ;;  %v2837_v4 = vpop.f32.mrf.mxu1 }
 0xc94   : > { %v2855_v62 = vsel %vm2847_vm2, %v2837_v4, %v5112_v54 }
 0xc95   : > { %2859 = vst [vmem:[%s373_s11 + $0x18] sm:$0xff] %v2855_v62 }
 0xc96   : > { %3930 = shalt.err (!%p3927_p2)
}
 0xc97   : > { %s3931_s0 = scalar_lea.hbm %s5236_s26, 512  ;;  %s3935_s16 = scalar_lea.hbm %s5286_s5, 1024 }
 0xc98   : > { %p3932_p3 = scmp.ne.s32.totalorder %s5236_s26, %s3931_s0  ;;  %p3936_p8 = scmp.lt.s32.totalorder %s5236_s26, %s5286_s5 }
 0xc99   : > { %p3937_p4 = scmp.lt.s32.totalorder %s3935_s16, %s3931_s0 }
 0xc9a   : > { %p3933_p7 = pnand %p3932_p3, %p5565_p1 }
 0xc9b   : > { %p3938_p9 = por %p3937_p4, %p3936_p8 }
 0xc9c   : > { %p3934_p11 = pneg %p3933_p7 }
 0xc9e   : > { %p3939_p10 = pnand %p3938_p9, %p3934_p11 }
 0xca0   : > { %3942 = shalt.err (!%p3939_p10)
}
 0xca1   : > { %s4010_s28 = smov 256  }
 0xca2   : > { %3349 = dma.vmem_to_hbm [thread:$0]  (%p5565_p1), %s5230_s4, 512, %s5236_s26, %s2861_s22, %s4010_s28, %s4010_s28, %s4007_s29  }
 0xca3 PF: > { %s2889_s8 = sand.u32 1, %s3981_s18   ;;  %p5566_p5 = scmp.ne.s32.totalorder %s5391_s6, 0 }
 0xca4   : > { %p5567_p12 = scmp.ge.s32.totalorder %s3993_s21, 2  ;;  %s2890_s1 = scalar_lea.sflag [#allocation4], %s2889_s8 }
 0xca6   : > { %p3369_p6 = pnand %p5567_p12, %p5566_p5 }
 0xca8   : > { %p3370_p13 = pneg %p3369_p6 }
 0xcaa   : > { %3976 = dma.done.wait (%p3370_p13), %s2890_s1, 512  }
 0xcab   : > { %3978 = vsyncadd (%p3370_p13), %s2890_s1, 4294966784  ;;  %s5568_s30 = sld [smem:[#allocation17_spill]]  ;;  %p24_p0 = scmp.ge.s32.totalorder %s4066_s24, 4  }
 0xcac   : > { %s5569_s20 = sld [smem:[#allocation18_spill]]  ;;  %s5570_s18 = smov %s3985_s19 }
 0xcad   : > { %s5572_s21 = smov %s4066_s24  ;;  %26 = sbr.rel (!%p24_p0) target bundleno = 13 (0xd), region = 135 }
 0xcb1   : > { %s5571_s19 = smov %s5568_s30 }
 0xcb2   :  { %2895 = vsyncpa [#allocation3], 1 }
 0xcb3   :  { %2897 = vsyncpa [#allocation3 + $0x1], 1 }
 0xcb4   :  { %2898 = vsyncpa [#allocation6], 1 }
 0xcb5   :  { %2900 = vsyncpa [#allocation6 + $0x1], 1 }
 0xcb6   :  { %2901 = vsyncpa [#allocation9], 1 }
 0xcb7   :  { %2903 = vsyncpa [#allocation9 + $0x1], 1 }
 0xcb8   :  { %2904 = vsyncpa [#allocation4], 1 }
 0xcb9   :  { %2906 = vsyncpa [#allocation4 + $0x1], 1 }

</bundles_post_ra>
